<compile_context>
chip_gen: v7x
topology: tpu7x:2x2x1
jax: 0.10.0
libtpu: 0.0.40
codegen_flags: <defaults>
</compile_context>

<pallas_src>
import jax
import jax.numpy as jnp
from jax.experimental import pallas as pl
from jax.experimental.pallas import tpu as pltpu


def _gelu_exact(x):
    # torch nn.GELU() default = exact (erf-based) GELU
    return jax.nn.gelu(x, approximate=False)


def _gelu_kernel(x):
    # tanh form: transcendental rides the EUP slot instead of a long VALU
    # erf polynomial (v6e/v7x review item).  Error << bf16 rounding here.
    return jax.nn.gelu(x, approximate=True)


def _round_up(x, m):
    return (x + m - 1) // m * m


# ---------------------------------------------------------------------------
# In-kernel building blocks
# ---------------------------------------------------------------------------
def _linear(h, w_ref, b_ref):
    """y = h @ W + b.  bf16 operands, f32 accumulation.  K==1 -> VPU fma."""
    w = w_ref[...]
    b = b_ref[...]
    if w.shape[0] == 1:
        # [rows, 1] * [1, out]: broadcast multiply-add on the VPU, skip MXU
        # fill/drain for a single useful contraction element.
        return h.astype(jnp.float32) * w.astype(jnp.float32) + b
    return jnp.dot(h.astype(jnp.bfloat16), w,
                   preferred_element_type=jnp.float32) + b


def _mlp_layers(h, layer_refs):
    """Apply an MLP given a list of (w_ref, b_ref); GELU between all but last."""
    for w_ref, b_ref in layer_refs[:-1]:
        h = _gelu_kernel(_linear(h, w_ref, b_ref))
    w_ref, b_ref = layer_refs[-1]
    return _linear(h, w_ref, b_ref)


def _make_fused_kernel(trunk_layer_counts, C, total_width):
    """Fused kernel: dense trunk stack + per-channel contraction for one row tile."""
    num_trunk = len(trunk_layer_counts)
    inner = total_width // C

    def kernel(*refs):
        # refs: g, xb, bvec, (w, b) * trunk layers, out_ref, basis_scratch
        g_ref, xb_ref, bvec_ref = refs[0], refs[1], refs[2]
        p = 3
        trunk_refs = []
        for n_layers in trunk_layer_counts:
            mlp = [(refs[p + 2 * j], refs[p + 2 * j + 1]) for j in range(n_layers)]
            p += 2 * n_layers
            trunk_refs.append(mlp)
        out_ref = refs[p]
        basis_ref = refs[p + 1]            # bf16 scratch [bn, total_width]

        # ---- dense trunk stack: outputs written into bf16 column slices ----
        h0 = _mlp_layers(g_ref[...], trunk_refs[0])          # [bn, 128*C] f32
        cur = h0.shape[1]
        basis_ref[:, 0:cur] = h0.astype(jnp.bfloat16)
        for i in range(1, num_trunk):
            nb = _mlp_layers(basis_ref[:, 0:cur], trunk_refs[i])
            basis_ref[:, cur:cur + nb.shape[1]] = nb.astype(jnp.bfloat16)
            cur += nb.shape[1]

        # ---- per-channel contraction: out[c] = xb_c @ basis_c^T + b[c] ----
        # xb_c is already bf16 (hoisted branch output); result is lane-dense
        # along the row tile (last dim of the out block = bn).
        for c in range(C):
            xc = xb_ref[:, c * inner:(c + 1) * inner]        # [B_pad, inner] bf16
            bc = basis_ref[:, c * inner:(c + 1) * inner]     # [bn, inner]   bf16
            out_ref[0, c, :, :] = (
                jax.lax.dot_general(
                    xc, bc,
                    dimension_numbers=(((1,), (1,)), ((), ())),
                    preferred_element_type=jnp.float32)
                + bvec_ref[c])

    return kernel


# ---------------------------------------------------------------------------
# Tiling choice
# ---------------------------------------------------------------------------
def _pick_bn(N, total_width):
    n_rows = _round_up(max(N, 8), 8)
    bn = 512
    # keep bf16 basis scratch <= 4 MiB so everything (weights x2 buffers +
    # scratch + blocks) stays under even v5e's 16 MiB default scoped VMEM.
    while bn > 8 and bn * total_width * 2 > (4 << 20):
        bn //= 2
    bn = max(8, min(bn, n_rows))
    # give both v7x TensorCores work: at least 2 grid steps whenever N allows.
    while bn > 8 and _round_up(N, bn) // bn < 2:
        bn = max(8, _round_up(bn // 2, 8))
    return bn


# ---------------------------------------------------------------------------
# Forward pass (single fused pallas_call)
# ---------------------------------------------------------------------------
def dense_don1d_forward(params, x, grid):
    q, C, L = params['query_dim'], params['out_channel'], params['num_layers']
    g = grid[0]
    N = g.shape[0]
    g = g.reshape(N, q).astype(jnp.float32)
    B = x.shape[0]
    xf = x.reshape(B, -1).astype(jnp.float32)
    total_width = 128 * C * (2 ** (L - 1))

    # --- branch MLP hoisted to the wrapper (same on every tile, negligible) ---
    def mlp(h, layers):
        for w, b in layers[:-1]:
            h = _gelu_exact(jnp.dot(h, w, precision="highest") + b)
        w, b = layers[-1]
        return jnp.dot(h, w, precision="highest") + b

    xb = mlp(xf, params['branch'])                      # [B, total_width] f32

    # --- row tiling over grid points ---
    bn = _pick_bn(N, total_width)
    N_pad = _round_up(N, bn)
    T = N_pad // bn
    if N_pad != N:
        g = jnp.pad(g, ((0, N_pad - N), (0, 0)))
    B_pad = _round_up(max(B, 8), 8)
    xb = jnp.pad(xb, ((0, B_pad - B), (0, 0))).astype(jnp.bfloat16)

    # Flatten trunk params.  Weights pre-cast to bf16 (MXU operands / half the
    # DMA bytes); biases stay f32.  All grid-resident (constant index_map).
    flat_params = []
    in_specs = [
        pl.BlockSpec((bn, q), lambda i: (i, 0)),                 # grid-point tile
        pl.BlockSpec((B_pad, total_width), lambda i: (0, 0)),    # branch output (resident)
        pl.BlockSpec(memory_space=pltpu.MemorySpace.SMEM),       # output bias vector
    ]

    def add_mlp(layers):
        for (w, b) in layers:
            wb = w.astype(jnp.bfloat16)
            flat_params.append(wb)
            in_specs.append(pl.BlockSpec(wb.shape, lambda i: (0, 0)))
            flat_params.append(b)
            in_specs.append(pl.BlockSpec(b.shape, lambda i: (0, 0)))
        return len(layers)

    trunk_counts = [add_mlp(m) for m in params['trunk']]

    kernel = _make_fused_kernel(trunk_counts, C, total_width)

    # Advisory cost estimate so XLA overlaps the wrapper-side branch MLP and
    # the output transpose with the kernel.
    trunk_macs_per_row = sum(w.shape[0] * w.shape[1]
                             for m in params['trunk'] for (w, _) in m)
    trunk_trans_per_row = sum(w.shape[1]
                              for m in params['trunk'] for (w, _) in m[:-1])
    weight_bytes = sum(w.size * 2 + b.size * 4
                       for m in params['trunk'] for (w, b) in m)
    cost = pl.CostEstimate(
        flops=int(2 * N_pad * trunk_macs_per_row + 2 * B_pad * N_pad * total_width),
        transcendentals=int(N_pad * trunk_trans_per_row),
        bytes_accessed=int(weight_bytes + g.size * 4 + xb.size * 2
                           + T * C * B_pad * bn * 4))

    # VMEM budget; only raise the scoped limit when the footprint needs it.
    basis_bytes = bn * total_width * 2
    out_block_bytes = C * B_pad * bn * 4
    vmem_need = (2 * weight_bytes + basis_bytes + 2 * out_block_bytes
                 + 2 * bn * q * 4 + 2 * xb.size * 2 + (2 << 20))
    cp_kwargs = dict(dimension_semantics=("parallel",))   # shard row tiles across TCs
    if vmem_need > (12 << 20):
        cp_kwargs['vmem_limit_bytes'] = int(vmem_need + (4 << 20))

    out = pl.pallas_call(
        kernel,
        grid=(T,),
        in_specs=in_specs,
        # Block last dim == full array last dim (bn), so bn is decoupled from
        # the 128-lane divisibility rule and stores stay dense per block.
        out_specs=pl.BlockSpec((1, C, B_pad, bn), lambda i: (i, 0, 0, 0)),
        out_shape=jax.ShapeDtypeStruct((T, C, B_pad, bn), jnp.float32),
        scratch_shapes=[pltpu.VMEM((bn, total_width), jnp.bfloat16)],
        compiler_params=pltpu.CompilerParams(**cp_kwargs),
        cost_estimate=cost,
    )(g, xb, params['b'], *flat_params)

    # [T, C, B_pad, bn] -> [B_pad, N_pad, C] -> drop row/batch padding.
    out = jnp.transpose(out, (2, 0, 3, 1)).reshape(B_pad, N_pad, C)
    return out[:B, :N, :]


# ---------------------------------------------------------------------------
# Deterministic parameter initialization (Glorot normal weights, zero biases)
# ---------------------------------------------------------------------------
def _glorot_normal(key, fan_in, fan_out):
    std = (2.0 / (fan_in + fan_out)) ** 0.5
    return (std * jax.random.normal(key, (fan_in, fan_out))).astype(jnp.float32)


def _init_mlp(key, in_dim, out_dim, hidden=(128, 128, 128, 128)):
    dims = [in_dim] + list(hidden) + [out_dim]
    keys = jax.random.split(key, len(dims) - 1)
    return [(_glorot_normal(k, di, do), jnp.zeros((1, do), jnp.float32))
            for k, di, do in zip(keys, dims[:-1], dims[1:])]


def init_dense_don1d(key, size, query_dim, in_channel_branch=1, out_channel=1,
                     num_layers=3):
    in_branch = in_channel_branch * size
    out_trunk = 128 * out_channel
    keys = iter(jax.random.split(key, num_layers + 1))
    trunk = [_init_mlp(next(keys), query_dim, out_trunk)]
    for _ in range(1, num_layers):
        trunk.append(_init_mlp(next(keys), out_trunk, out_trunk))
        out_trunk *= 2
    branch = _init_mlp(next(keys), in_branch, out_trunk)
    return dict(trunk=trunk, branch=branch,
                b=jnp.zeros((out_channel,), jnp.float32),
                query_dim=query_dim, out_channel=out_channel,
                num_layers=num_layers)


# ---------------------------------------------------------------------------
# Pure-JAX f32 reference (mirrors the PyTorch forward exactly)
# ---------------------------------------------------------------------------
def dense_don1d_reference(params, x, grid):
    def mlp(h, layers):
        for w, b in layers[:-1]:
            h = _gelu_exact(jnp.dot(h, w, precision="highest") + b)
        w, b = layers[-1]
        return jnp.dot(h, w, precision="highest") + b

    q, C, L = params['query_dim'], params['out_channel'], params['num_layers']
    g = grid[0].reshape(-1, q)
    N = g.shape[0]
    B = x.shape[0]
    xb = mlp(x.reshape(B, -1), params['branch'])
    basis = mlp(g, params['trunk'][0])
    for i in range(1, L):
        nb = mlp(basis, params['trunk'][i])
        basis = jnp.concatenate([basis, nb], axis=1)
    out = jnp.einsum('bci,nci->bnc', xb.reshape(B, C, -1),
                     basis.reshape(N, C, -1), precision="highest")
    return out + params['b']


if __name__ == "__main__":
    size, query_dim, num_points, batch = 16, 1, 128, 2
    key = jax.random.PRNGKey(0)
    kp, kx, kg = jax.random.split(key, 3)

    params = init_dense_don1d(kp, size=size, query_dim=query_dim)
    x = jax.random.normal(kx, (batch, 1, size), dtype=jnp.float32)       # [B, in_channel_branch, size]
    grid = jax.random.uniform(kg, (1, num_points, query_dim), dtype=jnp.float32)

    out = jax.block_until_ready(dense_don1d_forward(params, x, grid))
    ref = dense_don1d_reference(params, x, grid)

    assert out.shape == (batch, num_points, 1), out.shape
    max_err = jnp.max(jnp.abs(out - ref))
    assert jnp.allclose(out, ref, atol=1e-2, rtol=1e-2), f"max abs err {max_err}"
    print("KERNEL_OK")
</pallas_src>

<mosaic_0001>
module attributes {stable_mosaic.version = 11 : i64} {
  func.func @kernel(%arg0: i32, %arg1: memref<64x1xf32, #tpu.memory_space<vmem>>, %arg2: memref<8x512xbf16, #tpu.memory_space<vmem>>, %arg3: memref<1xf32, #tpu.memory_space<smem>>, %arg4: memref<1x128xbf16, #tpu.memory_space<vmem>>, %arg5: memref<1x128xf32, #tpu.memory_space<vmem>>, %arg6: memref<128x128xbf16, #tpu.memory_space<vmem>>, %arg7: memref<1x128xf32, #tpu.memory_space<vmem>>, %arg8: memref<128x128xbf16, #tpu.memory_space<vmem>>, %arg9: memref<1x128xf32, #tpu.memory_space<vmem>>, %arg10: memref<128x128xbf16, #tpu.memory_space<vmem>>, %arg11: memref<1x128xf32, #tpu.memory_space<vmem>>, %arg12: memref<128x128xbf16, #tpu.memory_space<vmem>>, %arg13: memref<1x128xf32, #tpu.memory_space<vmem>>, %arg14: memref<128x128xbf16, #tpu.memory_space<vmem>>, %arg15: memref<1x128xf32, #tpu.memory_space<vmem>>, %arg16: memref<128x128xbf16, #tpu.memory_space<vmem>>, %arg17: memref<1x128xf32, #tpu.memory_space<vmem>>, %arg18: memref<128x128xbf16, #tpu.memory_space<vmem>>, %arg19: memref<1x128xf32, #tpu.memory_space<vmem>>, %arg20: memref<128x128xbf16, #tpu.memory_space<vmem>>, %arg21: memref<1x128xf32, #tpu.memory_space<vmem>>, %arg22: memref<128x128xbf16, #tpu.memory_space<vmem>>, %arg23: memref<1x128xf32, #tpu.memory_space<vmem>>, %arg24: memref<256x128xbf16, #tpu.memory_space<vmem>>, %arg25: memref<1x128xf32, #tpu.memory_space<vmem>>, %arg26: memref<128x128xbf16, #tpu.memory_space<vmem>>, %arg27: memref<1x128xf32, #tpu.memory_space<vmem>>, %arg28: memref<128x128xbf16, #tpu.memory_space<vmem>>, %arg29: memref<1x128xf32, #tpu.memory_space<vmem>>, %arg30: memref<128x128xbf16, #tpu.memory_space<vmem>>, %arg31: memref<1x128xf32, #tpu.memory_space<vmem>>, %arg32: memref<128x256xbf16, #tpu.memory_space<vmem>>, %arg33: memref<1x256xf32, #tpu.memory_space<vmem>>, %arg34: memref<1x1x8x64xf32, #tpu.memory_space<vmem>>, %arg35: memref<64x512xbf16, #tpu.memory_space<vmem>>) attributes {dimension_semantics = [#tpu.dimension_semantics<parallel>], iteration_bounds = array<i64: 2>, scalar_prefetch = 0 : i64, scratch_operands = 1 : i64, tpu.core_type = #tpu.core_type<tc>, window_params = [{transform_indices = @transform_0, window_bounds = array<i64: 64, 1>}, {pipeline_mode = #tpu.pipeline_mode<synchronous>, transform_indices = @transform_1, window_bounds = array<i64: 8, 512>}, {transform_indices = @transform_2, window_bounds = array<i64: 1>}, {pipeline_mode = #tpu.pipeline_mode<synchronous>, transform_indices = @transform_3, window_bounds = array<i64: 1, 128>}, {pipeline_mode = #tpu.pipeline_mode<synchronous>, transform_indices = @transform_4, window_bounds = array<i64: 1, 128>}, {pipeline_mode = #tpu.pipeline_mode<synchronous>, transform_indices = @transform_5, window_bounds = array<i64: 128, 128>}, {pipeline_mode = #tpu.pipeline_mode<synchronous>, transform_indices = @transform_6, window_bounds = array<i64: 1, 128>}, {pipeline_mode = #tpu.pipeline_mode<synchronous>, transform_indices = @transform_7, window_bounds = array<i64: 128, 128>}, {pipeline_mode = #tpu.pipeline_mode<synchronous>, transform_indices = @transform_8, window_bounds = array<i64: 1, 128>}, {pipeline_mode = #tpu.pipeline_mode<synchronous>, transform_indices = @transform_9, window_bounds = array<i64: 128, 128>}, {pipeline_mode = #tpu.pipeline_mode<synchronous>, transform_indices = @transform_10, window_bounds = array<i64: 1, 128>}, {pipeline_mode = #tpu.pipeline_mode<synchronous>, transform_indices = @transform_11, window_bounds = array<i64: 128, 128>}, {pipeline_mode = #tpu.pipeline_mode<synchronous>, transform_indices = @transform_12, window_bounds = array<i64: 1, 128>}, {pipeline_mode = #tpu.pipeline_mode<synchronous>, transform_indices = @transform_13, window_bounds = array<i64: 128, 128>}, {pipeline_mode = #tpu.pipeline_mode<synchronous>, transform_indices = @transform_14, window_bounds = array<i64: 1, 128>}, {pipeline_mode = #tpu.pipeline_mode<synchronous>, transform_indices = @transform_15, window_bounds = array<i64: 128, 128>}, {pipeline_mode = #tpu.pipeline_mode<synchronous>, transform_indices = @transform_16, window_bounds = array<i64: 1, 128>}, {pipeline_mode = #tpu.pipeline_mode<synchronous>, transform_indices = @transform_17, window_bounds = array<i64: 128, 128>}, {pipeline_mode = #tpu.pipeline_mode<synchronous>, transform_indices = @transform_18, window_bounds = array<i64: 1, 128>}, {pipeline_mode = #tpu.pipeline_mode<synchronous>, transform_indices = @transform_19, window_bounds = array<i64: 128, 128>}, {pipeline_mode = #tpu.pipeline_mode<synchronous>, transform_indices = @transform_20, window_bounds = array<i64: 1, 128>}, {pipeline_mode = #tpu.pipeline_mode<synchronous>, transform_indices = @transform_21, window_bounds = array<i64: 128, 128>}, {pipeline_mode = #tpu.pipeline_mode<synchronous>, transform_indices = @transform_22, window_bounds = array<i64: 1, 128>}, {pipeline_mode = #tpu.pipeline_mode<synchronous>, transform_indices = @transform_23, window_bounds = array<i64: 256, 128>}, {pipeline_mode = #tpu.pipeline_mode<synchronous>, transform_indices = @transform_24, window_bounds = array<i64: 1, 128>}, {pipeline_mode = #tpu.pipeline_mode<synchronous>, transform_indices = @transform_25, window_bounds = array<i64: 128, 128>}, {pipeline_mode = #tpu.pipeline_mode<synchronous>, transform_indices = @transform_26, window_bounds = array<i64: 1, 128>}, {pipeline_mode = #tpu.pipeline_mode<synchronous>, transform_indices = @transform_27, window_bounds = array<i64: 128, 128>}, {pipeline_mode = #tpu.pipeline_mode<synchronous>, transform_indices = @transform_28, window_bounds = array<i64: 1, 128>}, {pipeline_mode = #tpu.pipeline_mode<synchronous>, transform_indices = @transform_29, window_bounds = array<i64: 128, 128>}, {pipeline_mode = #tpu.pipeline_mode<synchronous>, transform_indices = @transform_30, window_bounds = array<i64: 1, 128>}, {pipeline_mode = #tpu.pipeline_mode<synchronous>, transform_indices = @transform_31, window_bounds = array<i64: 128, 256>}, {pipeline_mode = #tpu.pipeline_mode<synchronous>, transform_indices = @transform_32, window_bounds = array<i64: 1, 256>}, {transform_indices = @transform_33, window_bounds = array<i64: 1, 1, 8, 64>}]} {
    %c0 = arith.constant 0 : index
    %c0_0 = arith.constant 0 : index
    %0 = vector.load %arg1[%c0, %c0_0] : memref<64x1xf32, #tpu.memory_space<vmem>>, vector<64x1xf32>
    %c0_1 = arith.constant 0 : index
    %c0_2 = arith.constant 0 : index
    %1 = vector.load %arg4[%c0_1, %c0_2] : memref<1x128xbf16, #tpu.memory_space<vmem>>, vector<1x128xbf16>
    %c0_3 = arith.constant 0 : index
    %c0_4 = arith.constant 0 : index
    %2 = vector.load %arg5[%c0_3, %c0_4] : memref<1x128xf32, #tpu.memory_space<vmem>>, vector<1x128xf32>
    %3 = arith.extf %1 : vector<1x128xbf16> to vector<1x128xf32>
    %4 = vector.broadcast %0 : vector<64x1xf32> to vector<64x128xf32>
    %5 = vector.broadcast %3 : vector<1x128xf32> to vector<64x128xf32>
    %6 = arith.mulf %4, %5 : vector<64x128xf32>
    %7 = vector.broadcast %2 : vector<1x128xf32> to vector<64x128xf32>
    %8 = arith.addf %6, %7 : vector<64x128xf32>
    %9 = arith.mulf %8, %8 : vector<64x128xf32>
    %10 = arith.mulf %8, %9 : vector<64x128xf32>
    %cst = arith.constant 4.471500e-02 : f32
    %11 = vector.broadcast %cst : f32 to vector<64x128xf32>
    %12 = arith.mulf %11, %10 : vector<64x128xf32>
    %13 = arith.addf %8, %12 : vector<64x128xf32>
    %cst_5 = arith.constant 0.797884583 : f32
    %14 = vector.broadcast %cst_5 : f32 to vector<64x128xf32>
    %15 = arith.mulf %14, %13 : vector<64x128xf32>
    %16 = math.tanh %15 : vector<64x128xf32>
    %cst_6 = arith.constant 1.000000e+00 : f32
    %17 = vector.broadcast %cst_6 : f32 to vector<64x128xf32>
    %18 = arith.addf %17, %16 : vector<64x128xf32>
    %cst_7 = arith.constant 5.000000e-01 : f32
    %19 = vector.broadcast %cst_7 : f32 to vector<64x128xf32>
    %20 = arith.mulf %19, %18 : vector<64x128xf32>
    %21 = arith.mulf %8, %20 : vector<64x128xf32>
    %c0_8 = arith.constant 0 : index
    %c0_9 = arith.constant 0 : index
    %22 = vector.load %arg6[%c0_8, %c0_9] : memref<128x128xbf16, #tpu.memory_space<vmem>>, vector<128x128xbf16>
    %c0_10 = arith.constant 0 : index
    %c0_11 = arith.constant 0 : index
    %23 = vector.load %arg7[%c0_10, %c0_11] : memref<1x128xf32, #tpu.memory_space<vmem>>, vector<1x128xf32>
    %24 = arith.truncf %21 : vector<64x128xf32> to vector<64x128xbf16>
    %cst_12 = arith.constant dense<0.000000e+00> : vector<64x128xf32>
    %25 = tpu.matmul %24, %22, %cst_12 {dimension_numbers = #tpu.dot_dimension_numbers<[1], [0], [0], [1], [0, 0, 1, 1], [], []>} : vector<64x128xbf16>, vector<128x128xbf16>, vector<64x128xf32> -> vector<64x128xf32>
    %26 = vector.broadcast %23 : vector<1x128xf32> to vector<64x128xf32>
    %27 = arith.addf %25, %26 : vector<64x128xf32>
    %28 = arith.mulf %27, %27 : vector<64x128xf32>
    %29 = arith.mulf %27, %28 : vector<64x128xf32>
    %cst_13 = arith.constant 4.471500e-02 : f32
    %30 = vector.broadcast %cst_13 : f32 to vector<64x128xf32>
    %31 = arith.mulf %30, %29 : vector<64x128xf32>
    %32 = arith.addf %27, %31 : vector<64x128xf32>
    %cst_14 = arith.constant 0.797884583 : f32
    %33 = vector.broadcast %cst_14 : f32 to vector<64x128xf32>
    %34 = arith.mulf %33, %32 : vector<64x128xf32>
    %35 = math.tanh %34 : vector<64x128xf32>
    %cst_15 = arith.constant 1.000000e+00 : f32
    %36 = vector.broadcast %cst_15 : f32 to vector<64x128xf32>
    %37 = arith.addf %36, %35 : vector<64x128xf32>
    %cst_16 = arith.constant 5.000000e-01 : f32
    %38 = vector.broadcast %cst_16 : f32 to vector<64x128xf32>
    %39 = arith.mulf %38, %37 : vector<64x128xf32>
    %40 = arith.mulf %27, %39 : vector<64x128xf32>
    %c0_17 = arith.constant 0 : index
    %c0_18 = arith.constant 0 : index
    %41 = vector.load %arg8[%c0_17, %c0_18] : memref<128x128xbf16, #tpu.memory_space<vmem>>, vector<128x128xbf16>
    %c0_19 = arith.constant 0 : index
    %c0_20 = arith.constant 0 : index
    %42 = vector.load %arg9[%c0_19, %c0_20] : memref<1x128xf32, #tpu.memory_space<vmem>>, vector<1x128xf32>
    %43 = arith.truncf %40 : vector<64x128xf32> to vector<64x128xbf16>
    %cst_21 = arith.constant dense<0.000000e+00> : vector<64x128xf32>
    %44 = tpu.matmul %43, %41, %cst_21 {dimension_numbers = #tpu.dot_dimension_numbers<[1], [0], [0], [1], [0, 0, 1, 1], [], []>} : vector<64x128xbf16>, vector<128x128xbf16>, vector<64x128xf32> -> vector<64x128xf32>
    %45 = vector.broadcast %42 : vector<1x128xf32> to vector<64x128xf32>
    %46 = arith.addf %44, %45 : vector<64x128xf32>
    %47 = arith.mulf %46, %46 : vector<64x128xf32>
    %48 = arith.mulf %46, %47 : vector<64x128xf32>
    %cst_22 = arith.constant 4.471500e-02 : f32
    %49 = vector.broadcast %cst_22 : f32 to vector<64x128xf32>
    %50 = arith.mulf %49, %48 : vector<64x128xf32>
    %51 = arith.addf %46, %50 : vector<64x128xf32>
    %cst_23 = arith.constant 0.797884583 : f32
    %52 = vector.broadcast %cst_23 : f32 to vector<64x128xf32>
    %53 = arith.mulf %52, %51 : vector<64x128xf32>
    %54 = math.tanh %53 : vector<64x128xf32>
    %cst_24 = arith.constant 1.000000e+00 : f32
    %55 = vector.broadcast %cst_24 : f32 to vector<64x128xf32>
    %56 = arith.addf %55, %54 : vector<64x128xf32>
    %cst_25 = arith.constant 5.000000e-01 : f32
    %57 = vector.broadcast %cst_25 : f32 to vector<64x128xf32>
    %58 = arith.mulf %57, %56 : vector<64x128xf32>
    %59 = arith.mulf %46, %58 : vector<64x128xf32>
    %c0_26 = arith.constant 0 : index
    %c0_27 = arith.constant 0 : index
    %60 = vector.load %arg10[%c0_26, %c0_27] : memref<128x128xbf16, #tpu.memory_space<vmem>>, vector<128x128xbf16>
    %c0_28 = arith.constant 0 : index
    %c0_29 = arith.constant 0 : index
    %61 = vector.load %arg11[%c0_28, %c0_29] : memref<1x128xf32, #tpu.memory_space<vmem>>, vector<1x128xf32>
    %62 = arith.truncf %59 : vector<64x128xf32> to vector<64x128xbf16>
    %cst_30 = arith.constant dense<0.000000e+00> : vector<64x128xf32>
    %63 = tpu.matmul %62, %60, %cst_30 {dimension_numbers = #tpu.dot_dimension_numbers<[1], [0], [0], [1], [0, 0, 1, 1], [], []>} : vector<64x128xbf16>, vector<128x128xbf16>, vector<64x128xf32> -> vector<64x128xf32>
    %64 = vector.broadcast %61 : vector<1x128xf32> to vector<64x128xf32>
    %65 = arith.addf %63, %64 : vector<64x128xf32>
    %66 = arith.mulf %65, %65 : vector<64x128xf32>
    %67 = arith.mulf %65, %66 : vector<64x128xf32>
    %cst_31 = arith.constant 4.471500e-02 : f32
    %68 = vector.broadcast %cst_31 : f32 to vector<64x128xf32>
    %69 = arith.mulf %68, %67 : vector<64x128xf32>
    %70 = arith.addf %65, %69 : vector<64x128xf32>
    %cst_32 = arith.constant 0.797884583 : f32
    %71 = vector.broadcast %cst_32 : f32 to vector<64x128xf32>
    %72 = arith.mulf %71, %70 : vector<64x128xf32>
    %73 = math.tanh %72 : vector<64x128xf32>
    %cst_33 = arith.constant 1.000000e+00 : f32
    %74 = vector.broadcast %cst_33 : f32 to vector<64x128xf32>
    %75 = arith.addf %74, %73 : vector<64x128xf32>
    %cst_34 = arith.constant 5.000000e-01 : f32
    %76 = vector.broadcast %cst_34 : f32 to vector<64x128xf32>
    %77 = arith.mulf %76, %75 : vector<64x128xf32>
    %78 = arith.mulf %65, %77 : vector<64x128xf32>
    %c0_35 = arith.constant 0 : index
    %c0_36 = arith.constant 0 : index
    %79 = vector.load %arg12[%c0_35, %c0_36] : memref<128x128xbf16, #tpu.memory_space<vmem>>, vector<128x128xbf16>
    %c0_37 = arith.constant 0 : index
    %c0_38 = arith.constant 0 : index
    %80 = vector.load %arg13[%c0_37, %c0_38] : memref<1x128xf32, #tpu.memory_space<vmem>>, vector<1x128xf32>
    %81 = arith.truncf %78 : vector<64x128xf32> to vector<64x128xbf16>
    %cst_39 = arith.constant dense<0.000000e+00> : vector<64x128xf32>
    %82 = tpu.matmul %81, %79, %cst_39 {dimension_numbers = #tpu.dot_dimension_numbers<[1], [0], [0], [1], [0, 0, 1, 1], [], []>} : vector<64x128xbf16>, vector<128x128xbf16>, vector<64x128xf32> -> vector<64x128xf32>
    %83 = vector.broadcast %80 : vector<1x128xf32> to vector<64x128xf32>
    %84 = arith.addf %82, %83 : vector<64x128xf32>
    %85 = arith.truncf %84 : vector<64x128xf32> to vector<64x128xbf16>
    %c0_40 = arith.constant 0 : index
    %c0_41 = arith.constant 0 : index
    %86 = vector.load %arg35[%c0_40, %c0_41] : memref<64x512xbf16, #tpu.memory_space<vmem>>, vector<64x128xbf16>
    tpu.vector_store %arg35[%c0_40, %c0_41], %85 {strides = array<i32>} : memref<64x512xbf16, #tpu.memory_space<vmem>>, vector<64x128xbf16>,
    %c0_42 = arith.constant 0 : index
    %c0_43 = arith.constant 0 : index
    %87 = vector.load %arg35[%c0_42, %c0_43] : memref<64x512xbf16, #tpu.memory_space<vmem>>, vector<64x128xbf16>
    %c0_44 = arith.constant 0 : index
    %c0_45 = arith.constant 0 : index
    %88 = vector.load %arg14[%c0_44, %c0_45] : memref<128x128xbf16, #tpu.memory_space<vmem>>, vector<128x128xbf16>
    %c0_46 = arith.constant 0 : index
    %c0_47 = arith.constant 0 : index
    %89 = vector.load %arg15[%c0_46, %c0_47] : memref<1x128xf32, #tpu.memory_space<vmem>>, vector<1x128xf32>
    %cst_48 = arith.constant dense<0.000000e+00> : vector<64x128xf32>
    %90 = tpu.matmul %87, %88, %cst_48 {dimension_numbers = #tpu.dot_dimension_numbers<[1], [0], [0], [1], [0, 0, 1, 1], [], []>} : vector<64x128xbf16>, vector<128x128xbf16>, vector<64x128xf32> -> vector<64x128xf32>
    %91 = vector.broadcast %89 : vector<1x128xf32> to vector<64x128xf32>
    %92 = arith.addf %90, %91 : vector<64x128xf32>
    %93 = arith.mulf %92, %92 : vector<64x128xf32>
    %94 = arith.mulf %92, %93 : vector<64x128xf32>
    %cst_49 = arith.constant 4.471500e-02 : f32
    %95 = vector.broadcast %cst_49 : f32 to vector<64x128xf32>
    %96 = arith.mulf %95, %94 : vector<64x128xf32>
    %97 = arith.addf %92, %96 : vector<64x128xf32>
    %cst_50 = arith.constant 0.797884583 : f32
    %98 = vector.broadcast %cst_50 : f32 to vector<64x128xf32>
    %99 = arith.mulf %98, %97 : vector<64x128xf32>
    %100 = math.tanh %99 : vector<64x128xf32>
    %cst_51 = arith.constant 1.000000e+00 : f32
    %101 = vector.broadcast %cst_51 : f32 to vector<64x128xf32>
    %102 = arith.addf %101, %100 : vector<64x128xf32>
    %cst_52 = arith.constant 5.000000e-01 : f32
    %103 = vector.broadcast %cst_52 : f32 to vector<64x128xf32>
    %104 = arith.mulf %103, %102 : vector<64x128xf32>
    %105 = arith.mulf %92, %104 : vector<64x128xf32>
    %c0_53 = arith.constant 0 : index
    %c0_54 = arith.constant 0 : index
    %106 = vector.load %arg16[%c0_53, %c0_54] : memref<128x128xbf16, #tpu.memory_space<vmem>>, vector<128x128xbf16>
    %c0_55 = arith.constant 0 : index
    %c0_56 = arith.constant 0 : index
    %107 = vector.load %arg17[%c0_55, %c0_56] : memref<1x128xf32, #tpu.memory_space<vmem>>, vector<1x128xf32>
    %108 = arith.truncf %105 : vector<64x128xf32> to vector<64x128xbf16>
    %cst_57 = arith.constant dense<0.000000e+00> : vector<64x128xf32>
    %109 = tpu.matmul %108, %106, %cst_57 {dimension_numbers = #tpu.dot_dimension_numbers<[1], [0], [0], [1], [0, 0, 1, 1], [], []>} : vector<64x128xbf16>, vector<128x128xbf16>, vector<64x128xf32> -> vector<64x128xf32>
    %110 = vector.broadcast %107 : vector<1x128xf32> to vector<64x128xf32>
    %111 = arith.addf %109, %110 : vector<64x128xf32>
    %112 = arith.mulf %111, %111 : vector<64x128xf32>
    %113 = arith.mulf %111, %112 : vector<64x128xf32>
    %cst_58 = arith.constant 4.471500e-02 : f32
    %114 = vector.broadcast %cst_58 : f32 to vector<64x128xf32>
    %115 = arith.mulf %114, %113 : vector<64x128xf32>
    %116 = arith.addf %111, %115 : vector<64x128xf32>
    %cst_59 = arith.constant 0.797884583 : f32
    %117 = vector.broadcast %cst_59 : f32 to vector<64x128xf32>
    %118 = arith.mulf %117, %116 : vector<64x128xf32>
    %119 = math.tanh %118 : vector<64x128xf32>
    %cst_60 = arith.constant 1.000000e+00 : f32
    %120 = vector.broadcast %cst_60 : f32 to vector<64x128xf32>
    %121 = arith.addf %120, %119 : vector<64x128xf32>
    %cst_61 = arith.constant 5.000000e-01 : f32
    %122 = vector.broadcast %cst_61 : f32 to vector<64x128xf32>
    %123 = arith.mulf %122, %121 : vector<64x128xf32>
    %124 = arith.mulf %111, %123 : vector<64x128xf32>
    %c0_62 = arith.constant 0 : index
    %c0_63 = arith.constant 0 : index
    %125 = vector.load %arg18[%c0_62, %c0_63] : memref<128x128xbf16, #tpu.memory_space<vmem>>, vector<128x128xbf16>
    %c0_64 = arith.constant 0 : index
    %c0_65 = arith.constant 0 : index
    %126 = vector.load %arg19[%c0_64, %c0_65] : memref<1x128xf32, #tpu.memory_space<vmem>>, vector<1x128xf32>
    %127 = arith.truncf %124 : vector<64x128xf32> to vector<64x128xbf16>
    %cst_66 = arith.constant dense<0.000000e+00> : vector<64x128xf32>
    %128 = tpu.matmul %127, %125, %cst_66 {dimension_numbers = #tpu.dot_dimension_numbers<[1], [0], [0], [1], [0, 0, 1, 1], [], []>} : vector<64x128xbf16>, vector<128x128xbf16>, vector<64x128xf32> -> vector<64x128xf32>
    %129 = vector.broadcast %126 : vector<1x128xf32> to vector<64x128xf32>
    %130 = arith.addf %128, %129 : vector<64x128xf32>
    %131 = arith.mulf %130, %130 : vector<64x128xf32>
    %132 = arith.mulf %130, %131 : vector<64x128xf32>
    %cst_67 = arith.constant 4.471500e-02 : f32
    %133 = vector.broadcast %cst_67 : f32 to vector<64x128xf32>
    %134 = arith.mulf %133, %132 : vector<64x128xf32>
    %135 = arith.addf %130, %134 : vector<64x128xf32>
    %cst_68 = arith.constant 0.797884583 : f32
    %136 = vector.broadcast %cst_68 : f32 to vector<64x128xf32>
    %137 = arith.mulf %136, %135 : vector<64x128xf32>
    %138 = math.tanh %137 : vector<64x128xf32>
    %cst_69 = arith.constant 1.000000e+00 : f32
    %139 = vector.broadcast %cst_69 : f32 to vector<64x128xf32>
    %140 = arith.addf %139, %138 : vector<64x128xf32>
    %cst_70 = arith.constant 5.000000e-01 : f32
    %141 = vector.broadcast %cst_70 : f32 to vector<64x128xf32>
    %142 = arith.mulf %141, %140 : vector<64x128xf32>
    %143 = arith.mulf %130, %142 : vector<64x128xf32>
    %c0_71 = arith.constant 0 : index
    %c0_72 = arith.constant 0 : index
    %144 = vector.load %arg20[%c0_71, %c0_72] : memref<128x128xbf16, #tpu.memory_space<vmem>>, vector<128x128xbf16>
    %c0_73 = arith.constant 0 : index
    %c0_74 = arith.constant 0 : index
    %145 = vector.load %arg21[%c0_73, %c0_74] : memref<1x128xf32, #tpu.memory_space<vmem>>, vector<1x128xf32>
    %146 = arith.truncf %143 : vector<64x128xf32> to vector<64x128xbf16>
    %cst_75 = arith.constant dense<0.000000e+00> : vector<64x128xf32>
    %147 = tpu.matmul %146, %144, %cst_75 {dimension_numbers = #tpu.dot_dimension_numbers<[1], [0], [0], [1], [0, 0, 1, 1], [], []>} : vector<64x128xbf16>, vector<128x128xbf16>, vector<64x128xf32> -> vector<64x128xf32>
    %148 = vector.broadcast %145 : vector<1x128xf32> to vector<64x128xf32>
    %149 = arith.addf %147, %148 : vector<64x128xf32>
    %150 = arith.mulf %149, %149 : vector<64x128xf32>
    %151 = arith.mulf %149, %150 : vector<64x128xf32>
    %cst_76 = arith.constant 4.471500e-02 : f32
    %152 = vector.broadcast %cst_76 : f32 to vector<64x128xf32>
    %153 = arith.mulf %152, %151 : vector<64x128xf32>
    %154 = arith.addf %149, %153 : vector<64x128xf32>
    %cst_77 = arith.constant 0.797884583 : f32
    %155 = vector.broadcast %cst_77 : f32 to vector<64x128xf32>
    %156 = arith.mulf %155, %154 : vector<64x128xf32>
    %157 = math.tanh %156 : vector<64x128xf32>
    %cst_78 = arith.constant 1.000000e+00 : f32
    %158 = vector.broadcast %cst_78 : f32 to vector<64x128xf32>
    %159 = arith.addf %158, %157 : vector<64x128xf32>
    %cst_79 = arith.constant 5.000000e-01 : f32
    %160 = vector.broadcast %cst_79 : f32 to vector<64x128xf32>
    %161 = arith.mulf %160, %159 : vector<64x128xf32>
    %162 = arith.mulf %149, %161 : vector<64x128xf32>
    %c0_80 = arith.constant 0 : index
    %c0_81 = arith.constant 0 : index
    %163 = vector.load %arg22[%c0_80, %c0_81] : memref<128x128xbf16, #tpu.memory_space<vmem>>, vector<128x128xbf16>
    %c0_82 = arith.constant 0 : index
    %c0_83 = arith.constant 0 : index
    %164 = vector.load %arg23[%c0_82, %c0_83] : memref<1x128xf32, #tpu.memory_space<vmem>>, vector<1x128xf32>
    %165 = arith.truncf %162 : vector<64x128xf32> to vector<64x128xbf16>
    %cst_84 = arith.constant dense<0.000000e+00> : vector<64x128xf32>
    %166 = tpu.matmul %165, %163, %cst_84 {dimension_numbers = #tpu.dot_dimension_numbers<[1], [0], [0], [1], [0, 0, 1, 1], [], []>} : vector<64x128xbf16>, vector<128x128xbf16>, vector<64x128xf32> -> vector<64x128xf32>
    %167 = vector.broadcast %164 : vector<1x128xf32> to vector<64x128xf32>
    %168 = arith.addf %166, %167 : vector<64x128xf32>
    %169 = arith.truncf %168 : vector<64x128xf32> to vector<64x128xbf16>
    %c0_85 = arith.constant 0 : index
    %c128 = arith.constant 128 : index
    %170 = vector.load %arg35[%c0_85, %c128] : memref<64x512xbf16, #tpu.memory_space<vmem>>, vector<64x128xbf16>
    tpu.vector_store %arg35[%c0_85, %c128], %169 {strides = array<i32>} : memref<64x512xbf16, #tpu.memory_space<vmem>>, vector<64x128xbf16>,
    %c0_86 = arith.constant 0 : index
    %c0_87 = arith.constant 0 : index
    %171 = vector.load %arg35[%c0_86, %c0_87] : memref<64x512xbf16, #tpu.memory_space<vmem>>, vector<64x256xbf16>
    %c0_88 = arith.constant 0 : index
    %c0_89 = arith.constant 0 : index
    %172 = vector.load %arg24[%c0_88, %c0_89] : memref<256x128xbf16, #tpu.memory_space<vmem>>, vector<256x128xbf16>
    %c0_90 = arith.constant 0 : index
    %c0_91 = arith.constant 0 : index
    %173 = vector.load %arg25[%c0_90, %c0_91] : memref<1x128xf32, #tpu.memory_space<vmem>>, vector<1x128xf32>
    %cst_92 = arith.constant dense<0.000000e+00> : vector<64x128xf32>
    %174 = tpu.matmul %171, %172, %cst_92 {dimension_numbers = #tpu.dot_dimension_numbers<[1], [0], [0], [1], [0, 0, 1, 1], [], []>} : vector<64x256xbf16>, vector<256x128xbf16>, vector<64x128xf32> -> vector<64x128xf32>
    %175 = vector.broadcast %173 : vector<1x128xf32> to vector<64x128xf32>
    %176 = arith.addf %174, %175 : vector<64x128xf32>
    %177 = arith.mulf %176, %176 : vector<64x128xf32>
    %178 = arith.mulf %176, %177 : vector<64x128xf32>
    %cst_93 = arith.constant 4.471500e-02 : f32
    %179 = vector.broadcast %cst_93 : f32 to vector<64x128xf32>
    %180 = arith.mulf %179, %178 : vector<64x128xf32>
    %181 = arith.addf %176, %180 : vector<64x128xf32>
    %cst_94 = arith.constant 0.797884583 : f32
    %182 = vector.broadcast %cst_94 : f32 to vector<64x128xf32>
    %183 = arith.mulf %182, %181 : vector<64x128xf32>
    %184 = math.tanh %183 : vector<64x128xf32>
    %cst_95 = arith.constant 1.000000e+00 : f32
    %185 = vector.broadcast %cst_95 : f32 to vector<64x128xf32>
    %186 = arith.addf %185, %184 : vector<64x128xf32>
    %cst_96 = arith.constant 5.000000e-01 : f32
    %187 = vector.broadcast %cst_96 : f32 to vector<64x128xf32>
    %188 = arith.mulf %187, %186 : vector<64x128xf32>
    %189 = arith.mulf %176, %188 : vector<64x128xf32>
    %c0_97 = arith.constant 0 : index
    %c0_98 = arith.constant 0 : index
    %190 = vector.load %arg26[%c0_97, %c0_98] : memref<128x128xbf16, #tpu.memory_space<vmem>>, vector<128x128xbf16>
    %c0_99 = arith.constant 0 : index
    %c0_100 = arith.constant 0 : index
    %191 = vector.load %arg27[%c0_99, %c0_100] : memref<1x128xf32, #tpu.memory_space<vmem>>, vector<1x128xf32>
    %192 = arith.truncf %189 : vector<64x128xf32> to vector<64x128xbf16>
    %cst_101 = arith.constant dense<0.000000e+00> : vector<64x128xf32>
    %193 = tpu.matmul %192, %190, %cst_101 {dimension_numbers = #tpu.dot_dimension_numbers<[1], [0], [0], [1], [0, 0, 1, 1], [], []>} : vector<64x128xbf16>, vector<128x128xbf16>, vector<64x128xf32> -> vector<64x128xf32>
    %194 = vector.broadcast %191 : vector<1x128xf32> to vector<64x128xf32>
    %195 = arith.addf %193, %194 : vector<64x128xf32>
    %196 = arith.mulf %195, %195 : vector<64x128xf32>
    %197 = arith.mulf %195, %196 : vector<64x128xf32>
    %cst_102 = arith.constant 4.471500e-02 : f32
    %198 = vector.broadcast %cst_102 : f32 to vector<64x128xf32>
    %199 = arith.mulf %198, %197 : vector<64x128xf32>
    %200 = arith.addf %195, %199 : vector<64x128xf32>
    %cst_103 = arith.constant 0.797884583 : f32
    %201 = vector.broadcast %cst_103 : f32 to vector<64x128xf32>
    %202 = arith.mulf %201, %200 : vector<64x128xf32>
    %203 = math.tanh %202 : vector<64x128xf32>
    %cst_104 = arith.constant 1.000000e+00 : f32
    %204 = vector.broadcast %cst_104 : f32 to vector<64x128xf32>
    %205 = arith.addf %204, %203 : vector<64x128xf32>
    %cst_105 = arith.constant 5.000000e-01 : f32
    %206 = vector.broadcast %cst_105 : f32 to vector<64x128xf32>
    %207 = arith.mulf %206, %205 : vector<64x128xf32>
    %208 = arith.mulf %195, %207 : vector<64x128xf32>
    %c0_106 = arith.constant 0 : index
    %c0_107 = arith.constant 0 : index
    %209 = vector.load %arg28[%c0_106, %c0_107] : memref<128x128xbf16, #tpu.memory_space<vmem>>, vector<128x128xbf16>
    %c0_108 = arith.constant 0 : index
    %c0_109 = arith.constant 0 : index
    %210 = vector.load %arg29[%c0_108, %c0_109] : memref<1x128xf32, #tpu.memory_space<vmem>>, vector<1x128xf32>
    %211 = arith.truncf %208 : vector<64x128xf32> to vector<64x128xbf16>
    %cst_110 = arith.constant dense<0.000000e+00> : vector<64x128xf32>
    %212 = tpu.matmul %211, %209, %cst_110 {dimension_numbers = #tpu.dot_dimension_numbers<[1], [0], [0], [1], [0, 0, 1, 1], [], []>} : vector<64x128xbf16>, vector<128x128xbf16>, vector<64x128xf32> -> vector<64x128xf32>
    %213 = vector.broadcast %210 : vector<1x128xf32> to vector<64x128xf32>
    %214 = arith.addf %212, %213 : vector<64x128xf32>
    %215 = arith.mulf %214, %214 : vector<64x128xf32>
    %216 = arith.mulf %214, %215 : vector<64x128xf32>
    %cst_111 = arith.constant 4.471500e-02 : f32
    %217 = vector.broadcast %cst_111 : f32 to vector<64x128xf32>
    %218 = arith.mulf %217, %216 : vector<64x128xf32>
    %219 = arith.addf %214, %218 : vector<64x128xf32>
    %cst_112 = arith.constant 0.797884583 : f32
    %220 = vector.broadcast %cst_112 : f32 to vector<64x128xf32>
    %221 = arith.mulf %220, %219 : vector<64x128xf32>
    %222 = math.tanh %221 : vector<64x128xf32>
    %cst_113 = arith.constant 1.000000e+00 : f32
    %223 = vector.broadcast %cst_113 : f32 to vector<64x128xf32>
    %224 = arith.addf %223, %222 : vector<64x128xf32>
    %cst_114 = arith.constant 5.000000e-01 : f32
    %225 = vector.broadcast %cst_114 : f32 to vector<64x128xf32>
    %226 = arith.mulf %225, %224 : vector<64x128xf32>
    %227 = arith.mulf %214, %226 : vector<64x128xf32>
    %c0_115 = arith.constant 0 : index
    %c0_116 = arith.constant 0 : index
    %228 = vector.load %arg30[%c0_115, %c0_116] : memref<128x128xbf16, #tpu.memory_space<vmem>>, vector<128x128xbf16>
    %c0_117 = arith.constant 0 : index
    %c0_118 = arith.constant 0 : index
    %229 = vector.load %arg31[%c0_117, %c0_118] : memref<1x128xf32, #tpu.memory_space<vmem>>, vector<1x128xf32>
    %230 = arith.truncf %227 : vector<64x128xf32> to vector<64x128xbf16>
    %cst_119 = arith.constant dense<0.000000e+00> : vector<64x128xf32>
    %231 = tpu.matmul %230, %228, %cst_119 {dimension_numbers = #tpu.dot_dimension_numbers<[1], [0], [0], [1], [0, 0, 1, 1], [], []>} : vector<64x128xbf16>, vector<128x128xbf16>, vector<64x128xf32> -> vector<64x128xf32>
    %232 = vector.broadcast %229 : vector<1x128xf32> to vector<64x128xf32>
    %233 = arith.addf %231, %232 : vector<64x128xf32>
    %234 = arith.mulf %233, %233 : vector<64x128xf32>
    %235 = arith.mulf %233, %234 : vector<64x128xf32>
    %cst_120 = arith.constant 4.471500e-02 : f32
    %236 = vector.broadcast %cst_120 : f32 to vector<64x128xf32>
    %237 = arith.mulf %236, %235 : vector<64x128xf32>
    %238 = arith.addf %233, %237 : vector<64x128xf32>
    %cst_121 = arith.constant 0.797884583 : f32
    %239 = vector.broadcast %cst_121 : f32 to vector<64x128xf32>
    %240 = arith.mulf %239, %238 : vector<64x128xf32>
    %241 = math.tanh %240 : vector<64x128xf32>
    %cst_122 = arith.constant 1.000000e+00 : f32
    %242 = vector.broadcast %cst_122 : f32 to vector<64x128xf32>
    %243 = arith.addf %242, %241 : vector<64x128xf32>
    %cst_123 = arith.constant 5.000000e-01 : f32
    %244 = vector.broadcast %cst_123 : f32 to vector<64x128xf32>
    %245 = arith.mulf %244, %243 : vector<64x128xf32>
    %246 = arith.mulf %233, %245 : vector<64x128xf32>
    %c0_124 = arith.constant 0 : index
    %c0_125 = arith.constant 0 : index
    %247 = vector.load %arg32[%c0_124, %c0_125] : memref<128x256xbf16, #tpu.memory_space<vmem>>, vector<128x256xbf16>
    %c0_126 = arith.constant 0 : index
    %c0_127 = arith.constant 0 : index
    %248 = vector.load %arg33[%c0_126, %c0_127] : memref<1x256xf32, #tpu.memory_space<vmem>>, vector<1x256xf32>
    %249 = arith.truncf %246 : vector<64x128xf32> to vector<64x128xbf16>
    %cst_128 = arith.constant dense<0.000000e+00> : vector<64x256xf32>
    %250 = tpu.matmul %249, %247, %cst_128 {dimension_numbers = #tpu.dot_dimension_numbers<[1], [0], [0], [1], [0, 0, 1, 1], [], []>} : vector<64x128xbf16>, vector<128x256xbf16>, vector<64x256xf32> -> vector<64x256xf32>
    %251 = vector.broadcast %248 : vector<1x256xf32> to vector<64x256xf32>
    %252 = arith.addf %250, %251 : vector<64x256xf32>
    %253 = arith.truncf %252 : vector<64x256xf32> to vector<64x256xbf16>
    %c0_129 = arith.constant 0 : index
    %c256 = arith.constant 256 : index
    %254 = vector.load %arg35[%c0_129, %c256] : memref<64x512xbf16, #tpu.memory_space<vmem>>, vector<64x256xbf16>
    tpu.vector_store %arg35[%c0_129, %c256], %253 {strides = array<i32>} : memref<64x512xbf16, #tpu.memory_space<vmem>>, vector<64x256xbf16>,
    %c0_130 = arith.constant 0 : index
    %c0_131 = arith.constant 0 : index
    %255 = vector.load %arg2[%c0_130, %c0_131] : memref<8x512xbf16, #tpu.memory_space<vmem>>, vector<8x512xbf16>
    %c0_132 = arith.constant 0 : index
    %c0_133 = arith.constant 0 : index
    %256 = vector.load %arg35[%c0_132, %c0_133] : memref<64x512xbf16, #tpu.memory_space<vmem>>, vector<64x512xbf16>
    %cst_134 = arith.constant dense<0.000000e+00> : vector<8x64xf32>
    %257 = tpu.matmul %255, %256, %cst_134 {dimension_numbers = #tpu.dot_dimension_numbers<[1], [1], [0], [0], [0, 0, 1, 0], [], []>} : vector<8x512xbf16>, vector<64x512xbf16>, vector<8x64xf32> -> vector<8x64xf32>
    %c0_135 = arith.constant 0 : index
    %258 = memref.load %arg3[%c0_135] : memref<1xf32, #tpu.memory_space<smem>>
    %259 = vector.broadcast %258 : f32 to vector<8x64xf32>
    %260 = arith.addf %257, %259 : vector<8x64xf32>
    %c0_136 = arith.constant 0 : index
    %c0_137 = arith.constant 0 : index
    %c0_138 = arith.constant 0 : index
    %c0_139 = arith.constant 0 : index
    %261 = vector.load %arg34[%c0_136, %c0_137, %c0_138, %c0_139] : memref<1x1x8x64xf32, #tpu.memory_space<vmem>>, vector<1x1x8x64xf32>
    %262 = vector.shape_cast %261 : vector<1x1x8x64xf32> to vector<8x64xf32>
    %263 = vector.shape_cast %260 : vector<8x64xf32> to vector<1x1x8x64xf32>
    tpu.vector_store %arg34[%c0_136, %c0_137, %c0_138, %c0_139], %263 {strides = array<i32>} : memref<1x1x8x64xf32, #tpu.memory_space<vmem>>, vector<1x1x8x64xf32>,
    return
  }
  func.func @transform_0(%arg0: i32) -> (i32, i32) {
    %c0_i32 = arith.constant 0 : i32
    %c0_i32_0 = arith.constant 0 : i32
    return %arg0, %c0_i32 : i32, i32
  }
  func.func @transform_1(%arg0: i32) -> (i32, i32) {
    %c0_i32 = arith.constant 0 : i32
    %c0_i32_0 = arith.constant 0 : i32
    %c0_i32_1 = arith.constant 0 : i32
    return %c0_i32, %c0_i32_0 : i32, i32
  }
  func.func @transform_2(%arg0: i32) -> i32 {
    %c0_i32 = arith.constant 0 : i32
    %c0_i32_0 = arith.constant 0 : i32
    return %c0_i32 : i32
  }
  func.func @transform_3(%arg0: i32) -> (i32, i32) {
    %c0_i32 = arith.constant 0 : i32
    %c0_i32_0 = arith.constant 0 : i32
    %c0_i32_1 = arith.constant 0 : i32
    return %c0_i32, %c0_i32_0 : i32, i32
  }
  func.func @transform_4(%arg0: i32) -> (i32, i32) {
    %c0_i32 = arith.constant 0 : i32
    %c0_i32_0 = arith.constant 0 : i32
    %c0_i32_1 = arith.constant 0 : i32
    return %c0_i32, %c0_i32_0 : i32, i32
  }
  func.func @transform_5(%arg0: i32) -> (i32, i32) {
    %c0_i32 = arith.constant 0 : i32
    %c0_i32_0 = arith.constant 0 : i32
    %c0_i32_1 = arith.constant 0 : i32
    return %c0_i32, %c0_i32_0 : i32, i32
  }
  func.func @transform_6(%arg0: i32) -> (i32, i32) {
    %c0_i32 = arith.constant 0 : i32
    %c0_i32_0 = arith.constant 0 : i32
    %c0_i32_1 = arith.constant 0 : i32
    return %c0_i32, %c0_i32_0 : i32, i32
  }
  func.func @transform_7(%arg0: i32) -> (i32, i32) {
    %c0_i32 = arith.constant 0 : i32
    %c0_i32_0 = arith.constant 0 : i32
    %c0_i32_1 = arith.constant 0 : i32
    return %c0_i32, %c0_i32_0 : i32, i32
  }
  func.func @transform_8(%arg0: i32) -> (i32, i32) {
    %c0_i32 = arith.constant 0 : i32
    %c0_i32_0 = arith.constant 0 : i32
    %c0_i32_1 = arith.constant 0 : i32
    return %c0_i32, %c0_i32_0 : i32, i32
  }
  func.func @transform_9(%arg0: i32) -> (i32, i32) {
    %c0_i32 = arith.constant 0 : i32
    %c0_i32_0 = arith.constant 0 : i32
    %c0_i32_1 = arith.constant 0 : i32
    return %c0_i32, %c0_i32_0 : i32, i32
  }
  func.func @transform_10(%arg0: i32) -> (i32, i32) {
    %c0_i32 = arith.constant 0 : i32
    %c0_i32_0 = arith.constant 0 : i32
    %c0_i32_1 = arith.constant 0 : i32
    return %c0_i32, %c0_i32_0 : i32, i32
  }
  func.func @transform_11(%arg0: i32) -> (i32, i32) {
    %c0_i32 = arith.constant 0 : i32
    %c0_i32_0 = arith.constant 0 : i32
    %c0_i32_1 = arith.constant 0 : i32
    return %c0_i32, %c0_i32_0 : i32, i32
  }
  func.func @transform_12(%arg0: i32) -> (i32, i32) {
    %c0_i32 = arith.constant 0 : i32
    %c0_i32_0 = arith.constant 0 : i32
    %c0_i32_1 = arith.constant 0 : i32
    return %c0_i32, %c0_i32_0 : i32, i32
  }
  func.func @transform_13(%arg0: i32) -> (i32, i32) {
    %c0_i32 = arith.constant 0 : i32
    %c0_i32_0 = arith.constant 0 : i32
    %c0_i32_1 = arith.constant 0 : i32
    return %c0_i32, %c0_i32_0 : i32, i32
  }
  func.func @transform_14(%arg0: i32) -> (i32, i32) {
    %c0_i32 = arith.constant 0 : i32
    %c0_i32_0 = arith.constant 0 : i32
    %c0_i32_1 = arith.constant 0 : i32
    return %c0_i32, %c0_i32_0 : i32, i32
  }
  func.func @transform_15(%arg0: i32) -> (i32, i32) {
    %c0_i32 = arith.constant 0 : i32
    %c0_i32_0 = arith.constant 0 : i32
    %c0_i32_1 = arith.constant 0 : i32
    return %c0_i32, %c0_i32_0 : i32, i32
  }
  func.func @transform_16(%arg0: i32) -> (i32, i32) {
    %c0_i32 = arith.constant 0 : i32
    %c0_i32_0 = arith.constant 0 : i32
    %c0_i32_1 = arith.constant 0 : i32
    return %c0_i32, %c0_i32_0 : i32, i32
  }
  func.func @transform_17(%arg0: i32) -> (i32, i32) {
    %c0_i32 = arith.constant 0 : i32
    %c0_i32_0 = arith.constant 0 : i32
    %c0_i32_1 = arith.constant 0 : i32
    return %c0_i32, %c0_i32_0 : i32, i32
  }
  func.func @transform_18(%arg0: i32) -> (i32, i32) {
    %c0_i32 = arith.constant 0 : i32
    %c0_i32_0 = arith.constant 0 : i32
    %c0_i32_1 = arith.constant 0 : i32
    return %c0_i32, %c0_i32_0 : i32, i32
  }
  func.func @transform_19(%arg0: i32) -> (i32, i32) {
    %c0_i32 = arith.constant 0 : i32
    %c0_i32_0 = arith.constant 0 : i32
    %c0_i32_1 = arith.constant 0 : i32
    return %c0_i32, %c0_i32_0 : i32, i32
  }
  func.func @transform_20(%arg0: i32) -> (i32, i32) {
    %c0_i32 = arith.constant 0 : i32
    %c0_i32_0 = arith.constant 0 : i32
    %c0_i32_1 = arith.constant 0 : i32
    return %c0_i32, %c0_i32_0 : i32, i32
  }
  func.func @transform_21(%arg0: i32) -> (i32, i32) {
    %c0_i32 = arith.constant 0 : i32
    %c0_i32_0 = arith.constant 0 : i32
    %c0_i32_1 = arith.constant 0 : i32
    return %c0_i32, %c0_i32_0 : i32, i32
  }
  func.func @transform_22(%arg0: i32) -> (i32, i32) {
    %c0_i32 = arith.constant 0 : i32
    %c0_i32_0 = arith.constant 0 : i32
    %c0_i32_1 = arith.constant 0 : i32
    return %c0_i32, %c0_i32_0 : i32, i32
  }
  func.func @transform_23(%arg0: i32) -> (i32, i32) {
    %c0_i32 = arith.constant 0 : i32
    %c0_i32_0 = arith.constant 0 : i32
    %c0_i32_1 = arith.constant 0 : i32
    return %c0_i32, %c0_i32_0 : i32, i32
  }
  func.func @transform_24(%arg0: i32) -> (i32, i32) {
    %c0_i32 = arith.constant 0 : i32
    %c0_i32_0 = arith.constant 0 : i32
    %c0_i32_1 = arith.constant 0 : i32
    return %c0_i32, %c0_i32_0 : i32, i32
  }
  func.func @transform_25(%arg0: i32) -> (i32, i32) {
    %c0_i32 = arith.constant 0 : i32
    %c0_i32_0 = arith.constant 0 : i32
    %c0_i32_1 = arith.constant 0 : i32
    return %c0_i32, %c0_i32_0 : i32, i32
  }
  func.func @transform_26(%arg0: i32) -> (i32, i32) {
    %c0_i32 = arith.constant 0 : i32
    %c0_i32_0 = arith.constant 0 : i32
    %c0_i32_1 = arith.constant 0 : i32
    return %c0_i32, %c0_i32_0 : i32, i32
  }
  func.func @transform_27(%arg0: i32) -> (i32, i32) {
    %c0_i32 = arith.constant 0 : i32
    %c0_i32_0 = arith.constant 0 : i32
    %c0_i32_1 = arith.constant 0 : i32
    return %c0_i32, %c0_i32_0 : i32, i32
  }
  func.func @transform_28(%arg0: i32) -> (i32, i32) {
    %c0_i32 = arith.constant 0 : i32
    %c0_i32_0 = arith.constant 0 : i32
    %c0_i32_1 = arith.constant 0 : i32
    return %c0_i32, %c0_i32_0 : i32, i32
  }
  func.func @transform_29(%arg0: i32) -> (i32, i32) {
    %c0_i32 = arith.constant 0 : i32
    %c0_i32_0 = arith.constant 0 : i32
    %c0_i32_1 = arith.constant 0 : i32
    return %c0_i32, %c0_i32_0 : i32, i32
  }
  func.func @transform_30(%arg0: i32) -> (i32, i32) {
    %c0_i32 = arith.constant 0 : i32
    %c0_i32_0 = arith.constant 0 : i32
    %c0_i32_1 = arith.constant 0 : i32
    return %c0_i32, %c0_i32_0 : i32, i32
  }
  func.func @transform_31(%arg0: i32) -> (i32, i32) {
    %c0_i32 = arith.constant 0 : i32
    %c0_i32_0 = arith.constant 0 : i32
    %c0_i32_1 = arith.constant 0 : i32
    return %c0_i32, %c0_i32_0 : i32, i32
  }
  func.func @transform_32(%arg0: i32) -> (i32, i32) {
    %c0_i32 = arith.constant 0 : i32
    %c0_i32_0 = arith.constant 0 : i32
    %c0_i32_1 = arith.constant 0 : i32
    return %c0_i32, %c0_i32_0 : i32, i32
  }
  func.func @transform_33(%arg0: i32) -> (i32, i32, i32, i32) {
    %c0_i32 = arith.constant 0 : i32
    %c0_i32_0 = arith.constant 0 : i32
    %c0_i32_1 = arith.constant 0 : i32
    %c0_i32_2 = arith.constant 0 : i32
    return %arg0, %c0_i32, %c0_i32_0, %c0_i32_1 : i32, i32, i32, i32
  }
}

</mosaic_0001>

<bundles_post_ra>
// kernel: tpu_custom_call.1
= control target key start
LH: loop header
LB: loop body
LE: loop exit
PB: predicated region body
PF: predicated region fallthrough
CT: control target
= control target key end

     0   :  { %s6509_s6 = smov 1   ;;  %s6510_s10 = smov 2   ;;  %s7843_s0 = inlined_call_operand.smem [shape: u32[34], index: -1, kind: input, shape index: {}] }
   0x1   :  { %s6573_s5 = sld [smem:[%s7843_s0]]   ;;  %s6511_s14 = smov 3  }
   0x2   :  { %s6578_s9 = sld [smem:[%s7843_s0 + %s6509_s6]]   ;;  %s6512_s18 = smov 4  }
   0x3   :  { %s6583_s13 = sld [smem:[%s7843_s0 + %s6510_s10]]   ;;  %s6513_s22 = smov 5  }
   0x4   :  { %s6588_s17 = sld [smem:[%s7843_s0 + %s6511_s14]]   ;;  %s6514_s26 = smov 6  }
   0x5   :  { %s6593_s21 = sld [smem:[%s7843_s0 + %s6512_s18]]   ;;  %s6515_s30 = smov 7  }
   0x6   :  { %s6598_s25 = sld [smem:[%s7843_s0 + %s6513_s22]]   ;;  %s6516_s4 = smov 8  }
   0x7   :  { %7865 = sst [smem:[#allocation42_spill]] %s6573_s5  ;;  %s6517_s10 = smov 9  }
   0x8   :  { %7866 = sst [smem:[#allocation43_spill]] %s6578_s9  ;;  %s6518_s15 = smov 10  }
   0x9   :  { %s6603_s29 = sld [smem:[%s7843_s0 + %s6514_s26]]   ;;  %s6519_s20 = smov 11  }
   0xa   :  { %7867 = sst [smem:[#allocation44_spill]] %s6588_s17  ;;  %s6520_s26 = smov 12  }
   0xb   :  { %7868 = sst [smem:[#allocation45_spill]] %s6593_s21  ;;  %s6521_s1 = smov 13  }
   0xc   :  { %7869 = sst [smem:[#allocation46_spill]] %s6598_s25  ;;  %s6522_s7 = smov 14  }
   0xd   :  { %s6608_s3 = sld [smem:[%s7843_s0 + %s6515_s30]]   ;;  %s6524_s22 = smov 16  }
   0xe   :  { %s6613_s8 = sld [smem:[%s7843_s0 + %s6516_s4]]   ;;  %s6525_s28 = smov 17  }
   0xf   :  { %7870 = sst [smem:[#allocation47_spill]] %s6603_s29  ;;  %s6541_s5 = smov 33  }
  0x10   :  { %s6618_s14 = sld [smem:[%s7843_s0 + %s6517_s10]]  }
  0x11   :  { %s6623_s19 = sld [smem:[%s7843_s0 + %s6518_s15]]   ;;  %s6523_s15 = smov 15  }
  0x12   :  { %s6628_s24 = sld [smem:[%s7843_s0 + %s6519_s20]]  }
  0x13   :  { %7871 = sst [smem:[#allocation48_spill]] %s6608_s3 }
  0x14   :  { %7872 = sst [smem:[#allocation49_spill]] %s6613_s8 }
  0x15   :  { %s6633_s30 = sld [smem:[%s7843_s0 + %s6520_s26]]  }
  0x16   :  { %7873 = sst [smem:[#allocation50_spill]] %s6618_s14 }
  0x17   :  { %7874 = sst [smem:[#allocation51_spill]] %s6623_s19 }
  0x18   :  { %s6638_s6 = sld [smem:[%s7843_s0 + %s6521_s1]]  }
  0x19   :  { %s6643_s12 = sld [smem:[%s7843_s0 + %s6522_s7]]   ;;  %s6526_s7 = smov 18  }
  0x1a   :  { %s6648_s20 = sld [smem:[%s7843_s0 + %s6523_s15]]   ;;  %s6527_s15 = smov 19  }
  0x1b   :  { %7875 = sst [smem:[#allocation52_spill]] %s6633_s30 }
  0x1c   :  { %s6653_s27 = sld [smem:[%s7843_s0 + %s6524_s22]]   ;;  %s6528_s22 = smov 20  }
  0x1d   :  { %s6658_s4 = sld [smem:[%s7843_s0 + %s6525_s28]]   ;;  %s6529_s28 = smov 21  }
  0x1e   :  { %7876 = sst [smem:[#allocation53_spill]] %s6638_s6 }
  0x1f   :  { %s6663_s9 = sld [smem:[%s7843_s0 + %s6526_s7]]   ;;  %s6530_s7 = smov 22  }
  0x20   :  { %s6668_s30 = sld [smem:[%s7843_s0 + %s6527_s15]]   ;;  %s6531_s15 = smov 23  }
  0x21   :  { %s6673_s19 = sld [smem:[%s7843_s0 + %s6528_s22]]   ;;  %s6532_s22 = smov 24  }
  0x22   :  { %s6678_s8 = sld [smem:[%s7843_s0 + %s6529_s28]]   ;;  %s6533_s28 = smov 25  }
  0x23   :  { %7877 = sst [smem:[#allocation54_spill]] %s6658_s4 }
  0x24   :  { %s6683_s29 = sld [smem:[%s7843_s0 + %s6530_s7]]   ;;  %s6534_s7 = smov 26  }
  0x25   :  { %s6688_s21 = sld [smem:[%s7843_s0 + %s6531_s15]]   ;;  %s6535_s15 = smov 27  }
  0x26   :  { %s6693_s17 = sld [smem:[%s7843_s0 + %s6532_s22]]   ;;  %s6536_s22 = smov 28  }
  0x27   :  { %7878 = sst [smem:[#allocation55_spill]] %s6673_s19 }
  0x28   :  { %7879 = sst [smem:[#allocation56_spill]] %s6678_s8 }
  0x29   :  { %s6698_s25 = sld [smem:[%s7843_s0 + %s6533_s28]]   ;;  %s6537_s28 = smov 29  }
  0x2a   :  { %7880 = sst [smem:[#allocation57_spill]] %s6683_s29 }
  0x2b   :  { %7881 = sst [smem:[#allocation58_spill]] %s6688_s21  ;;  %s6539_s21 = smov 31  }
  0x2c   :  { %7882 = sst [smem:[#allocation59_spill]] %s6693_s17  ;;  %s6540_s17 = smov 32  }
  0x2d   :  { %s6703_s16 = sld [smem:[%s7843_s0 + %s6534_s7]]   ;;  %s6538_s7 = smov 30  }
  0x2e   :  { %s6708_s23 = sld [smem:[%s7843_s0 + %s6535_s15]]  }
  0x2f   :  { %s6713_s1 = sld [smem:[%s7843_s0 + %s6536_s22]]  }
  0x30   :  { %s6718_s10 = sld [smem:[%s7843_s0 + %s6537_s28]]  }
  0x31   :  { %s6723_s29 = sld [smem:[%s7843_s0 + %s6538_s7]]  }
  0x32   :  { %s6738_s19 = sld [smem:[%s7843_s0 + %s6541_s5]]  }
  0x33   :  { %7883 = sst [smem:[#allocation60_spill]] %s6703_s16 }
  0x34   :  { %7884 = sst [smem:[#allocation61_spill]] %s6708_s23 }
  0x35   :  { %7885 = sst [smem:[#allocation62_spill]] %s6713_s1 }
  0x36   :  { %s6728_s23 = sld [smem:[%s7843_s0 + %s6539_s21]]  }
  0x37   :  { %s6733_s1 = sld [smem:[%s7843_s0 + %s6540_s17]]  }
  0x38   :  { %72 = sst [smem:[#allocation3]] %s6583_s13 }
  0x39   :  { %73 = vsyncpa [#allocation5], 0 }
  0x3a   :  { %74 = vsyncpa [#allocation8], 0 }
  0x3b   :  { %75 = vsyncpa [#allocation11], 0 }
  0x3c   :  { %76 = vsyncpa [#allocation14], 0 }
  0x3d   :  { %77 = vsyncpa [#allocation17], 0 }
  0x3e   :  { %78 = vsyncpa [#allocation20], 0 }
  0x3f   :  { %79 = vsyncpa [#allocation23], 0 }
  0x40   :  { %80 = vsyncpa [#allocation26], 0 }
  0x41   :  { %81 = vsyncpa [#allocation29], 0 }
  0x42   :  { %82 = vsyncpa [#allocation6], 0 }
  0x43   :  { %84 = vsyncpa [#allocation6 + $0x1], 0  ;;  %s6741_s16 = smov 0   ;;  %s6743_s7 = smov 0  }
  0x44   :  { %s6745_s11 = smov 0   ;;  %s6747_s0 = smov 0  }
  0x45 LB: > { %s7886_s8 = sld [smem:[#allocation56_spill]]  ;;  %s7887_s4 = sld [smem:[#allocation54_spill]]  ;;  %s6495_s16 = sphi %s6741_s16, %s7945_s16   ;;  %s6507_s0 = sphi %s6747_s0, %s7942_s0   ;;  %s6503_s11 = sphi %s6745_s11, %s7944_s11   ;;  %s6499_s7 = sphi %s6743_s7, %s7946_s7  }
  0x46   : > { %s7888_s3 = sld [smem:[#allocation48_spill]]  ;;  %s7889_s14 = sld [smem:[#allocation50_spill]] }
  0x47   : > { %s7890_s6 = sld [smem:[#allocation53_spill]]  ;;  %7891 = sst [smem:[#allocation63_spill]] %s6495_s16 }
  0x48   : > { %7892 = sst [smem:[#allocation64_spill]] %s6503_s11  ;;  %s6762_s13 = sadd.s32 4294967295, %s6507_s0  }
  0x49   : > { %s4686_s21 = sadd.s32 4294967294, %s6507_s0   ;;  %s6766_s15 = sadd.s32 1, %s6507_s0  }
  0x4a   : > { %7893 = sst [smem:[#allocation65_spill]] %s6766_s15  ;;  %s795_s18 = sadd.s32 1, %s6503_s11 }
  0x4b   : > { %s792_s17 = ssub.s32 %s6507_s0, %s6766_s15  ;;  %p805_p0 = scmp.ne.s32.totalorder %s6503_s11, %s6499_s7 }
  0x4c   : > { %p793_p1 = scmp.eq.s32.totalorder %s792_s17, 0  ;;  %p806_p2 = scmp.eq.s32.totalorder %s6762_s13, 1 }
  0x4d   : > { %p811_p3 = scmp.ne.s32.totalorder %s6499_s7, %s6495_s16  ;;  %p812_p4 = scmp.eq.s32.totalorder %s4686_s21, 1 }
  0x4e   : > { %s6777_s22 = scalar_select %p793_p1, %s6503_s11, %s795_s18  }
  0x4f   : > { %p6779_p5 = por %p806_p2, %p805_p0  ;;  %p6783_p6 = por %p812_p4, %p811_p3 }
  0x50   : > { %7894 = sst [smem:[#allocation66_spill]] %s6777_s22  ;;  %p4687_p7 = scmp.ge.s32.totalorder %s6507_s0, 1 }
  0x51   : > { %s7895_s26 = scalar_select %p6779_p5, 1, 0 }
  0x52   : > { %s7896_s5 = scalar_select %p6783_p6, 1, 0 }
  0x53   : > { %p819_p8 = scmp.lt.s32.totalorder %s6507_s0, 3  ;;  %p7854_p9 = scmp.eq.s32.totalorder %s6762_s13, 0 }
  0x54   : > { %7897 = sst [smem:[#allocation67_spill]] %s7896_s5  ;;  %s6542_s2 = smov [#allocation7]  }
  0x55   : > { %p6790_p10 = pnand %p4687_p7, %p819_p8  ;;  %s865_s21 = sshll.u32 %s6542_s2, 4  ;;  %s6796_s21 = int_to_ptr.vmem [resolvable:$true] %s865_s21 }
  0x56   : > { %s6543_s17 = smov [#allocation10]   ;;  %s6544_s11 = smov [#allocation13]  }
  0x57   : > { %s7898_s28 = scalar_select %p6790_p10, 1, 0 }
  0x58   : > { %p5421_p11 = pneg %p6790_p10  ;;  %s897_s22 = sshll.u32 %s6543_s17, 4  ;;  %s6804_s22 = int_to_ptr.vmem [resolvable:$true] %s897_s22 }
  0x59   : > { %s6806_s15 = sshll.u32 %s6544_s11, 4  ;;  %s5933_s5 = scalar_lea.hbm %s7889_s14, 1024  ;;  %s922_s15 = int_to_ptr.vmem [resolvable:$true] %s6806_s15 }
  0x5a   : > { %p6800_p12 = pnand %p7854_p9, %p5421_p11  ;;  %p5934_p13 = scmp.ne.s32.totalorder %s7889_s14, %s5933_s5 }
  0x5b   : > { %p5940_p3 = scmp.lt.u32.totalorder %s5933_s5, %s7889_s14 }
  0x5c   : > { %p6812_p0 = pneg %p6800_p12 }
  0x5e   : > { %p5936_p1 = pnand %p6812_p0, %p5934_p13 }
  0x60   : > { %p5937_p2 = pneg %p5936_p1 }
  0x62   : > { %p5942_p4 = pnand %p5940_p3, %p5937_p2 }
  0x64   : > { %5945 = shalt.err (!%p5942_p4)
}
  0x65   : > { %s5946_s11 = scalar_lea.vmem %s6796_s21, 1024  ;;  %p5954_p9 = scmp.lt.s32.totalorder %s6796_s21, %s6796_s21 }
  0x66   : > { %p5947_p7 = scmp.ne.s32.totalorder %s6796_s21, %s5946_s11  ;;  %p5955_p6 = scmp.lt.s32.totalorder %s5946_s11, %s5946_s11 }
  0x68   : > { %p5949_p8 = pnand %p5947_p7, %p6812_p0  ;;  %p5956_p5 = por %p5955_p6, %p5954_p9 }
  0x6a   : > { %p5950_p11 = pneg %p5949_p8 }
  0x6c   : > { %p5957_p10 = pnand %p5956_p5, %p5950_p11 }
  0x6e   : > { %5960 = shalt.err (!%p5957_p10)
}
  0x6f   : > { %s7860_s17 = smov 64   ;;  %s7861_s5 = smov 4  }
  0x70   : > { %5427 = dma.hbm_to_vmem [thread:$0]  (!%p6800_p12), %s7889_s14, 1024, %s6796_s21, [#allocation8], %s7860_s17, %s7860_s17, %s7861_s5  }
  0x71   : > { %s5961_s16 = scalar_lea.hbm %s7890_s6, 1024 }
  0x72   : > { %p5962_p13 = scmp.ne.s32.totalorder %s7890_s6, %s5961_s16  ;;  %p5968_p9 = scmp.lt.u32.totalorder %s5961_s16, %s7890_s6 }
  0x74   : > { %p5964_p6 = pnand %p5962_p13, %p6812_p0 }
  0x76   : > { %p5965_p5 = pneg %p5964_p6 }
  0x78   : > { %p5970_p10 = pnand %p5968_p9, %p5965_p5 }
  0x7a   : > { %5973 = shalt.err (!%p5970_p10)
}
  0x7b   : > { %s5974_s11 = scalar_lea.vmem %s6804_s22, 1024  ;;  %p5982_p4 = scmp.lt.s32.totalorder %s6804_s22, %s6804_s22 }
  0x7c   : > { %p5975_p1 = scmp.ne.s32.totalorder %s6804_s22, %s5974_s11  ;;  %p5983_p7 = scmp.lt.s32.totalorder %s5974_s11, %s5974_s11 }
  0x7e   : > { %p5977_p2 = pnand %p5975_p1, %p6812_p0  ;;  %p5984_p8 = por %p5983_p7, %p5982_p4 }
  0x80   : > { %p5978_p3 = pneg %p5977_p2 }
  0x82   : > { %p5985_p11 = pnand %p5984_p8, %p5978_p3 }
  0x84   : > { %5988 = shalt.err (!%p5985_p11)
}
  0x85   : > { %5433 = dma.hbm_to_vmem [thread:$0]  (!%p6800_p12), %s7890_s6, 1024, %s6804_s22, [#allocation11], %s7860_s17, %s7860_s17, %s7861_s5  }
  0x86   : > { %s5989_s16 = scalar_lea.hbm %s6648_s20, 1024 }
  0x87   : > { %p5990_p13 = scmp.ne.s32.totalorder %s6648_s20, %s5989_s16  ;;  %p5996_p9 = scmp.lt.u32.totalorder %s5989_s16, %s6648_s20 }
  0x89   : > { %p5992_p6 = pnand %p5990_p13, %p6812_p0 }
  0x8b   : > { %p5993_p5 = pneg %p5992_p6 }
  0x8d   : > { %p5998_p10 = pnand %p5996_p9, %p5993_p5 }
  0x8f   : > { %6001 = shalt.err (!%p5998_p10)
}
  0x90   : > { %s6002_s21 = scalar_lea.vmem %s922_s15, 1024  ;;  %p6010_p4 = scmp.lt.s32.totalorder %s922_s15, %s922_s15 }
  0x91   : > { %p6003_p1 = scmp.ne.s32.totalorder %s922_s15, %s6002_s21  ;;  %p6011_p7 = scmp.lt.s32.totalorder %s6002_s21, %s6002_s21 }
  0x93   : > { %p6005_p2 = pnand %p6003_p1, %p6812_p0  ;;  %p6012_p8 = por %p6011_p7, %p6010_p4 }
  0x95   : > { %p6006_p3 = pneg %p6005_p2 }
  0x97   : > { %p6013_p11 = pnand %p6012_p8, %p6006_p3 }
  0x99   : > { %6016 = shalt.err (!%p6013_p11)
}
  0x9a   : > { %5439 = dma.hbm_to_vmem [thread:$0]  (!%p6800_p12), %s6648_s20, 1024, %s922_s15, [#allocation14], %s7860_s17, %s7860_s17, %s7861_s5  }
  0x9b   : > { %s6547_s22 = smov [#allocation16]   ;;  %s6548_s16 = smov [#allocation19]  }
  0x9c   : > { %s945_s11 = sshll.u32 %s6547_s22, 4  ;;  %s969_s6 = sshll.u32 %s6548_s16, 4  ;;  %s946_s11 = int_to_ptr.vmem [resolvable:$true] %s945_s11  ;;  %s970_s6 = int_to_ptr.vmem [resolvable:$true] %s969_s6 }
  0x9d   : > { %s6017_s21 = scalar_lea.hbm %s7887_s4, 1024 }
  0x9e   : > { %p6018_p13 = scmp.ne.s32.totalorder %s7887_s4, %s6017_s21  ;;  %p6024_p9 = scmp.lt.u32.totalorder %s6017_s21, %s7887_s4 }
  0xa0   : > { %p6020_p6 = pnand %p6018_p13, %p6812_p0 }
  0xa2   : > { %p6021_p5 = pneg %p6020_p6 }
  0xa4   : > { %p6026_p10 = pnand %p6024_p9, %p6021_p5 }
  0xa6   : > { %6029 = shalt.err (!%p6026_p10)
}
  0xa7   : > { %s6030_s14 = scalar_lea.vmem %s946_s11, 1024  ;;  %p6038_p4 = scmp.lt.s32.totalorder %s946_s11, %s946_s11 }
  0xa8   : > { %p6031_p1 = scmp.ne.s32.totalorder %s946_s11, %s6030_s14  ;;  %p6039_p7 = scmp.lt.s32.totalorder %s6030_s14, %s6030_s14 }
  0xaa   : > { %p6033_p2 = pnand %p6031_p1, %p6812_p0  ;;  %p6040_p8 = por %p6039_p7, %p6038_p4 }
  0xac   : > { %p6034_p3 = pneg %p6033_p2 }
  0xae   : > { %p6041_p11 = pnand %p6040_p8, %p6034_p3 }
  0xb0   : > { %6044 = shalt.err (!%p6041_p11)
}
  0xb1   : > { %5445 = dma.hbm_to_vmem [thread:$0]  (!%p6800_p12), %s7887_s4, 1024, %s946_s11, [#allocation17], %s7860_s17, %s7860_s17, %s7861_s5  }
  0xb2   : > { %s6045_s15 = scalar_lea.hbm %s6668_s30, 1024 }
  0xb3   : > { %p6046_p13 = scmp.ne.s32.totalorder %s6668_s30, %s6045_s15  ;;  %p6052_p9 = scmp.lt.u32.totalorder %s6045_s15, %s6668_s30 }
  0xb5   : > { %p6048_p6 = pnand %p6046_p13, %p6812_p0 }
  0xb7   : > { %p6049_p5 = pneg %p6048_p6 }
  0xb9   : > { %p6054_p10 = pnand %p6052_p9, %p6049_p5 }
  0xbb   : > { %6057 = shalt.err (!%p6054_p10)
}
  0xbc   : > { %s6058_s14 = scalar_lea.vmem %s970_s6, 1024  ;;  %p6066_p4 = scmp.lt.s32.totalorder %s970_s6, %s970_s6 }
  0xbd   : > { %p6059_p1 = scmp.ne.s32.totalorder %s970_s6, %s6058_s14  ;;  %p6067_p7 = scmp.lt.s32.totalorder %s6058_s14, %s6058_s14 }
  0xbf   : > { %p6061_p2 = pnand %p6059_p1, %p6812_p0  ;;  %p6068_p8 = por %p6067_p7, %p6066_p4 }
  0xc1   : > { %p6062_p3 = pneg %p6061_p2 }
  0xc3   : > { %p6069_p11 = pnand %p6068_p8, %p6062_p3 }
  0xc5   : > { %6072 = shalt.err (!%p6069_p11)
}
  0xc6   : > { %5451 = dma.hbm_to_vmem [thread:$0]  (!%p6800_p12), %s6668_s30, 1024, %s970_s6, [#allocation20], %s7860_s17, %s7860_s17, %s7861_s5  }
  0xc7   : > { %s6549_s22 = smov [#allocation22]   ;;  %s6550_s16 = smov [#allocation25]  }
  0xc8   : > { %s993_s11 = sshll.u32 %s6549_s22, 4  ;;  %s1023_s21 = sshll.u32 %s6550_s16, 4  ;;  %s994_s11 = int_to_ptr.vmem [resolvable:$true] %s993_s11  ;;  %s1024_s21 = int_to_ptr.vmem [resolvable:$true] %s1023_s21 }
  0xc9   : > { %s6073_s15 = scalar_lea.hbm %s7886_s8, 1024 }
  0xca   : > { %p6074_p13 = scmp.ne.s32.totalorder %s7886_s8, %s6073_s15  ;;  %p6080_p9 = scmp.lt.u32.totalorder %s6073_s15, %s7886_s8 }
  0xcc   : > { %p6076_p6 = pnand %p6074_p13, %p6812_p0 }
  0xce   : > { %p6077_p5 = pneg %p6076_p6 }
  0xd0   : > { %p6082_p10 = pnand %p6080_p9, %p6077_p5 }
  0xd2   : > { %6085 = shalt.err (!%p6082_p10)
}
  0xd3   : > { %s6086_s14 = scalar_lea.vmem %s994_s11, 1024  ;;  %p6094_p4 = scmp.lt.s32.totalorder %s994_s11, %s994_s11 }
  0xd4   : > { %p6087_p1 = scmp.ne.s32.totalorder %s994_s11, %s6086_s14  ;;  %p6095_p7 = scmp.lt.s32.totalorder %s6086_s14, %s6086_s14 }
  0xd6   : > { %p6089_p2 = pnand %p6087_p1, %p6812_p0  ;;  %p6096_p8 = por %p6095_p7, %p6094_p4 }
  0xd8   : > { %p6090_p3 = pneg %p6089_p2 }
  0xda   : > { %p6097_p11 = pnand %p6096_p8, %p6090_p3 }
  0xdc   : > { %6100 = shalt.err (!%p6097_p11)
}
  0xdd   : > { %5457 = dma.hbm_to_vmem [thread:$0]  (!%p6800_p12), %s7886_s8, 1024, %s994_s11, [#allocation23], %s7860_s17, %s7860_s17, %s7861_s5  }
  0xde   : > { %s6101_s6 = scalar_lea.hbm %s6698_s25, 1024 }
  0xdf   : > { %p6102_p13 = scmp.ne.s32.totalorder %s6698_s25, %s6101_s6  ;;  %p6108_p9 = scmp.lt.u32.totalorder %s6101_s6, %s6698_s25 }
  0xe1   : > { %p6104_p6 = pnand %p6102_p13, %p6812_p0 }
  0xe3   : > { %p6105_p5 = pneg %p6104_p6 }
  0xe5   : > { %p6110_p10 = pnand %p6108_p9, %p6105_p5 }
  0xe7   : > { %6113 = shalt.err (!%p6110_p10)
}
  0xe8   : > { %s6114_s22 = scalar_lea.vmem %s1024_s21, 1024  ;;  %p6122_p4 = scmp.lt.s32.totalorder %s1024_s21, %s1024_s21 }
  0xe9   : > { %p6115_p1 = scmp.ne.s32.totalorder %s1024_s21, %s6114_s22  ;;  %p6123_p7 = scmp.lt.s32.totalorder %s6114_s22, %s6114_s22 }
  0xeb   : > { %p6117_p2 = pnand %p6115_p1, %p6812_p0  ;;  %p6124_p8 = por %p6123_p7, %p6122_p4 }
  0xed   : > { %p6118_p3 = pneg %p6117_p2 }
  0xef   : > { %p6125_p11 = pnand %p6124_p8, %p6118_p3 }
  0xf1   : > { %6128 = shalt.err (!%p6125_p11)
}
  0xf2   : > { %5463 = dma.hbm_to_vmem [thread:$0]  (!%p6800_p12), %s6698_s25, 1024, %s1024_s21, [#allocation26], %s7860_s17, %s7860_s17, %s7861_s5  }
  0xf3   : > { %s6551_s11 = smov [#allocation28]   ;;  %s6552_s15 = smov [#allocation4]  }
  0xf4   : > { %s1055_s16 = sshll.u32 %s6551_s11, 4  ;;  %s849_s14 = sshll.u32 %s6552_s15, 4  ;;  %s1056_s16 = int_to_ptr.vmem [resolvable:$true] %s1055_s16  ;;  %s850_s14 = int_to_ptr.vmem [resolvable:$true] %s849_s14 }
  0xf5   : > { %s6129_s6 = scalar_lea.hbm %s6718_s10, 1024 }
  0xf6   : > { %p6130_p13 = scmp.ne.s32.totalorder %s6718_s10, %s6129_s6  ;;  %p6136_p9 = scmp.lt.u32.totalorder %s6129_s6, %s6718_s10 }
  0xf8   : > { %p6132_p6 = pnand %p6130_p13, %p6812_p0 }
  0xfa   : > { %p6133_p5 = pneg %p6132_p6 }
  0xfc   : > { %p6138_p10 = pnand %p6136_p9, %p6133_p5 }
  0xfe   : > { %6141 = shalt.err (!%p6138_p10)
}
  0xff   : > { %s6142_s22 = scalar_lea.vmem %s1056_s16, 1024  ;;  %p6150_p4 = scmp.lt.s32.totalorder %s1056_s16, %s1056_s16 }
 0x100   : > { %p6143_p1 = scmp.ne.s32.totalorder %s1056_s16, %s6142_s22  ;;  %p6151_p7 = scmp.lt.s32.totalorder %s6142_s22, %s6142_s22 }
 0x102   : > { %p6145_p2 = pnand %p6143_p1, %p6812_p0  ;;  %p6152_p8 = por %p6151_p7, %p6150_p4 }
 0x104   : > { %p6146_p3 = pneg %p6145_p2 }
 0x106   : > { %p6153_p11 = pnand %p6152_p8, %p6146_p3 }
 0x108   : > { %6156 = shalt.err (!%p6153_p11)
}
 0x109   : > { %5469 = dma.hbm_to_vmem [thread:$0]  (!%p6800_p12), %s6718_s10, 1024, %s1056_s16, [#allocation29], %s7860_s17, %s7860_s17, %s7861_s5  }
 0x10a   : > { %s6157_s21 = scalar_lea.hbm %s7888_s3, 1024 }
 0x10b   : > { %p6158_p13 = scmp.ne.s32.totalorder %s7888_s3, %s6157_s21  ;;  %p6164_p9 = scmp.lt.u32.totalorder %s6157_s21, %s7888_s3 }
 0x10d   : > { %p6160_p6 = pnand %p6158_p13, %p6812_p0 }
 0x10f   : > { %p6161_p5 = pneg %p6160_p6 }
 0x111   : > { %p6166_p10 = pnand %p6164_p9, %p6161_p5 }
 0x113   : > { %6169 = shalt.err (!%p6166_p10)
}
 0x114   : > { %s6170_s11 = scalar_lea.vmem %s850_s14, 1024  ;;  %p6178_p4 = scmp.lt.s32.totalorder %s850_s14, %s850_s14 }
 0x115   : > { %p6171_p1 = scmp.ne.s32.totalorder %s850_s14, %s6170_s11  ;;  %p6179_p7 = scmp.lt.s32.totalorder %s6170_s11, %s6170_s11 }
 0x117   : > { %p6173_p2 = pnand %p6171_p1, %p6812_p0  ;;  %p6180_p8 = por %p6179_p7, %p6178_p4 }
 0x119   : > { %p6174_p3 = pneg %p6173_p2 }
 0x11b   : > { %p6181_p11 = pnand %p6180_p8, %p6174_p3 }
 0x11d   : > { %6184 = shalt.err (!%p6181_p11)
}
 0x11e   : > { %5424 = dma.hbm_to_vmem [thread:$0]  (!%p6800_p12), %s7888_s3, 1024, %s850_s14, [#allocation5], %s7860_s17, %s7860_s17, %s7861_s5  }
 0x11f   : > { %s6553_s16 = smov [#allocation9]   ;;  %s6554_s6 = smov [#allocation12]  }
 0x120   : > { %s881_s15 = sshll.u32 %s6553_s16, 4  ;;  %s911_s22 = sshll.u32 %s6554_s6, 4  ;;  %s882_s15 = int_to_ptr.vmem [resolvable:$true] %s881_s15  ;;  %s912_s22 = int_to_ptr.vmem [resolvable:$true] %s911_s22 }
 0x121   : > { %s6185_s21 = scalar_lea.hbm %s6628_s24, 1024 }
 0x122   : > { %p6186_p13 = scmp.ne.s32.totalorder %s6628_s24, %s6185_s21  ;;  %p6192_p9 = scmp.lt.u32.totalorder %s6185_s21, %s6628_s24 }
 0x124   : > { %p6188_p6 = pnand %p6186_p13, %p6812_p0 }
 0x126   : > { %p6189_p5 = pneg %p6188_p6 }
 0x128   : > { %p6194_p10 = pnand %p6192_p9, %p6189_p5 }
 0x12a   : > { %6197 = shalt.err (!%p6194_p10)
}
 0x12b   : > { %s6198_s11 = scalar_lea.vmem %s882_s15, 1024  ;;  %p6206_p4 = scmp.lt.s32.totalorder %s882_s15, %s882_s15 }
 0x12c   : > { %p6199_p1 = scmp.ne.s32.totalorder %s882_s15, %s6198_s11  ;;  %p6207_p7 = scmp.lt.s32.totalorder %s6198_s11, %s6198_s11 }
 0x12e   : > { %p6201_p2 = pnand %p6199_p1, %p6812_p0  ;;  %p6208_p8 = por %p6207_p7, %p6206_p4 }
 0x130   : > { %p6202_p3 = pneg %p6201_p2 }
 0x132   : > { %p6209_p11 = pnand %p6208_p8, %p6202_p3 }
 0x134   : > { %6212 = shalt.err (!%p6209_p11)
}
 0x135   : > { %5430 = dma.hbm_to_vmem [thread:$0]  (!%p6800_p12), %s6628_s24, 1024, %s882_s15, [#allocation8], %s7860_s17, %s7860_s17, %s7861_s5  }
 0x136   : > { %s6213_s14 = scalar_lea.hbm %s6643_s12, 16 }
 0x137   : > { %p6214_p13 = scmp.ne.s32.totalorder %s6643_s12, %s6213_s14  ;;  %p6220_p9 = scmp.lt.u32.totalorder %s6213_s14, %s6643_s12 }
 0x139   : > { %p6216_p6 = pnand %p6214_p13, %p6812_p0 }
 0x13b   : > { %p6217_p5 = pneg %p6216_p6 }
 0x13d   : > { %p6222_p10 = pnand %p6220_p9, %p6217_p5 }
 0x13f   : > { %6225 = shalt.err (!%p6222_p10)
}
 0x140   : > { %s6226_s16 = scalar_lea.vmem %s912_s22, 16  ;;  %s6233_s6 = scalar_lea.vmem %s912_s22, 32 }
 0x141   : > { %p6227_p1 = scmp.ne.s32.totalorder %s912_s22, %s6226_s16  ;;  %p6234_p4 = scmp.lt.s32.totalorder %s912_s22, %s912_s22 }
 0x142   : > { %p6235_p7 = scmp.lt.s32.totalorder %s6233_s6, %s6226_s16 }
 0x143   : > { %p6229_p2 = pnand %p6227_p1, %p6812_p0 }
 0x144   : > { %p6236_p8 = por %p6235_p7, %p6234_p4 }
 0x145   : > { %p6230_p3 = pneg %p6229_p2 }
 0x147   : > { %p6237_p11 = pnand %p6236_p8, %p6230_p3 }
 0x149   : > { %6240 = shalt.err (!%p6237_p11)
}
 0x14a   : > { %5436 = dma.hbm_to_vmem [thread:$0]  (!%p6800_p12), %s6643_s12, 16, %s912_s22, [#allocation11]  }
 0x14b   : > { %s6555_s15 = smov [#allocation15]   ;;  %s6556_s11 = smov [#allocation18]  }
 0x14c   : > { %s935_s21 = sshll.u32 %s6555_s15, 4  ;;  %s959_s14 = sshll.u32 %s6556_s11, 4  ;;  %s936_s21 = int_to_ptr.vmem [resolvable:$true] %s935_s21  ;;  %s960_s14 = int_to_ptr.vmem [resolvable:$true] %s959_s14 }
 0x14d   : > { %s6241_s17 = scalar_lea.hbm %s6653_s27, 16 }
 0x14e   : > { %p6242_p13 = scmp.ne.s32.totalorder %s6653_s27, %s6241_s17  ;;  %p6248_p9 = scmp.lt.u32.totalorder %s6241_s17, %s6653_s27 }
 0x150   : > { %p6244_p6 = pnand %p6242_p13, %p6812_p0 }
 0x152   : > { %p6245_p5 = pneg %p6244_p6 }
 0x154   : > { %p6250_p10 = pnand %p6248_p9, %p6245_p5 }
 0x156   : > { %6253 = shalt.err (!%p6250_p10)
}
 0x157   : > { %s6254_s16 = scalar_lea.vmem %s936_s21, 16  ;;  %s6261_s22 = scalar_lea.vmem %s936_s21, 32 }
 0x158   : > { %p6255_p1 = scmp.ne.s32.totalorder %s936_s21, %s6254_s16  ;;  %p6262_p4 = scmp.lt.s32.totalorder %s936_s21, %s936_s21 }
 0x159   : > { %p6263_p7 = scmp.lt.s32.totalorder %s6261_s22, %s6254_s16 }
 0x15a   : > { %p6257_p2 = pnand %p6255_p1, %p6812_p0 }
 0x15b   : > { %p6264_p8 = por %p6263_p7, %p6262_p4 }
 0x15c   : > { %p6258_p3 = pneg %p6257_p2 }
 0x15e   : > { %p6265_p11 = pnand %p6264_p8, %p6258_p3 }
 0x160   : > { %6268 = shalt.err (!%p6265_p11)
}
 0x161   : > { %5442 = dma.hbm_to_vmem [thread:$0]  (!%p6800_p12), %s6653_s27, 16, %s936_s21, [#allocation14]  }
 0x162   : > { %s6269_s17 = scalar_lea.hbm %s6663_s9, 16 }
 0x163   : > { %p6270_p13 = scmp.ne.s32.totalorder %s6663_s9, %s6269_s17  ;;  %p6276_p9 = scmp.lt.u32.totalorder %s6269_s17, %s6663_s9 }
 0x165   : > { %p6272_p6 = pnand %p6270_p13, %p6812_p0 }
 0x167   : > { %p6273_p5 = pneg %p6272_p6 }
 0x169   : > { %p6278_p10 = pnand %p6276_p9, %p6273_p5 }
 0x16b   : > { %6281 = shalt.err (!%p6278_p10)
}
 0x16c   : > { %s6282_s6 = scalar_lea.vmem %s960_s14, 16  ;;  %s6289_s15 = scalar_lea.vmem %s960_s14, 32 }
 0x16d   : > { %p6283_p1 = scmp.ne.s32.totalorder %s960_s14, %s6282_s6  ;;  %p6290_p4 = scmp.lt.s32.totalorder %s960_s14, %s960_s14 }
 0x16e   : > { %p6291_p7 = scmp.lt.s32.totalorder %s6289_s15, %s6282_s6 }
 0x16f   : > { %p6285_p2 = pnand %p6283_p1, %p6812_p0 }
 0x170   : > { %p6292_p8 = por %p6291_p7, %p6290_p4 }
 0x171   : > { %p6286_p3 = pneg %p6285_p2 }
 0x173   : > { %p6293_p11 = pnand %p6292_p8, %p6286_p3 }
 0x175   : > { %6296 = shalt.err (!%p6293_p11)
}
 0x176   : > { %s7901_s21 = sld [smem:[#allocation55_spill]]  ;;  %s6557_s11 = smov [#allocation21]  }
 0x177   : > { %5448 = dma.hbm_to_vmem [thread:$0]  (!%p6800_p12), %s6663_s9, 16, %s960_s14, [#allocation17]  }
 0x178   : > { %s983_s16 = sshll.u32 %s6557_s11, 4  ;;  %s6558_s22 = smov [#allocation24]   ;;  %s984_s16 = int_to_ptr.vmem [resolvable:$true] %s983_s16 }
 0x179   : > { %s1007_s17 = sshll.u32 %s6558_s22, 4  ;;  %s1008_s17 = int_to_ptr.vmem [resolvable:$true] %s1007_s17 }
 0x17c   : > { %s6297_s5 = scalar_lea.hbm %s7901_s21, 16 }
 0x17d   : > { %p6298_p13 = scmp.ne.s32.totalorder %s7901_s21, %s6297_s5  ;;  %p6304_p9 = scmp.lt.u32.totalorder %s6297_s5, %s7901_s21 }
 0x17f   : > { %p6300_p6 = pnand %p6298_p13, %p6812_p0 }
 0x181   : > { %p6301_p5 = pneg %p6300_p6 }
 0x183   : > { %p6306_p10 = pnand %p6304_p9, %p6301_p5 }
 0x185   : > { %6309 = shalt.err (!%p6306_p10)
}
 0x186   : > { %s6310_s6 = scalar_lea.vmem %s984_s16, 16  ;;  %s6317_s14 = scalar_lea.vmem %s984_s16, 32 }
 0x187   : > { %p6311_p1 = scmp.ne.s32.totalorder %s984_s16, %s6310_s6  ;;  %p6318_p4 = scmp.lt.s32.totalorder %s984_s16, %s984_s16 }
 0x188   : > { %p6319_p7 = scmp.lt.s32.totalorder %s6317_s14, %s6310_s6 }
 0x189   : > { %p6313_p2 = pnand %p6311_p1, %p6812_p0 }
 0x18a   : > { %p6320_p8 = por %p6319_p7, %p6318_p4 }
 0x18b   : > { %p6314_p3 = pneg %p6313_p2 }
 0x18d   : > { %p6321_p11 = pnand %p6320_p8, %p6314_p3 }
 0x18f   : > { %6324 = shalt.err (!%p6321_p11)
}
 0x190   : > { %s7902_s15 = sld [smem:[#allocation57_spill]] }
 0x191   : > { %5454 = dma.hbm_to_vmem [thread:$0]  (!%p6800_p12), %s7901_s21, 16, %s984_s16, [#allocation20]  }
 0x196   : > { %s6325_s5 = scalar_lea.hbm %s7902_s15, 16 }
 0x197   : > { %p6326_p13 = scmp.ne.s32.totalorder %s7902_s15, %s6325_s5  ;;  %p6332_p9 = scmp.lt.u32.totalorder %s6325_s5, %s7902_s15 }
 0x199   : > { %p6328_p6 = pnand %p6326_p13, %p6812_p0 }
 0x19b   : > { %p6329_p5 = pneg %p6328_p6 }
 0x19d   : > { %p6334_p10 = pnand %p6332_p9, %p6329_p5 }
 0x19f   : > { %6337 = shalt.err (!%p6334_p10)
}
 0x1a0   : > { %s6338_s11 = scalar_lea.vmem %s1008_s17, 16  ;;  %s6345_s22 = scalar_lea.vmem %s1008_s17, 32 }
 0x1a1   : > { %p6339_p1 = scmp.ne.s32.totalorder %s1008_s17, %s6338_s11  ;;  %p6346_p4 = scmp.lt.s32.totalorder %s1008_s17, %s1008_s17 }
 0x1a2   : > { %p6347_p7 = scmp.lt.s32.totalorder %s6345_s22, %s6338_s11 }
 0x1a3   : > { %p6341_p2 = pnand %p6339_p1, %p6812_p0 }
 0x1a4   : > { %p6348_p8 = por %p6347_p7, %p6346_p4 }
 0x1a5   : > { %p6342_p3 = pneg %p6341_p2 }
 0x1a7   : > { %p6349_p11 = pnand %p6348_p8, %p6342_p3 }
 0x1a9   : > { %6352 = shalt.err (!%p6349_p11)
}
 0x1aa   : > { %s7903_s16 = sld [smem:[#allocation61_spill]]  ;;  %s6559_s14 = smov [#allocation27]  }
 0x1ab   : > { %5460 = dma.hbm_to_vmem [thread:$0]  (!%p6800_p12), %s7902_s15, 16, %s1008_s17, [#allocation23]  }
 0x1ac   : > { %s1039_s5 = sshll.u32 %s6559_s14, 4  ;;  %s6560_s3 = smov [#allocation30]   ;;  %s1040_s5 = int_to_ptr.vmem [resolvable:$true] %s1039_s5 }
 0x1ad   : > { %s1071_s4 = sshll.u32 %s6560_s3, 4  ;;  %s1072_s4 = int_to_ptr.vmem [resolvable:$true] %s1071_s4 }
 0x1b0   : > { %s7904_s6 = smov %s7903_s16  ;;  %s6353_s8 = scalar_lea.hbm %s7903_s16, 1024 }
 0x1b1   : > { %p6354_p13 = scmp.ne.s32.totalorder %s7904_s6, %s6353_s8  ;;  %p6360_p9 = scmp.lt.u32.totalorder %s6353_s8, %s7904_s6 }
 0x1b3   : > { %p6356_p6 = pnand %p6354_p13, %p6812_p0 }
 0x1b5   : > { %p6357_p5 = pneg %p6356_p6 }
 0x1b7   : > { %p6362_p10 = pnand %p6360_p9, %p6357_p5 }
 0x1b9   : > { %6365 = shalt.err (!%p6362_p10)
}
 0x1ba   : > { %s6366_s11 = scalar_lea.vmem %s1040_s5, 1024  ;;  %p6374_p4 = scmp.lt.s32.totalorder %s1040_s5, %s1040_s5 }
 0x1bb   : > { %p6367_p1 = scmp.ne.s32.totalorder %s1040_s5, %s6366_s11  ;;  %p6375_p7 = scmp.lt.s32.totalorder %s6366_s11, %s6366_s11 }
 0x1bd   : > { %p6369_p2 = pnand %p6367_p1, %p6812_p0  ;;  %p6376_p8 = por %p6375_p7, %p6374_p4 }
 0x1bf   : > { %p6370_p3 = pneg %p6369_p2 }
 0x1c1   : > { %p6377_p11 = pnand %p6376_p8, %p6370_p3 }
 0x1c3   : > { %6380 = shalt.err (!%p6377_p11)
}
 0x1c4   : > { %s7905_s3 = smov 4   ;;  %s7906_s17 = smov 64  }
 0x1c5   : > { %5466 = dma.hbm_to_vmem [thread:$0]  (!%p6800_p12), %s7904_s6, 1024, %s1040_s5, [#allocation26], %s7906_s17, %s7906_s17, %s7905_s3  }
 0x1c6   : > { %s6381_s8 = scalar_lea.hbm %s6728_s23, 2048 }
 0x1c7   : > { %p6382_p13 = scmp.ne.s32.totalorder %s6728_s23, %s6381_s8  ;;  %p6388_p9 = scmp.lt.u32.totalorder %s6381_s8, %s6728_s23 }
 0x1c9   : > { %p6384_p6 = pnand %p6382_p13, %p6812_p0 }
 0x1cb   : > { %p6385_p5 = pneg %p6384_p6 }
 0x1cd   : > { %p6390_p10 = pnand %p6388_p9, %p6385_p5 }
 0x1cf   : > { %6393 = shalt.err (!%p6390_p10)
}
 0x1d0   : > { %s6394_s22 = scalar_lea.vmem %s1072_s4, 2048  ;;  %p6402_p4 = scmp.lt.s32.totalorder %s1072_s4, %s1072_s4 }
 0x1d1   : > { %p6395_p1 = scmp.ne.s32.totalorder %s1072_s4, %s6394_s22  ;;  %p6403_p7 = scmp.lt.s32.totalorder %s6394_s22, %s6394_s22 }
 0x1d3   : > { %p6397_p2 = pnand %p6395_p1, %p6812_p0  ;;  %p6404_p8 = por %p6403_p7, %p6402_p4 }
 0x1d5   : > { %p6398_p3 = pneg %p6397_p2 }
 0x1d7   : > { %p6405_p11 = pnand %p6404_p8, %p6398_p3 }
 0x1d9   : > { %6408 = shalt.err (!%p6405_p11)
}
 0x1da   : > { %s6561_s16 = smov 128   ;;  %s6562_s14 = smov 8  }
 0x1db   : > { %5472 = dma.hbm_to_vmem [thread:$0]  (!%p6800_p12), %s6728_s23, 2048, %s1072_s4, [#allocation29], %s6561_s16, %s6561_s16, %s6562_s14  }
 0x1dc   : > { %p7907_p13 = scmp.ne.s32.totalorder %s7898_s28, 0 }
 0x1dd   : > { %p7908_p6 = scmp.eq.s32.totalorder (!%p7907_p13), %s6762_s13, 0 }
 0x1de   : > { %1099 = sbr.rel (%p7907_p13) target bundleno = 4330 (0x10ea), region = 152 }
 0x1e5   : > { %6454 = dma.done.wait (%p7908_p6), [#allocation5], 1024   ;;  %p7909_p0 = pmov %p7908_p6 }
 0x1e7   : > { %6456 = vsyncadd (%p7909_p0), [#allocation5], 4294966272  ;;  %p7910_p5 = pmov %p7909_p0 }
 0x1e8   : > { %p7911_p9 = pmov %p7909_p0 }
 0x1e9   : > { %6458 = dma.done.wait (%p7910_p5), [#allocation8], 2048  }
 0x1ea   : > { %6460 = vsyncadd (%p7911_p9), [#allocation8], 4294965248  ;;  %p7912_p10 = pmov %p7909_p0 }
 0x1eb   : > { %p7913_p12 = pmov %p7909_p0 }
 0x1ec   : > { %6462 = dma.done.wait (%p7912_p10), [#allocation11], 1040  }
 0x1ed   : > { %6464 = vsyncadd (%p7913_p12), [#allocation11], 4294966256  ;;  %p7914_p1 = pmov %p7909_p0 }
 0x1ee   : > { %p7915_p2 = pmov %p7909_p0 }
 0x1ef   : > { %6466 = dma.done.wait (%p7914_p1), [#allocation14], 1040  }
 0x1f0   : > { %6468 = vsyncadd (%p7915_p2), [#allocation14], 4294966256  ;;  %p7916_p3 = pmov %p7909_p0 }
 0x1f1   : > { %p7917_p4 = pmov %p7909_p0 }
 0x1f2   : > { %6470 = dma.done.wait (%p7916_p3), [#allocation17], 1040  }
 0x1f3   : > { %6472 = vsyncadd (%p7917_p4), [#allocation17], 4294966256  ;;  %p7918_p7 = pmov %p7909_p0 }
 0x1f4   : > { %p7919_p8 = pmov %p7909_p0 }
 0x1f5   : > { %6474 = dma.done.wait (%p7918_p7), [#allocation20], 1040  }
 0x1f6   : > { %6476 = vsyncadd (%p7919_p8), [#allocation20], 4294966256  ;;  %p7920_p11 = pmov %p7909_p0 }
 0x1f7   : > { %p7921_p13 = pmov %p7909_p0 }
 0x1f8   : > { %6478 = dma.done.wait (%p7920_p11), [#allocation23], 1040  }
 0x1f9   : > { %6480 = vsyncadd (%p7921_p13), [#allocation23], 4294966256  ;;  %p7922_p6 = pmov %p7909_p0 }
 0x1fb   : > { %6482 = dma.done.wait (%p7922_p6), [#allocation26], 2048  }
 0x1fc   : > { %6484 = vsyncadd (%p7909_p0), [#allocation26], 4294965248  ;;  %p7923_p5 = pmov %p7909_p0 }
 0x1fd   : > { %p7924_p9 = pmov %p7909_p0 }
 0x1fe   : > { %6486 = dma.done.wait (%p7923_p5), [#allocation29], 3072  }
 0x1ff   : > { %6488 = vsyncadd (%p7924_p9), [#allocation29], 4294964224  ;;  %s7925_s4 = sld [smem:[#allocation42_spill]]  ;;  %s4725_s28 = sshll.u32 %s6762_s13, 3  ;;  %v6563_v0 = vmov 0   ;;  %v1305_v17 = vlaneseq  ;;  %vm4414_vm0 = vcmask 523264  }
 0x200   : > { %5600 = vset.pattern.permute.xlu1 %v6563_v0  ;;  %s7926_s18 = sld [smem:[#allocation46_spill]]  ;;  %5599 = vset.pattern.permute.xlu0 %v6563_v0  ;;  %p1248_p10 = scmp.lt.s32.totalorder %s4725_s28, 15 }
 0x201   : > { %s7927_s11 = sld [smem:[#allocation44_spill]]  ;;  %s7928_s3 = sld [smem:[#allocation45_spill]]  ;;  %v7078_v18 = vshrl.u32 %v1305_v17, 7 }
 0x202   : > { %s7948_s28 = smov (!%p1248_p10, %s4725_s28), 15  ;;  %s7929_s17 = sld [smem:[#allocation47_spill]] }
 0x203   : > { %s4726_s2 = sshll.u32 %s7948_s28, 3  ;;  %v1307_v21 = vsub.s32 0, %v7078_v18  ;;  %s7930_s8 = sld [smem:[#allocation49_spill]] }
 0x204   : > { %s7931_s22 = sld [smem:[#allocation51_spill]]  ;;  %s7932_s16 = sld [smem:[#allocation52_spill]] }
 0x205   : > { %s1251_s5 = scalar_lea.vmem %s7925_s4, %s4726_s2  ;;  %s7933_s14 = sld [smem:[#allocation58_spill]] }
 0x206   : > { %v1256_v1 = vld [vmem:[%s1251_s5 + $0x10] sm:$0xff]  ;;  %v1254_v2 = vld [vmem:[%s1251_s5] sm:$0xff]  ;;  %v1257_v3 = vld [vmem:[%s1251_s5 + $0x18] sm:$0xff]  ;;  %s7934_s4 = sld [smem:[#allocation59_spill]]  ;;  %s7935_s28 = sld [smem:[#allocation60_spill]] }
 0x207   : > { %1277 = vperm.xlu1 %5600, %v1256_v1   ;;  %1267 = vperm.xlu0 %5599, %v1254_v2   ;;  %v1255_v4 = vld [vmem:[%s1251_s5 + $0x8] sm:$0xff]  ;;  %v1258_v6 = vld [vmem:[%s1251_s5 + $0x20] sm:$0xff]  ;;  %v1261_v8 = vld [vmem:[%s1251_s5 + $0x38] sm:$0xff]  ;;  %s7936_s2 = sld [smem:[#allocation62_spill]]  ;;  %p7938_p1 = scmp.ne.s32.totalorder %s7895_s26, 0 }
 0x208   : > { %v1259_v5 = vld [vmem:[%s1251_s5 + $0x28] sm:$0xff]  ;;  %v5601_v7 = vld [vmem:[%s7926_s18] sm:$0xff]   ;;  %v1260_v9 = vld [vmem:[%s1251_s5 + $0x30] sm:$0xff]  ;;  %s7937_s5 = sld [smem:[#allocation43_spill]] }
 0x209   : > { %5061 = vmatprep.subr.bf16.mxu0 %v5601_v7  ;;  %v5602_v10 = vld [vmem:[%s7926_s18 + $0x8] sm:$0xff]   ;;  %v5603_v11 = vld [vmem:[%s7926_s18 + $0x10] sm:$0xff]   ;;  %v5604_v12 = vld [vmem:[%s7926_s18 + $0x18] sm:$0xff]  }
 0x20a   : > { %5062 = vmatpush3.bf16.msra.mxu0 %v5601_v7  ;;  %v5605_v13 = vld [vmem:[%s7926_s18 + $0x20] sm:$0xff]   ;;  %v5606_v14 = vld [vmem:[%s7926_s18 + $0x28] sm:$0xff]   ;;  %v5607_v15 = vld [vmem:[%s7926_s18 + $0x30] sm:$0xff]  }
 0x20b   : > { %1282 = vperm.xlu1 %5600, %v1257_v3   ;;  %1272 = vperm.xlu0 %5599, %v1255_v4   ;;  %v5608_v16 = vld [vmem:[%s7926_s18 + $0x38] sm:$0xff]   ;;  %v1262_v19 = vld [vmem:[%s7927_s11] sm:$0x1]  ;;  %s4318_s11 = sld [smem:[#allocation3]] }
 0x20c   : > { %5063 = vmatprep.subr.bf16.mxu0 %v5602_v10  ;;  %v1264_v20 = vunpack.c.l.bf16 %v1262_v19  ;;  %v4727_v23 = vld [vmem:[%s7928_s3] ss:$0 sm:$0xff]  ;;  %s1244_s3 = sand.u32 1, %s6499_s7  }
 0x20e   : > { %5064 = vmatpush3.bf16.msra.mxu0 %v5602_v10  ;;  %v1308_v22 = vrot.slane %v1264_v20, %v1307_v21 }
 0x20f   : > { %1292 = vperm.xlu1 %5600, %v1259_v5   ;;  %1287 = vperm.xlu0 %5599, %v1258_v6  }
 0x210   : > { %5065 = vmatprep.subr.bf16.mxu0 %v5603_v11 }
 0x212   : > { %5066 = vmatpush3.bf16.msra.mxu0 %v5603_v11 }
 0x213   : > { %1302 = vperm.xlu1 %5600, %v1261_v8   ;;  %1297 = vperm.xlu0 %5599, %v1260_v9  }
 0x214   : > { %5067 = vmatprep.subr.bf16.mxu0 %v5604_v12 }
 0x216   : > { %5068 = vmatpush3.bf16.msra.mxu0 %v5604_v12 }
 0x217   : > { %5069 = vmatprep.subr.bf16.mxu0 %v5605_v13 }
 0x21a   : > { %5070 = vmatpush3.bf16.msra.mxu0 %v5605_v13 }
 0x21b   : > { %5071 = vmatprep.subr.bf16.mxu0 %v5606_v14 }
 0x21e   : > { %5072 = vmatpush3.bf16.msra.mxu0 %v5606_v14 }
 0x21f   : > { %5073 = vmatprep.subr.bf16.mxu0 %v5607_v15 }
 0x222   : > { %5074 = vmatpush3.bf16.msra.mxu0 %v5607_v15 }
 0x223   : > { %5075 = vmatprep.subr.bf16.mxu0 %v5608_v16 }
 0x226   : > { %5076 = vmatpush3.bf16.msra.mxu0 %v5608_v16 }
 0x286   : > { %v1278_v24 = vpop.permute.xlu1 %1277  ;;  %v1268_v25 = vpop.permute.xlu0 %1267 }
 0x287   : > { %v1311_v26 = vmul.f32 %v1308_v22, %v1278_v24  ;;  %v1309_v27 = vmul.f32 %v1308_v22, %v1268_v25 }
 0x289   : > { %v7085_v28 = vadd.f32 %v4727_v23, %v1311_v26  ;;  %v7087_v29 = vadd.f32 %v4727_v23, %v1309_v27 }
 0x28a   : > { %v1283_v30 = vpop.permute.xlu1 %1282  ;;  %v1273_v31 = vpop.permute.xlu0 %1272 }
 0x28b   : > { %v1333_v32 = vmul.f32 %v7085_v28, %v7085_v28  ;;  %v1331_v33 = vmul.f32 %v7087_v29, %v7087_v29  ;;  %v1312_v34 = vmul.f32 %v1308_v22, %v1283_v30  ;;  %v1310_v35 = vmul.f32 %v1308_v22, %v1273_v31 }
 0x28d   : > { %v1341_v36 = vmul.f32 %v1333_v32, %v7085_v28  ;;  %v1339_v37 = vmul.f32 %v1331_v33, %v7087_v29  ;;  %v7095_v38 = vadd.f32 %v4727_v23, %v1312_v34  ;;  %v7097_v39 = vadd.f32 %v4727_v23, %v1310_v35 }
 0x28e   : > { %v1293_v40 = vpop.permute.xlu1 %1292  ;;  %v1288_v41 = vpop.permute.xlu0 %1287 }
 0x28f   : > { %v1349_v42 = vmul.f32 0.044715, %v1341_v36  ;;  %v1334_v43 = vmul.f32 %v7095_v38, %v7095_v38  ;;  %v1332_v44 = vmul.f32 %v7097_v39, %v7097_v39  ;;  %v1314_v45 = vmul.f32 %v1308_v22, %v1293_v40 }
 0x290   : > { %v1313_v46 = vmul.f32 %v1308_v22, %v1288_v41  ;;  %v1347_v47 = vmul.f32 0.044715, %v1339_v37 }
 0x291   : > { %v1357_v48 = vadd.f32 %v1349_v42, %v7085_v28  ;;  %v1342_v49 = vmul.f32 %v1334_v43, %v7095_v38  ;;  %v1340_v50 = vmul.f32 %v1332_v44, %v7097_v39  ;;  %v7106_v51 = vadd.f32 %v4727_v23, %v1314_v45 }
 0x292   : > { %v7108_v52 = vadd.f32 %v4727_v23, %v1313_v46  ;;  %v1303_v53 = vpop.permute.xlu1 %1302  ;;  %v1298_v54 = vpop.permute.xlu0 %1297  ;;  %v1355_v55 = vadd.f32 %v1347_v47, %v7087_v29 }
 0x293   : > { %v1365_v56 = vmul.f32 0.7978846, %v1357_v48  ;;  %v1350_v57 = vmul.f32 0.044715, %v1342_v49  ;;  %v1336_v58 = vmul.f32 %v7106_v51, %v7106_v51  ;;  %v1316_v59 = vmul.f32 %v1308_v22, %v1303_v53 }
 0x294   : > { %v1335_v60 = vmul.f32 %v7108_v52, %v7108_v52  ;;  %v1315_v61 = vmul.f32 %v1308_v22, %v1298_v54  ;;  %v1348_v62 = vmul.f32 0.044715, %v1340_v50  ;;  %v1363_v63 = vmul.f32 0.7978846, %v1355_v55 }
 0x295   : > { %v1358_v1 = vadd.f32 %v1350_v57, %v7095_v38  ;;  %v1344_v2 = vmul.f32 %v1336_v58, %v7106_v51  ;;  %v7117_v3 = vadd.f32 %v4727_v23, %v1316_v59  ;;  %5741 = vtanh.f32 %v1365_v56 }
 0x296   : > { %v1343_v4 = vmul.f32 %v1335_v60, %v7108_v52  ;;  %v7120_v5 = vadd.f32 %v4727_v23, %v1315_v61  ;;  %v1356_v6 = vadd.f32 %v1348_v62, %v7097_v39  ;;  %5743 = vtanh.f32 %v1363_v63 }
 0x297   : > { %v1366_v7 = vmul.f32 0.7978846, %v1358_v1  ;;  %v1352_v8 = vmul.f32 0.044715, %v1344_v2  ;;  %v1338_v9 = vmul.f32 %v7117_v3, %v7117_v3  ;;  %v5609_v2 = vld [vmem:[#allocation4] sm:$0xff]  }
 0x298   : > { %v1351_v10 = vmul.f32 0.044715, %v1343_v4  ;;  %v1337_v11 = vmul.f32 %v7120_v5, %v7120_v5  ;;  %v1364_v12 = vmul.f32 0.7978846, %v1356_v6  ;;  %5085 = vmatprep.subr.bf16.mxu1 %v5609_v2  ;;  %v5611_v4 = vld [vmem:[#allocation4 + $0x10] sm:$0xff]   ;;  %v5613_v6 = vld [vmem:[#allocation4 + $0x20] sm:$0xff]  }
 0x299   : > { %v1360_v13 = vadd.f32 %v1352_v8, %v7106_v51  ;;  %v1346_v14 = vmul.f32 %v1338_v9, %v7117_v3  ;;  %5745 = vtanh.f32 %v1366_v7  ;;  %5086 = vmatpush3.bf16.msra.mxu1 %v5609_v2  ;;  %v5616_v7 = vld [vmem:[#allocation4 + $0x38] sm:$0xff]   ;;  %v4728_v8 = vld [vmem:[%s7929_s17] ss:$0 sm:$0xff]  ;;  %s4724_s17 = sshll.u32 %s1244_s3, 3 }
 0x29a   : > { %v1359_v15 = vadd.f32 %v1351_v10, %v7108_v52  ;;  %v1345_v16 = vmul.f32 %v1337_v11, %v7120_v5  ;;  %5747 = vtanh.f32 %v1364_v12 }
 0x29b   : > { %v1368_v17 = vmul.f32 0.7978846, %v1360_v13  ;;  %v1354_v19 = vmul.f32 0.044715, %v1346_v14 }
 0x29c   : > { %v1367_v20 = vmul.f32 0.7978846, %v1359_v15  ;;  %v1353_v22 = vmul.f32 0.044715, %v1345_v16 }
 0x29d   : > { %v1362_v23 = vadd.f32 %v1354_v19, %v7117_v3  ;;  %5749 = vtanh.f32 %v1368_v17 }
 0x29e   : > { %v1361_v24 = vadd.f32 %v1353_v22, %v7120_v5  ;;  %5751 = vtanh.f32 %v1367_v20 }
 0x29f   : > { %v5742_v25 = vpop.eup %5741  ;;  %v1370_v26 = vmul.f32 0.7978846, %v1362_v23 }
 0x2a0   : > { %v5744_v27 = vpop.eup %5743  ;;  %v1369_v30 = vmul.f32 0.7978846, %v1361_v24  ;;  %v1381_v31 = vadd.f32 1.0, %v5742_v25 }
 0x2a1   : > { %v1379_v32 = vadd.f32 1.0, %v5744_v27  ;;  %5753 = vtanh.f32 %v1370_v26 }
 0x2a2   : > { %5755 = vtanh.f32 %v1369_v30  ;;  %v1389_v36 = vmul.f32 0.5, %v1381_v31 }
 0x2a3   : > { %v5746_v33 = vpop.eup %5745  ;;  %v1387_v40 = vmul.f32 0.5, %v1379_v32 }
 0x2a4   : > { %v5748_v34 = vpop.eup %5747  ;;  %v1382_v35 = vadd.f32 1.0, %v5746_v33  ;;  %v1397_v45 = vmul.f32 %v1389_v36, %v7085_v28 }
 0x2a5   : > { %v1380_v37 = vadd.f32 1.0, %v5748_v34  ;;  %v1395_v48 = vmul.f32 %v1387_v40, %v7087_v29 }
 0x2a6   : > { %v1390_v41 = vmul.f32 0.5, %v1382_v35 }
 0x2a7   : > { %v5750_v42 = vpop.eup %5749  ;;  %v1388_v43 = vmul.f32 0.5, %v1380_v37 }
 0x2a8   : > { %v5752_v44 = vpop.eup %5751  ;;  %v1398_v46 = vmul.f32 %v1390_v41, %v7095_v38  ;;  %v1384_v47 = vadd.f32 1.0, %v5750_v42 }
 0x2a9   : > { %v1396_v49 = vmul.f32 %v1388_v43, %v7097_v39  ;;  %v1383_v50 = vadd.f32 1.0, %v5752_v44 }
 0x2aa   : > { %v1421_v53 = vpack.c.bf16 %v1398_v46, %v1397_v45  ;;  %v1392_v54 = vmul.f32 0.5, %v1384_v47 }
 0x2ab   : > { %v5754_v55 = vpop.eup %5753  ;;  %v1420_v56 = vpack.c.bf16 %v1396_v49, %v1395_v48  ;;  %v1391_v57 = vmul.f32 0.5, %v1383_v50 }
 0x2ac   : > { %v5756_v58 = vpop.eup %5755  ;;  %v1400_v59 = vmul.f32 %v1392_v54, %v7106_v51  ;;  %v1386_v60 = vadd.f32 1.0, %v5754_v55  ;;  %v5610_v51 = vld [vmem:[#allocation4 + $0x8] sm:$0xff]  }
 0x2ad   : > { %5077 = vmatprep.mubr.bf16.mxu0 %v1420_v56  ;;  %v1399_v28 = vmul.f32 %v1391_v57, %v7108_v52  ;;  %v1385_v61 = vadd.f32 1.0, %v5756_v58  ;;  %5087 = vmatprep.subr.bf16.mxu1 %v5610_v51  ;;  %v5612_v52 = vld [vmem:[#allocation4 + $0x18] sm:$0xff]  }
 0x2ae   : > { %5078 = vmatmul.mubr.bf16.vlgmr.msra.gmra.mrb[0].mxu0 %v1421_v53  ;;  %v1394_v38 = vmul.f32 0.5, %v1386_v60  ;;  %5088 = vmatpush3.bf16.msra.mxu1 %v5610_v51 }
 0x2af   : > { %v1422_v62 = vpack.c.bf16 %v1400_v59, %v1399_v28  ;;  %v1393_v29 = vmul.f32 0.5, %v1385_v61  ;;  %5089 = vmatprep.subr.bf16.mxu1 %v5611_v4 }
 0x2b0   : > { %v1402_v39 = vmul.f32 %v1394_v38, %v7117_v3  ;;  %v5614_v3 = vld [vmem:[#allocation4 + $0x28] sm:$0xff]  }
 0x2b1   : > { %5081 = vmatprep.mubr.bf16.mxu0 %v1422_v62  ;;  %v1401_v63 = vmul.f32 %v1393_v29, %v7120_v5  ;;  %v5615_v5 = vld [vmem:[#allocation4 + $0x30] sm:$0xff]  }
 0x2b2   : > { %5090 = vmatpush3.bf16.msra.mxu1 %v5611_v4 }
 0x2b3   : > { %v1423_v1 = vpack.c.bf16 %v1402_v39, %v1401_v63  ;;  %5091 = vmatprep.subr.bf16.mxu1 %v5612_v52 }
 0x2b6   : > { %5082 = vmatmul.mubr.bf16.gmra.mrb[4].mxu0 %v1423_v1  ;;  %5092 = vmatpush3.bf16.msra.mxu1 %v5612_v52 }
 0x2b7   : > { %5093 = vmatprep.subr.bf16.mxu1 %v5613_v6 }
 0x2ba   : > { %5094 = vmatpush3.bf16.msra.mxu1 %v5613_v6 }
 0x2bb   : > { %5095 = vmatprep.subr.bf16.mxu1 %v5614_v3 }
 0x2be   : > { %5096 = vmatpush3.bf16.msra.mxu1 %v5614_v3 }
 0x2bf   : > { %5097 = vmatprep.subr.bf16.mxu1 %v5615_v5 }
 0x2c2   : > { %5098 = vmatpush3.bf16.msra.mxu1 %v5615_v5 }
 0x2c3   : > { %5099 = vmatprep.subr.bf16.mxu1 %v5616_v7 }
 0x2c6   : > { %5100 = vmatpush3.bf16.msra.mxu1 %v5616_v7 }
 0x381   : > { %v5079_v9 = vpop.f32.mrb[0].mxu0 }
 0x382   : > { %v7142_v10 = vadd.f32 %v5079_v9, %v4728_v8  ;;  %v1512_v11 = vpop.f32.mrb[1].mxu0 }
 0x383   : > { %v7144_v12 = vadd.f32 %v4728_v8, %v1512_v11  ;;  %v5080_v13 = vpop.f32.mrb[2].mxu0 }
 0x384   : > { %v1545_v14 = vmul.f32 %v7142_v10, %v7142_v10  ;;  %v7148_v15 = vadd.f32 %v5080_v13, %v4728_v8  ;;  %v1515_v16 = vpop.f32.mrb[3].mxu0 }
 0x385   : > { %v1543_v17 = vmul.f32 %v7144_v12, %v7144_v12  ;;  %v7152_v19 = vadd.f32 %v4728_v8, %v1515_v16 }
 0x386   : > { %v1553_v20 = vmul.f32 %v1545_v14, %v7142_v10  ;;  %v1546_v22 = vmul.f32 %v7148_v15, %v7148_v15 }
 0x387   : > { %v1551_v23 = vmul.f32 %v1543_v17, %v7144_v12  ;;  %v1544_v24 = vmul.f32 %v7152_v19, %v7152_v19 }
 0x388   : > { %v1561_v25 = vmul.f32 0.044715, %v1553_v20  ;;  %v1554_v26 = vmul.f32 %v1546_v22, %v7148_v15 }
 0x389   : > { %v1559_v27 = vmul.f32 0.044715, %v1551_v23  ;;  %v1552_v30 = vmul.f32 %v1544_v24, %v7152_v19  ;;  %v5083_v31 = vpop.f32.mrb[4].mxu0 }
 0x38a   : > { %v1569_v32 = vadd.f32 %v1561_v25, %v7142_v10  ;;  %v1562_v33 = vmul.f32 0.044715, %v1554_v26  ;;  %v7163_v34 = vadd.f32 %v5083_v31, %v4728_v8  ;;  %v1528_v35 = vpop.f32.mrb[5].mxu0 }
 0x38b   : > { %v1560_v36 = vmul.f32 0.044715, %v1552_v30  ;;  %v7165_v37 = vadd.f32 %v4728_v8, %v1528_v35  ;;  %v5084_v40 = vpop.f32.mrb[6].mxu0  ;;  %v1567_v41 = vadd.f32 %v1559_v27, %v7144_v12 }
 0x38c   : > { %v1577_v42 = vmul.f32 0.7978846, %v1569_v32  ;;  %v1570_v43 = vadd.f32 %v1562_v33, %v7148_v15  ;;  %v1549_v44 = vmul.f32 %v7163_v34, %v7163_v34  ;;  %v7171_v45 = vadd.f32 %v5084_v40, %v4728_v8  ;;  %v1531_v46 = vpop.f32.mrb[7].mxu0 }
 0x38d   : > { %v1547_v47 = vmul.f32 %v7165_v37, %v7165_v37  ;;  %v7175_v48 = vadd.f32 %v4728_v8, %v1531_v46  ;;  %v1568_v49 = vadd.f32 %v1560_v36, %v7152_v19  ;;  %v1575_v50 = vmul.f32 0.7978846, %v1567_v41 }
 0x38e   : > { %5757 = vtanh.f32 %v1577_v42  ;;  %v1578_v53 = vmul.f32 0.7978846, %v1570_v43  ;;  %v1557_v54 = vmul.f32 %v1549_v44, %v7163_v34  ;;  %v1550_v55 = vmul.f32 %v7171_v45, %v7171_v45 }
 0x38f   : > { %v1555_v56 = vmul.f32 %v1547_v47, %v7165_v37  ;;  %v1548_v57 = vmul.f32 %v7175_v48, %v7175_v48  ;;  %v1576_v58 = vmul.f32 0.7978846, %v1568_v49  ;;  %5759 = vtanh.f32 %v1575_v50  ;;  %v5617_v50 = vld [vmem:[#allocation7] sm:$0xff]  }
 0x390   : > { %5761 = vtanh.f32 %v1578_v53  ;;  %v1565_v59 = vmul.f32 0.044715, %v1557_v54  ;;  %v1558_v60 = vmul.f32 %v1550_v55, %v7171_v45  ;;  %5109 = vmatprep.subr.bf16.mxu0 %v5617_v50  ;;  %v5618_v53 = vld [vmem:[#allocation7 + $0x8] sm:$0xff]   ;;  %v5619_v54 = vld [vmem:[#allocation7 + $0x10] sm:$0xff]   ;;  %v5624_v55 = vld [vmem:[#allocation7 + $0x38] sm:$0xff]  }
 0x391   : > { %v1563_v28 = vmul.f32 0.044715, %v1555_v56  ;;  %v1556_v61 = vmul.f32 %v1548_v57, %v7175_v48  ;;  %5763 = vtanh.f32 %v1576_v58  ;;  %5110 = vmatpush3.bf16.msra.mxu0 %v5617_v50  ;;  %v4737_v56 = vld [vmem:[%s7930_s8] ss:$0 sm:$0xff]  ;;  %s4874_s8 = sshll.u32 %s6762_s13, 7  ;;  %s6564_s13 = smov [#allocation31]  }
 0x392   : > { %v1573_v38 = vadd.f32 %v1565_v59, %v7163_v34  ;;  %v1566_v62 = vmul.f32 0.044715, %v1558_v60  ;;  %5111 = vmatprep.subr.bf16.mxu0 %v5618_v53 }
 0x393   : > { %v1571_v29 = vadd.f32 %v1563_v28, %v7165_v37  ;;  %v1564_v39 = vmul.f32 0.044715, %v1556_v61 }
 0x394   : > { %v1581_v63 = vmul.f32 0.7978846, %v1573_v38  ;;  %v1574_v1 = vadd.f32 %v1566_v62, %v7171_v45 }
 0x395   : > { %v1579_v2 = vmul.f32 0.7978846, %v1571_v29  ;;  %v1572_v51 = vadd.f32 %v1564_v39, %v7175_v48  ;;  %5112 = vmatpush3.bf16.msra.mxu0 %v5618_v53 }
 0x396   : > { %5765 = vtanh.f32 %v1581_v63  ;;  %v1582_v4 = vmul.f32 0.7978846, %v1574_v1  ;;  %5113 = vmatprep.subr.bf16.mxu0 %v5619_v54 }
 0x397   : > { %5767 = vtanh.f32 %v1579_v2  ;;  %v1580_v52 = vmul.f32 0.7978846, %v1572_v51 }
 0x398   : > { %v5758_v6 = vpop.eup %5757  ;;  %5769 = vtanh.f32 %v1582_v4 }
 0x399   : > { %v5760_v3 = vpop.eup %5759  ;;  %5771 = vtanh.f32 %v1580_v52  ;;  %v1593_v5 = vadd.f32 1.0, %v5758_v6  ;;  %5114 = vmatpush3.bf16.msra.mxu0 %v5619_v54 }
 0x39a   : > { %v5762_v7 = vpop.eup %5761  ;;  %v1591_v8 = vadd.f32 1.0, %v5760_v3 }
 0x39b   : > { %v5764_v9 = vpop.eup %5763  ;;  %v1594_v11 = vadd.f32 1.0, %v5762_v7  ;;  %v1601_v13 = vmul.f32 0.5, %v1593_v5 }
 0x39c   : > { %v1592_v14 = vadd.f32 1.0, %v5764_v9  ;;  %v1599_v16 = vmul.f32 0.5, %v1591_v8 }
 0x39d   : > { %v1602_v17 = vmul.f32 0.5, %v1594_v11  ;;  %v1609_v22 = vmul.f32 %v1601_v13, %v7142_v10 }
 0x39e   : > { %v1600_v20 = vmul.f32 0.5, %v1592_v14  ;;  %v1607_v25 = vmul.f32 %v1599_v16, %v7144_v12 }
 0x39f   : > { %v1610_v23 = vmul.f32 %v1602_v17, %v7148_v15 }
 0x3a0   : > { %v5766_v24 = vpop.eup %5765  ;;  %v1608_v26 = vmul.f32 %v1600_v20, %v7152_v19 }
 0x3a1   : > { %v5768_v27 = vpop.eup %5767  ;;  %v1633_v30 = vpack.c.bf16 %v1610_v23, %v1609_v22  ;;  %v1597_v31 = vadd.f32 1.0, %v5766_v24 }
 0x3a2   : > { %v5770_v32 = vpop.eup %5769  ;;  %v1632_v33 = vpack.c.bf16 %v1608_v26, %v1607_v25  ;;  %v1595_v35 = vadd.f32 1.0, %v5768_v27 }
 0x3a3   : > { %v5772_v36 = vpop.eup %5771  ;;  %v1598_v40 = vadd.f32 1.0, %v5770_v32  ;;  %v1605_v41 = vmul.f32 0.5, %v1597_v31 }
 0x3a4   : > { %5101 = vmatprep.mubr.bf16.mxu1 %v1632_v33  ;;  %v1596_v42 = vadd.f32 1.0, %v5772_v36  ;;  %v1603_v43 = vmul.f32 0.5, %v1595_v35 }
 0x3a5   : > { %5102 = vmatmul.mubr.bf16.vlgmr.msra.gmra.mrb[0].mxu1 %v1633_v30  ;;  %v1606_v10 = vmul.f32 0.5, %v1598_v40  ;;  %v1613_v44 = vmul.f32 %v1605_v41, %v7163_v34  ;;  %v5620_v34 = vld [vmem:[#allocation7 + $0x18] sm:$0xff]  }
 0x3a6   : > { %v1604_v15 = vmul.f32 0.5, %v1596_v42  ;;  %v1611_v19 = vmul.f32 %v1603_v43, %v7165_v37  ;;  %5115 = vmatprep.subr.bf16.mxu0 %v5620_v34  ;;  %v5621_v37 = vld [vmem:[#allocation7 + $0x20] sm:$0xff]  }
 0x3a7   : > { %v1614_v12 = vmul.f32 %v1606_v10, %v7171_v45  ;;  %5116 = vmatpush3.bf16.msra.mxu0 %v5620_v34  ;;  %v5622_v45 = vld [vmem:[#allocation7 + $0x28] sm:$0xff]  }
 0x3a8   : > { %v1612_v46 = vmul.f32 %v1604_v15, %v7175_v48  ;;  %5117 = vmatprep.subr.bf16.mxu0 %v5621_v37  ;;  %v5623_v48 = vld [vmem:[#allocation7 + $0x30] sm:$0xff]  }
 0x3a9   : > { %v1635_v47 = vpack.c.bf16 %v1614_v12, %v1613_v44 }
 0x3aa   : > { %v1634_v49 = vpack.c.bf16 %v1612_v46, %v1611_v19 }
 0x3ab   : > { %5118 = vmatpush3.bf16.msra.mxu0 %v5621_v37 }
 0x3ac   : > { %5105 = vmatprep.mubr.bf16.mxu1 %v1634_v49  ;;  %5119 = vmatprep.subr.bf16.mxu0 %v5622_v45 }
 0x3ad   : > { %5106 = vmatmul.mubr.bf16.gmra.mrb[4].mxu1 %v1635_v47 }
 0x3af   : > { %5120 = vmatpush3.bf16.msra.mxu0 %v5622_v45 }
 0x3b0   : > { %5121 = vmatprep.subr.bf16.mxu0 %v5623_v48 }
 0x3b3   : > { %5122 = vmatpush3.bf16.msra.mxu0 %v5623_v48 }
 0x3b4   : > { %5123 = vmatprep.subr.bf16.mxu0 %v5624_v55 }
 0x3b7   : > { %5124 = vmatpush3.bf16.msra.mxu0 %v5624_v55 }
 0x478   : > { %v5103_v57 = vpop.f32.mrb[0].mxu1 }
 0x479   : > { %v7199_v58 = vadd.f32 %v5103_v57, %v4737_v56  ;;  %v1724_v59 = vpop.f32.mrb[1].mxu1 }
 0x47a   : > { %v7201_v60 = vadd.f32 %v4737_v56, %v1724_v59  ;;  %v5104_v28 = vpop.f32.mrb[2].mxu1 }
 0x47b   : > { %v1757_v61 = vmul.f32 %v7199_v58, %v7199_v58  ;;  %v7205_v38 = vadd.f32 %v5104_v28, %v4737_v56  ;;  %v1727_v62 = vpop.f32.mrb[3].mxu1 }
 0x47c   : > { %v1755_v29 = vmul.f32 %v7201_v60, %v7201_v60  ;;  %v7209_v39 = vadd.f32 %v4737_v56, %v1727_v62 }
 0x47d   : > { %v1765_v63 = vmul.f32 %v1757_v61, %v7199_v58  ;;  %v1758_v1 = vmul.f32 %v7205_v38, %v7205_v38 }
 0x47e   : > { %v1763_v2 = vmul.f32 %v1755_v29, %v7201_v60  ;;  %v1756_v51 = vmul.f32 %v7209_v39, %v7209_v39 }
 0x47f   : > { %v1773_v4 = vmul.f32 0.044715, %v1765_v63  ;;  %v1766_v52 = vmul.f32 %v1758_v1, %v7205_v38 }
 0x480   : > { %v1771_v6 = vmul.f32 0.044715, %v1763_v2  ;;  %v1764_v3 = vmul.f32 %v1756_v51, %v7209_v39  ;;  %v5107_v5 = vpop.f32.mrb[4].mxu1 }
 0x481   : > { %v1781_v7 = vadd.f32 %v1773_v4, %v7199_v58  ;;  %v1774_v8 = vmul.f32 0.044715, %v1766_v52  ;;  %v7220_v9 = vadd.f32 %v5107_v5, %v4737_v56  ;;  %v1740_v11 = vpop.f32.mrb[5].mxu1 }
 0x482   : > { %v1779_v13 = vadd.f32 %v1771_v6, %v7201_v60  ;;  %v1772_v14 = vmul.f32 0.044715, %v1764_v3  ;;  %v7223_v16 = vadd.f32 %v4737_v56, %v1740_v11  ;;  %v5108_v17 = vpop.f32.mrb[6].mxu1 }
 0x483   : > { %v1789_v20 = vmul.f32 0.7978846, %v1781_v7  ;;  %v1782_v22 = vadd.f32 %v1774_v8, %v7205_v38  ;;  %v1761_v23 = vmul.f32 %v7220_v9, %v7220_v9  ;;  %v7228_v24 = vadd.f32 %v5108_v17, %v4737_v56  ;;  %v1743_v25 = vpop.f32.mrb[7].mxu1 }
 0x484   : > { %v1787_v26 = vmul.f32 0.7978846, %v1779_v13  ;;  %v1780_v27 = vadd.f32 %v1772_v14, %v7209_v39  ;;  %v1759_v30 = vmul.f32 %v7223_v16, %v7223_v16  ;;  %v7233_v31 = vadd.f32 %v4737_v56, %v1743_v25 }
 0x485   : > { %5773 = vtanh.f32 %v1789_v20  ;;  %v1790_v32 = vmul.f32 0.7978846, %v1782_v22  ;;  %v1769_v33 = vmul.f32 %v1761_v23, %v7220_v9  ;;  %v1762_v35 = vmul.f32 %v7228_v24, %v7228_v24 }
 0x486   : > { %5775 = vtanh.f32 %v1787_v26  ;;  %v1788_v36 = vmul.f32 0.7978846, %v1780_v27  ;;  %v1767_v40 = vmul.f32 %v1759_v30, %v7223_v16  ;;  %v1760_v41 = vmul.f32 %v7233_v31, %v7233_v31  ;;  %v5625_v30 = vld [vmem:[#allocation9] sm:$0xff]  }
 0x487   : > { %5777 = vtanh.f32 %v1790_v32  ;;  %v1777_v42 = vmul.f32 0.044715, %v1769_v33  ;;  %v1770_v43 = vmul.f32 %v1762_v35, %v7228_v24  ;;  %5133 = vmatprep.subr.bf16.mxu1 %v5625_v30  ;;  %v5626_v32 = vld [vmem:[#allocation9 + $0x8] sm:$0xff]   ;;  %v5627_v33 = vld [vmem:[#allocation9 + $0x10] sm:$0xff]   ;;  %v5632_v35 = vld [vmem:[#allocation9 + $0x38] sm:$0xff]  }
 0x488   : > { %5779 = vtanh.f32 %v1788_v36  ;;  %v1775_v10 = vmul.f32 0.044715, %v1767_v40  ;;  %v1768_v15 = vmul.f32 %v1760_v41, %v7233_v31  ;;  %5134 = vmatpush3.bf16.msra.mxu1 %v5625_v30  ;;  %v5633_v36 = vld [vmem:[#allocation10] sm:$0xff]   ;;  %v5634_v40 = vld [vmem:[#allocation10 + $0x8] sm:$0xff]   ;;  %v5635_v41 = vld [vmem:[#allocation10 + $0x10] sm:$0xff]  }
 0x489   : > { %v1785_v44 = vadd.f32 %v1777_v42, %v7220_v9  ;;  %v1778_v12 = vmul.f32 0.044715, %v1770_v43  ;;  %5135 = vmatprep.subr.bf16.mxu1 %v5626_v32  ;;  %5157 = vmatprep.subr.bf16.mxu0 %v5633_v36  ;;  %v5636_v42 = vld [vmem:[#allocation10 + $0x18] sm:$0xff]   ;;  %v5637_v43 = vld [vmem:[#allocation10 + $0x20] sm:$0xff]  }
 0x48a   : > { %v1783_v19 = vadd.f32 %v1775_v10, %v7223_v16  ;;  %v1776_v46 = vmul.f32 0.044715, %v1768_v15  ;;  %v5638_v10 = vld [vmem:[#allocation10 + $0x28] sm:$0xff]   ;;  %v4746_v15 = vld [vmem:[%s7931_s22] ss:$0 sm:$0xff]  ;;  %s1246_s22 = scalar_lea.vmem [#allocation31], %s4724_s17 }
 0x48b   : > { %v1793_v47 = vmul.f32 0.7978846, %v1785_v44  ;;  %v1786_v49 = vadd.f32 %v1778_v12, %v7228_v24 }
 0x48c   : > { %v1791_v50 = vmul.f32 0.7978846, %v1783_v19  ;;  %v1784_v53 = vadd.f32 %v1776_v46, %v7233_v31  ;;  %5136 = vmatpush3.bf16.msra.mxu1 %v5626_v32 }
 0x48d   : > { %5781 = vtanh.f32 %v1793_v47  ;;  %v1794_v54 = vmul.f32 0.7978846, %v1786_v49  ;;  %5137 = vmatprep.subr.bf16.mxu1 %v5627_v33 }
 0x48e   : > { %5783 = vtanh.f32 %v1791_v50  ;;  %v1792_v34 = vmul.f32 0.7978846, %v1784_v53 }
 0x48f   : > { %v5774_v37 = vpop.eup %5773  ;;  %5785 = vtanh.f32 %v1794_v54 }
 0x490   : > { %v5776_v45 = vpop.eup %5775  ;;  %v1805_v48 = vadd.f32 1.0, %v5774_v37  ;;  %5787 = vtanh.f32 %v1792_v34  ;;  %5138 = vmatpush3.bf16.msra.mxu1 %v5627_v33 }
 0x491   : > { %v5778_v55 = vpop.eup %5777  ;;  %v1803_v56 = vadd.f32 1.0, %v5776_v45 }
 0x492   : > { %v5780_v57 = vpop.eup %5779  ;;  %v1813_v59 = vmul.f32 0.5, %v1805_v48  ;;  %v1806_v28 = vadd.f32 1.0, %v5778_v55 }
 0x493   : > { %v1804_v61 = vadd.f32 1.0, %v5780_v57  ;;  %v1811_v62 = vmul.f32 0.5, %v1803_v56 }
 0x494   : > { %v1814_v29 = vmul.f32 0.5, %v1806_v28  ;;  %v1821_v1 = vmul.f32 %v1813_v59, %v7199_v58 }
 0x495   : > { %v1812_v63 = vmul.f32 0.5, %v1804_v61  ;;  %v1819_v4 = vmul.f32 %v1811_v62, %v7201_v60 }
 0x496   : > { %v1822_v2 = vmul.f32 %v1814_v29, %v7205_v38 }
 0x497   : > { %v5782_v51 = vpop.eup %5781  ;;  %v1820_v52 = vmul.f32 %v1812_v63, %v7209_v39 }
 0x498   : > { %v5784_v6 = vpop.eup %5783  ;;  %v1845_v3 = vpack.c.bf16 %v1822_v2, %v1821_v1  ;;  %v1809_v5 = vadd.f32 1.0, %v5782_v51 }
 0x499   : > { %v5786_v7 = vpop.eup %5785  ;;  %v1844_v8 = vpack.c.bf16 %v1820_v52, %v1819_v4  ;;  %v1807_v11 = vadd.f32 1.0, %v5784_v6 }
 0x49a   : > { %v5788_v13 = vpop.eup %5787  ;;  %v1810_v14 = vadd.f32 1.0, %v5786_v7  ;;  %v1817_v17 = vmul.f32 0.5, %v1809_v5 }
 0x49b   : > { %5125 = vmatprep.mubr.bf16.mxu0 %v1844_v8  ;;  %v1808_v20 = vadd.f32 1.0, %v5788_v13  ;;  %v1815_v22 = vmul.f32 0.5, %v1807_v11 }
 0x49c   : > { %5126 = vmatmul.mubr.bf16.vlgmr.msra.gmra.mrb[8].mxu0 %v1845_v3  ;;  %v1818_v58 = vmul.f32 0.5, %v1810_v14  ;;  %v1825_v23 = vmul.f32 %v1817_v17, %v7220_v9  ;;  %v5628_v9 = vld [vmem:[#allocation9 + $0x18] sm:$0xff]  }
 0x49d   : > { %v1816_v38 = vmul.f32 0.5, %v1808_v20  ;;  %v1823_v39 = vmul.f32 %v1815_v22, %v7223_v16  ;;  %5139 = vmatprep.subr.bf16.mxu1 %v5628_v9  ;;  %v5630_v16 = vld [vmem:[#allocation9 + $0x28] sm:$0xff]   ;;  %5158 = vmatpush3.bf16.msra.mxu0 %v5633_v36 }
 0x49e   : > { %v1826_v60 = vmul.f32 %v1818_v58, %v7228_v24  ;;  %5140 = vmatpush3.bf16.msra.mxu1 %v5628_v9  ;;  %v5629_v24 = vld [vmem:[#allocation9 + $0x20] sm:$0xff]   ;;  %5159 = vmatprep.subr.bf16.mxu0 %v5634_v40 }
 0x49f   : > { %v1824_v25 = vmul.f32 %v1816_v38, %v7233_v31  ;;  %5141 = vmatprep.subr.bf16.mxu1 %v5629_v24  ;;  %v5631_v31 = vld [vmem:[#allocation9 + $0x30] sm:$0xff]  }
 0x4a0   : > { %v1847_v26 = vpack.c.bf16 %v1826_v60, %v1825_v23 }
 0x4a1   : > { %v1846_v27 = vpack.c.bf16 %v1824_v25, %v1823_v39  ;;  %5160 = vmatpush3.bf16.msra.mxu0 %v5634_v40 }
 0x4a2   : > { %5142 = vmatpush3.bf16.msra.mxu1 %v5629_v24  ;;  %5161 = vmatprep.subr.bf16.mxu0 %v5635_v41 }
 0x4a3   : > { %5129 = vmatprep.mubr.bf16.mxu0 %v1846_v27  ;;  %5143 = vmatprep.subr.bf16.mxu1 %v5630_v16 }
 0x4a4   : > { %5130 = vmatmul.mubr.bf16.gmra.mrb[12].mxu0 %v1847_v26 }
 0x4a5   : > { %5162 = vmatpush3.bf16.msra.mxu0 %v5635_v41 }
 0x4a6   : > { %5144 = vmatpush3.bf16.msra.mxu1 %v5630_v16  ;;  %5163 = vmatprep.subr.bf16.mxu0 %v5636_v42 }
 0x4a7   : > { %5145 = vmatprep.subr.bf16.mxu1 %v5631_v31 }
 0x4a9   : > { %5164 = vmatpush3.bf16.msra.mxu0 %v5636_v42 }
 0x4aa   : > { %5146 = vmatpush3.bf16.msra.mxu1 %v5631_v31  ;;  %5165 = vmatprep.subr.bf16.mxu0 %v5637_v43 }
 0x4ab   : > { %5147 = vmatprep.subr.bf16.mxu1 %v5632_v35 }
 0x4ad   : > { %5166 = vmatpush3.bf16.msra.mxu0 %v5637_v43 }
 0x4ae   : > { %5148 = vmatpush3.bf16.msra.mxu1 %v5632_v35  ;;  %5167 = vmatprep.subr.bf16.mxu0 %v5638_v10 }
 0x4b1   : > { %5168 = vmatpush3.bf16.msra.mxu0 %v5638_v10 }
 0x56f   : > { %v5127_v44 = vpop.f32.mrb[8].mxu0 }
 0x570   : > { %v7256_v12 = vadd.f32 %v5127_v44, %v4746_v15  ;;  %v1936_v19 = vpop.f32.mrb[9].mxu0 }
 0x571   : > { %v7258_v46 = vadd.f32 %v4746_v15, %v1936_v19  ;;  %v5128_v47 = vpop.f32.mrb[10].mxu0 }
 0x572   : > { %v1969_v49 = vmul.f32 %v7256_v12, %v7256_v12  ;;  %v7262_v50 = vadd.f32 %v5128_v47, %v4746_v15  ;;  %v1939_v53 = vpop.f32.mrb[11].mxu0 }
 0x573   : > { %v1967_v54 = vmul.f32 %v7258_v46, %v7258_v46  ;;  %v7266_v34 = vadd.f32 %v4746_v15, %v1939_v53 }
 0x574   : > { %v1977_v37 = vmul.f32 %v1969_v49, %v7256_v12  ;;  %v1970_v45 = vmul.f32 %v7262_v50, %v7262_v50 }
 0x575   : > { %v1975_v48 = vmul.f32 %v1967_v54, %v7258_v46  ;;  %v1968_v55 = vmul.f32 %v7266_v34, %v7266_v34 }
 0x576   : > { %v1985_v56 = vmul.f32 0.044715, %v1977_v37  ;;  %v1978_v57 = vmul.f32 %v1970_v45, %v7262_v50 }
 0x577   : > { %v1983_v59 = vmul.f32 0.044715, %v1975_v48  ;;  %v1976_v28 = vmul.f32 %v1968_v55, %v7266_v34  ;;  %v5131_v61 = vpop.f32.mrb[12].mxu0 }
 0x578   : > { %v1993_v62 = vadd.f32 %v1985_v56, %v7256_v12  ;;  %v1986_v29 = vmul.f32 0.044715, %v1978_v57  ;;  %v7277_v63 = vadd.f32 %v5131_v61, %v4746_v15  ;;  %v1952_v1 = vpop.f32.mrb[13].mxu0 }
 0x579   : > { %v1991_v2 = vadd.f32 %v1983_v59, %v7258_v46  ;;  %v1984_v51 = vmul.f32 0.044715, %v1976_v28  ;;  %v7280_v4 = vadd.f32 %v4746_v15, %v1952_v1  ;;  %v5132_v52 = vpop.f32.mrb[14].mxu0 }
 0x57a   : > { %v2001_v6 = vmul.f32 0.7978846, %v1993_v62  ;;  %v1994_v3 = vadd.f32 %v1986_v29, %v7262_v50  ;;  %v1973_v5 = vmul.f32 %v7277_v63, %v7277_v63  ;;  %v7285_v7 = vadd.f32 %v5132_v52, %v4746_v15  ;;  %v1955_v8 = vpop.f32.mrb[15].mxu0 }
 0x57b   : > { %v1999_v11 = vmul.f32 0.7978846, %v1991_v2  ;;  %v1992_v13 = vadd.f32 %v1984_v51, %v7266_v34  ;;  %v1971_v14 = vmul.f32 %v7280_v4, %v7280_v4  ;;  %v7290_v17 = vadd.f32 %v4746_v15, %v1955_v8 }
 0x57c   : > { %5789 = vtanh.f32 %v2001_v6  ;;  %v2002_v20 = vmul.f32 0.7978846, %v1994_v3  ;;  %v1981_v22 = vmul.f32 %v1973_v5, %v7277_v63  ;;  %v1974_v58 = vmul.f32 %v7285_v7, %v7285_v7 }
 0x57d   : > { %5791 = vtanh.f32 %v1999_v11  ;;  %v2000_v38 = vmul.f32 0.7978846, %v1992_v13  ;;  %v1979_v23 = vmul.f32 %v1971_v14, %v7280_v4  ;;  %v1972_v60 = vmul.f32 %v7290_v17, %v7290_v17  ;;  %v5639_v14 = vld [vmem:[#allocation10 + $0x30] sm:$0xff]  }
 0x57e   : > { %5793 = vtanh.f32 %v2002_v20  ;;  %v1989_v39 = vmul.f32 0.044715, %v1981_v22  ;;  %v1982_v25 = vmul.f32 %v1974_v58, %v7285_v7  ;;  %5169 = vmatprep.subr.bf16.mxu0 %v5639_v14  ;;  %v5640_v20 = vld [vmem:[#allocation10 + $0x38] sm:$0xff]   ;;  %v4755_v58 = vld [vmem:[%s7932_s16] ss:$0 sm:$0xff]  ;;  %s4430_s16 = sshll.u32 %s1246_s22, 4  ;;  %s7807_s16 = int_to_ptr.vmem [resolvable:$true] %s4430_s16 }
 0x57f   : > { %5795 = vtanh.f32 %v2000_v38  ;;  %v1987_v26 = vmul.f32 0.044715, %v1979_v23  ;;  %v1980_v27 = vmul.f32 %v1972_v60, %v7290_v17  ;;  %5170 = vmatpush3.bf16.msra.mxu0 %v5639_v14 }
 0x580   : > { %v1997_v30 = vadd.f32 %v1989_v39, %v7277_v63  ;;  %v1990_v32 = vmul.f32 0.044715, %v1982_v25  ;;  %5171 = vmatprep.subr.bf16.mxu0 %v5640_v20 }
 0x581   : > { %v1995_v33 = vadd.f32 %v1987_v26, %v7280_v4  ;;  %v1988_v9 = vmul.f32 0.044715, %v1980_v27 }
 0x582   : > { %v2005_v24 = vmul.f32 0.7978846, %v1997_v30  ;;  %v1998_v16 = vadd.f32 %v1990_v32, %v7285_v7 }
 0x583   : > { %v2003_v31 = vmul.f32 0.7978846, %v1995_v33  ;;  %v1996_v35 = vadd.f32 %v1988_v9, %v7290_v17  ;;  %5172 = vmatpush3.bf16.msra.mxu0 %v5640_v20 }
 0x584   : > { %5797 = vtanh.f32 %v2005_v24  ;;  %v2006_v36 = vmul.f32 0.7978846, %v1998_v16 }
 0x585   : > { %5799 = vtanh.f32 %v2003_v31  ;;  %v2004_v40 = vmul.f32 0.7978846, %v1996_v35 }
 0x586   : > { %v5790_v41 = vpop.eup %5789  ;;  %5801 = vtanh.f32 %v2006_v36  ;;  %v5641_v36 = vld [vmem:[#allocation13] sm:$0xff]  }
 0x587   : > { %v5792_v42 = vpop.eup %5791  ;;  %v2017_v43 = vadd.f32 1.0, %v5790_v41  ;;  %5803 = vtanh.f32 %v2004_v40  ;;  %5181 = vmatprep.subr.bf16.mxu1 %v5641_v36  ;;  %v5642_v40 = vld [vmem:[#allocation13 + $0x8] sm:$0xff]   ;;  %v5643_v41 = vld [vmem:[#allocation13 + $0x10] sm:$0xff]  }
 0x588   : > { %v5794_v10 = vpop.eup %5793  ;;  %v2015_v15 = vadd.f32 1.0, %v5792_v42  ;;  %v5644_v42 = vld [vmem:[#allocation13 + $0x18] sm:$0xff]  }
 0x589   : > { %v5796_v44 = vpop.eup %5795  ;;  %v2025_v19 = vmul.f32 0.5, %v2017_v43  ;;  %v2018_v47 = vadd.f32 1.0, %v5794_v10  ;;  %v5645_v43 = vld [vmem:[#allocation13 + $0x20] sm:$0xff]   ;;  %v5646_v10 = vld [vmem:[#allocation13 + $0x28] sm:$0xff]  }
 0x58a   : > { %v2016_v49 = vadd.f32 1.0, %v5796_v44  ;;  %v2023_v53 = vmul.f32 0.5, %v2015_v15  ;;  %v5647_v15 = vld [vmem:[#allocation13 + $0x30] sm:$0xff]   ;;  %v5648_v44 = vld [vmem:[#allocation13 + $0x38] sm:$0xff]  }
 0x58b   : > { %v2026_v54 = vmul.f32 0.5, %v2018_v47  ;;  %v2033_v45 = vmul.f32 %v2025_v19, %v7256_v12  ;;  %v4764_v19 = vld [vmem:[#allocation12] ss:$0 sm:$0xff] }
 0x58c   : > { %v2024_v37 = vmul.f32 0.5, %v2016_v49  ;;  %v2031_v56 = vmul.f32 %v2023_v53, %v7258_v46 }
 0x58d   : > { %v2034_v48 = vmul.f32 %v2026_v54, %v7262_v50 }
 0x58e   : > { %v5798_v55 = vpop.eup %5797  ;;  %v2032_v57 = vmul.f32 %v2024_v37, %v7266_v34 }
 0x58f   : > { %v5800_v59 = vpop.eup %5799  ;;  %v2057_v28 = vpack.c.bf16 %v2034_v48, %v2033_v45  ;;  %v2021_v61 = vadd.f32 1.0, %v5798_v55 }
 0x590   : > { %v5802_v62 = vpop.eup %5801  ;;  %v2056_v29 = vpack.c.bf16 %v2032_v57, %v2031_v56  ;;  %v2019_v1 = vadd.f32 1.0, %v5800_v59 }
 0x591   : > { %v5804_v2 = vpop.eup %5803  ;;  %v2022_v51 = vadd.f32 1.0, %v5802_v62  ;;  %v2029_v52 = vmul.f32 0.5, %v2021_v61 }
 0x592   : > { %5149 = vmatprep.mubr.bf16.mxu1 %v2056_v29  ;;  %v2020_v6 = vadd.f32 1.0, %v5804_v2  ;;  %v2027_v3 = vmul.f32 0.5, %v2019_v1 }
 0x593   : > { %5150 = vmatmul.mubr.bf16.vlgmr.msra.gmra.mrb[8].mxu1 %v2057_v28  ;;  %v2030_v12 = vmul.f32 0.5, %v2022_v51  ;;  %v2037_v46 = vmul.f32 %v2029_v52, %v7277_v63 }
 0x594   : > { %v2028_v50 = vmul.f32 0.5, %v2020_v6  ;;  %v2035_v5 = vmul.f32 %v2027_v3, %v7280_v4  ;;  %5182 = vmatpush3.bf16.msra.mxu1 %v5641_v36 }
 0x595   : > { %v2038_v34 = vmul.f32 %v2030_v12, %v7285_v7  ;;  %5183 = vmatprep.subr.bf16.mxu1 %v5642_v40 }
 0x596   : > { %v2036_v8 = vmul.f32 %v2028_v50, %v7290_v17 }
 0x597   : > { %v2059_v11 = vpack.c.bf16 %v2038_v34, %v2037_v46 }
 0x598   : > { %v2058_v13 = vpack.c.bf16 %v2036_v8, %v2035_v5  ;;  %5184 = vmatpush3.bf16.msra.mxu1 %v5642_v40 }
 0x599   : > { %5185 = vmatprep.subr.bf16.mxu1 %v5643_v41 }
 0x59a   : > { %5153 = vmatprep.mubr.bf16.mxu1 %v2058_v13 }
 0x59b   : > { %5154 = vmatmul.mubr.bf16.gmra.mrb[12].mxu1 %v2059_v11 }
 0x59c   : > { %5186 = vmatpush3.bf16.msra.mxu1 %v5643_v41 }
 0x59d   : > { %5187 = vmatprep.subr.bf16.mxu1 %v5644_v42 }
 0x5a0   : > { %5188 = vmatpush3.bf16.msra.mxu1 %v5644_v42 }
 0x5a1   : > { %5189 = vmatprep.subr.bf16.mxu1 %v5645_v43 }
 0x5a4   : > { %5190 = vmatpush3.bf16.msra.mxu1 %v5645_v43 }
 0x5a5   : > { %5191 = vmatprep.subr.bf16.mxu1 %v5646_v10 }
 0x5a8   : > { %5192 = vmatpush3.bf16.msra.mxu1 %v5646_v10 }
 0x5a9   : > { %5193 = vmatprep.subr.bf16.mxu1 %v5647_v15 }
 0x5ac   : > { %5194 = vmatpush3.bf16.msra.mxu1 %v5647_v15 }
 0x5ad   : > { %5195 = vmatprep.subr.bf16.mxu1 %v5648_v44 }
 0x5b0   : > { %5196 = vmatpush3.bf16.msra.mxu1 %v5648_v44 }
 0x666   : > { %v5151_v22 = vpop.f32.mrb[8].mxu1 }
 0x667   : > { %v2148_v38 = vpop.f32.mrb[9].mxu1  ;;  %v2157_v23 = vadd.f32 %v5151_v22, %v4755_v58 }
 0x668   : > { %v5152_v63 = vpop.f32.mrb[10].mxu1  ;;  %v2149_v4 = vadd.f32 %v4755_v58, %v2148_v38 }
 0x669   : > { %v2160_v7 = vadd.f32 %v5152_v63, %v4755_v58  ;;  %v2151_v60 = vpop.f32.mrb[11].mxu1 }
 0x66a   : > { %v2152_v39 = vadd.f32 %v4755_v58, %v2151_v60 }
 0x66b   : > { %v7313_v17 = vpack.c.bf16 %v2160_v7, %v2157_v23 }
 0x66c   : > { %v7315_v25 = vpack.c.bf16 %v2152_v39, %v2149_v4 }
 0x66e   : > { %v5155_v26 = vpop.f32.mrb[12].mxu1  ;;  %5173 = vmatprep.mubr.bf16.mxu0 %v7315_v25 }
 0x66f   : > { %v2164_v27 = vpop.f32.mrb[13].mxu1  ;;  %5174 = vmatmul.mubr.bf16.vlgmr.msra.gmra.mrb[16].mxu0 %v7313_v17  ;;  %v2173_v32 = vadd.f32 %v5155_v26, %v4755_v58 }
 0x670   : > { %v5156_v30 = vpop.f32.mrb[14].mxu1  ;;  %v2165_v24 = vadd.f32 %v4755_v58, %v2164_v27 }
 0x671   : > { %v2176_v33 = vadd.f32 %v5156_v30, %v4755_v58  ;;  %v2167_v9 = vpop.f32.mrb[15].mxu1 }
 0x672   : > { %v2168_v16 = vadd.f32 %v4755_v58, %v2167_v9 }
 0x673   : > { %v7319_v31 = vpack.c.bf16 %v2176_v33, %v2173_v32 }
 0x674   : > { %v7321_v35 = vpack.c.bf16 %v2168_v16, %v2165_v24 }
 0x676   : > { %5177 = vmatprep.mubr.bf16.mxu0 %v7321_v35 }
 0x677   : > { %5178 = vmatmul.mubr.bf16.gmra.mrb[20].mxu0 %v7319_v31 }
 0x742   : > { %v5175_v47 = vpop.f32.mrb[16].mxu0 }
 0x743   : > { %v7325_v49 = vadd.f32 %v5175_v47, %v4764_v19  ;;  %v2296_v53 = vpop.f32.mrb[17].mxu0 }
 0x744   : > { %v7327_v54 = vadd.f32 %v4764_v19, %v2296_v53  ;;  %v5176_v37 = vpop.f32.mrb[18].mxu0 }
 0x745   : > { %v2329_v45 = vmul.f32 %v7325_v49, %v7325_v49  ;;  %v7331_v48 = vadd.f32 %v5176_v37, %v4764_v19  ;;  %v2299_v55 = vpop.f32.mrb[19].mxu0 }
 0x746   : > { %v2327_v56 = vmul.f32 %v7327_v54, %v7327_v54  ;;  %v7335_v57 = vadd.f32 %v4764_v19, %v2299_v55 }
 0x747   : > { %v2337_v59 = vmul.f32 %v2329_v45, %v7325_v49  ;;  %v2330_v28 = vmul.f32 %v7331_v48, %v7331_v48 }
 0x748   : > { %v2335_v61 = vmul.f32 %v2327_v56, %v7327_v54  ;;  %v2328_v62 = vmul.f32 %v7335_v57, %v7335_v57 }
 0x749   : > { %v2345_v29 = vmul.f32 0.044715, %v2337_v59  ;;  %v2338_v1 = vmul.f32 %v2330_v28, %v7331_v48 }
 0x74a   : > { %v2343_v2 = vmul.f32 0.044715, %v2335_v61  ;;  %v2336_v51 = vmul.f32 %v2328_v62, %v7335_v57  ;;  %v5179_v52 = vpop.f32.mrb[20].mxu0 }
 0x74b   : > { %v2353_v6 = vadd.f32 %v2345_v29, %v7325_v49  ;;  %v2346_v3 = vmul.f32 0.044715, %v2338_v1  ;;  %v7346_v12 = vadd.f32 %v5179_v52, %v4764_v19  ;;  %v2312_v50 = vpop.f32.mrb[21].mxu0 }
 0x74c   : > { %v2351_v46 = vadd.f32 %v2343_v2, %v7327_v54  ;;  %v2344_v34 = vmul.f32 0.044715, %v2336_v51  ;;  %v7349_v5 = vadd.f32 %v4764_v19, %v2312_v50  ;;  %v5180_v8 = vpop.f32.mrb[22].mxu0 }
 0x74d   : > { %v2361_v11 = vmul.f32 0.7978846, %v2353_v6  ;;  %v2354_v13 = vadd.f32 %v2346_v3, %v7331_v48  ;;  %v2333_v14 = vmul.f32 %v7346_v12, %v7346_v12  ;;  %v7354_v20 = vadd.f32 %v5180_v8, %v4764_v19  ;;  %v2315_v22 = vpop.f32.mrb[23].mxu0 }
 0x74e   : > { %v2359_v58 = vmul.f32 0.7978846, %v2351_v46  ;;  %v2352_v38 = vadd.f32 %v2344_v34, %v7335_v57  ;;  %v2331_v63 = vmul.f32 %v7349_v5, %v7349_v5  ;;  %v7359_v23 = vadd.f32 %v4764_v19, %v2315_v22 }
 0x74f   : > { %5805 = vtanh.f32 %v2361_v11  ;;  %v2362_v7 = vmul.f32 0.7978846, %v2354_v13  ;;  %v2341_v60 = vmul.f32 %v2333_v14, %v7346_v12  ;;  %v2334_v4 = vmul.f32 %v7354_v20, %v7354_v20 }
 0x750   : > { %5807 = vtanh.f32 %v2359_v58  ;;  %v2360_v39 = vmul.f32 0.7978846, %v2352_v38  ;;  %v2339_v26 = vmul.f32 %v2331_v63, %v7349_v5  ;;  %v2332_v27 = vmul.f32 %v7359_v23, %v7359_v23 }
 0x751   : > { %5809 = vtanh.f32 %v2362_v7  ;;  %v2349_v30 = vmul.f32 0.044715, %v2341_v60  ;;  %v2342_v32 = vmul.f32 %v2334_v4, %v7354_v20 }
 0x752   : > { %5811 = vtanh.f32 %v2360_v39  ;;  %v2347_v33 = vmul.f32 0.044715, %v2339_v26  ;;  %v2340_v9 = vmul.f32 %v2332_v27, %v7359_v23  ;;  %v5649_v39 = vld [vmem:[#allocation16] sm:$0xff]   ;;  %v5650_v26 = vld [vmem:[#allocation16 + $0x8] sm:$0xff]   ;;  %v5651_v27 = vld [vmem:[#allocation16 + $0x10] sm:$0xff]  }
 0x753   : > { %v2357_v24 = vadd.f32 %v2349_v30, %v7346_v12  ;;  %v2350_v16 = vmul.f32 0.044715, %v2342_v32  ;;  %5205 = vmatprep.subr.bf16.mxu0 %v5649_v39  ;;  %v5656_v30 = vld [vmem:[#allocation16 + $0x38] sm:$0xff]  }
 0x754   : > { %v2355_v36 = vadd.f32 %v2347_v33, %v7349_v5  ;;  %v2348_v40 = vmul.f32 0.044715, %v2340_v9  ;;  %5206 = vmatpush3.bf16.msra.mxu0 %v5649_v39  ;;  %v4773_v32 = vld [vmem:[#allocation15] ss:$0 sm:$0xff] }
 0x755   : > { %v2365_v41 = vmul.f32 0.7978846, %v2357_v24  ;;  %v2358_v42 = vadd.f32 %v2350_v16, %v7354_v20  ;;  %5207 = vmatprep.subr.bf16.mxu0 %v5650_v26 }
 0x756   : > { %v2363_v43 = vmul.f32 0.7978846, %v2355_v36  ;;  %v2356_v10 = vadd.f32 %v2348_v40, %v7359_v23 }
 0x757   : > { %5813 = vtanh.f32 %v2365_v41  ;;  %v2366_v15 = vmul.f32 0.7978846, %v2358_v42 }
 0x758   : > { %5815 = vtanh.f32 %v2363_v43  ;;  %v2364_v44 = vmul.f32 0.7978846, %v2356_v10  ;;  %5208 = vmatpush3.bf16.msra.mxu0 %v5650_v26 }
 0x759   : > { %v5806_v19 = vpop.eup %5805  ;;  %5817 = vtanh.f32 %v2366_v15  ;;  %5209 = vmatprep.subr.bf16.mxu0 %v5651_v27 }
 0x75a   : > { %v5808_v47 = vpop.eup %5807  ;;  %v2377_v53 = vadd.f32 1.0, %v5806_v19  ;;  %5819 = vtanh.f32 %v2364_v44 }
 0x75b   : > { %v5810_v37 = vpop.eup %5809  ;;  %v2375_v45 = vadd.f32 1.0, %v5808_v47 }
 0x75c   : > { %v5812_v55 = vpop.eup %5811  ;;  %v2385_v56 = vmul.f32 0.5, %v2377_v53  ;;  %v2378_v59 = vadd.f32 1.0, %v5810_v37  ;;  %5210 = vmatpush3.bf16.msra.mxu0 %v5651_v27 }
 0x75d   : > { %v2376_v28 = vadd.f32 1.0, %v5812_v55  ;;  %v2383_v61 = vmul.f32 0.5, %v2375_v45 }
 0x75e   : > { %v2386_v62 = vmul.f32 0.5, %v2378_v59  ;;  %v2393_v1 = vmul.f32 %v2385_v56, %v7325_v49 }
 0x75f   : > { %v2384_v29 = vmul.f32 0.5, %v2376_v28  ;;  %v2391_v52 = vmul.f32 %v2383_v61, %v7327_v54 }
 0x760   : > { %v2394_v2 = vmul.f32 %v2386_v62, %v7331_v48 }
 0x761   : > { %v5814_v51 = vpop.eup %5813  ;;  %v2392_v6 = vmul.f32 %v2384_v29, %v7335_v57 }
 0x762   : > { %v5816_v3 = vpop.eup %5815  ;;  %v2417_v50 = vpack.c.bf16 %v2394_v2, %v2393_v1  ;;  %v2381_v46 = vadd.f32 1.0, %v5814_v51 }
 0x763   : > { %v5818_v34 = vpop.eup %5817  ;;  %v2416_v8 = vpack.c.bf16 %v2392_v6, %v2391_v52  ;;  %v2379_v11 = vadd.f32 1.0, %v5816_v3 }
 0x764   : > { %v5820_v13 = vpop.eup %5819  ;;  %v2382_v14 = vadd.f32 1.0, %v5818_v34  ;;  %v2389_v22 = vmul.f32 0.5, %v2381_v46 }
 0x765   : > { %5197 = vmatprep.mubr.bf16.mxu1 %v2416_v8  ;;  %v2380_v58 = vadd.f32 1.0, %v5820_v13  ;;  %v2387_v38 = vmul.f32 0.5, %v2379_v11 }
 0x766   : > { %5198 = vmatmul.mubr.bf16.vlgmr.msra.gmra.mrb[16].mxu1 %v2417_v50  ;;  %v2390_v49 = vmul.f32 0.5, %v2382_v14  ;;  %v2397_v63 = vmul.f32 %v2389_v22, %v7346_v12  ;;  %v5652_v12 = vld [vmem:[#allocation16 + $0x18] sm:$0xff]  }
 0x767   : > { %v2388_v48 = vmul.f32 0.5, %v2380_v58  ;;  %v2395_v57 = vmul.f32 %v2387_v38, %v7349_v5  ;;  %5211 = vmatprep.subr.bf16.mxu0 %v5652_v12  ;;  %v5654_v5 = vld [vmem:[#allocation16 + $0x28] sm:$0xff]  }
 0x768   : > { %v2398_v54 = vmul.f32 %v2390_v49, %v7354_v20  ;;  %5212 = vmatpush3.bf16.msra.mxu0 %v5652_v12  ;;  %v5653_v20 = vld [vmem:[#allocation16 + $0x20] sm:$0xff]  }
 0x769   : > { %v2396_v7 = vmul.f32 %v2388_v48, %v7359_v23  ;;  %5213 = vmatprep.subr.bf16.mxu0 %v5653_v20  ;;  %v5655_v23 = vld [vmem:[#allocation16 + $0x30] sm:$0xff]  }
 0x76a   : > { %v2419_v60 = vpack.c.bf16 %v2398_v54, %v2397_v63 }
 0x76b   : > { %v2418_v4 = vpack.c.bf16 %v2396_v7, %v2395_v57 }
 0x76c   : > { %5214 = vmatpush3.bf16.msra.mxu0 %v5653_v20 }
 0x76d   : > { %5201 = vmatprep.mubr.bf16.mxu1 %v2418_v4  ;;  %5215 = vmatprep.subr.bf16.mxu0 %v5654_v5 }
 0x76e   : > { %5202 = vmatmul.mubr.bf16.gmra.mrb[20].mxu1 %v2419_v60 }
 0x770   : > { %5216 = vmatpush3.bf16.msra.mxu0 %v5654_v5 }
 0x771   : > { %5217 = vmatprep.subr.bf16.mxu0 %v5655_v23 }
 0x774   : > { %5218 = vmatpush3.bf16.msra.mxu0 %v5655_v23 }
 0x775   : > { %5219 = vmatprep.subr.bf16.mxu0 %v5656_v30 }
 0x778   : > { %5220 = vmatpush3.bf16.msra.mxu0 %v5656_v30 }
 0x839   : > { %v5199_v33 = vpop.f32.mrb[16].mxu1 }
 0x83a   : > { %v7381_v9 = vadd.f32 %v5199_v33, %v4773_v32  ;;  %v2508_v24 = vpop.f32.mrb[17].mxu1 }
 0x83b   : > { %v7383_v16 = vadd.f32 %v4773_v32, %v2508_v24  ;;  %v5200_v36 = vpop.f32.mrb[18].mxu1 }
 0x83c   : > { %v2541_v40 = vmul.f32 %v7381_v9, %v7381_v9  ;;  %v7387_v41 = vadd.f32 %v5200_v36, %v4773_v32  ;;  %v2511_v42 = vpop.f32.mrb[19].mxu1 }
 0x83d   : > { %v2539_v43 = vmul.f32 %v7383_v16, %v7383_v16  ;;  %v7391_v10 = vadd.f32 %v4773_v32, %v2511_v42 }
 0x83e   : > { %v2549_v15 = vmul.f32 %v2541_v40, %v7381_v9  ;;  %v2542_v44 = vmul.f32 %v7387_v41, %v7387_v41 }
 0x83f   : > { %v2547_v19 = vmul.f32 %v2539_v43, %v7383_v16  ;;  %v2540_v47 = vmul.f32 %v7391_v10, %v7391_v10 }
 0x840   : > { %v2557_v53 = vmul.f32 0.044715, %v2549_v15  ;;  %v2550_v37 = vmul.f32 %v2542_v44, %v7387_v41 }
 0x841   : > { %v2555_v45 = vmul.f32 0.044715, %v2547_v19  ;;  %v2548_v55 = vmul.f32 %v2540_v47, %v7391_v10  ;;  %v5203_v56 = vpop.f32.mrb[20].mxu1 }
 0x842   : > { %v2565_v59 = vadd.f32 %v2557_v53, %v7381_v9  ;;  %v2558_v28 = vmul.f32 0.044715, %v2550_v37  ;;  %v7402_v61 = vadd.f32 %v5203_v56, %v4773_v32  ;;  %v2524_v62 = vpop.f32.mrb[21].mxu1 }
 0x843   : > { %v2563_v29 = vadd.f32 %v2555_v45, %v7383_v16  ;;  %v2556_v1 = vmul.f32 0.044715, %v2548_v55  ;;  %v7405_v2 = vadd.f32 %v4773_v32, %v2524_v62  ;;  %v5204_v51 = vpop.f32.mrb[22].mxu1 }
 0x844   : > { %v2573_v52 = vmul.f32 0.7978846, %v2565_v59  ;;  %v2566_v6 = vadd.f32 %v2558_v28, %v7387_v41  ;;  %v2545_v3 = vmul.f32 %v7402_v61, %v7402_v61  ;;  %v7410_v50 = vadd.f32 %v5204_v51, %v4773_v32  ;;  %v2527_v46 = vpop.f32.mrb[23].mxu1 }
 0x845   : > { %v2571_v34 = vmul.f32 0.7978846, %v2563_v29  ;;  %v2564_v8 = vadd.f32 %v2556_v1, %v7391_v10  ;;  %v2543_v11 = vmul.f32 %v7405_v2, %v7405_v2  ;;  %v7415_v13 = vadd.f32 %v4773_v32, %v2527_v46 }
 0x846   : > { %5821 = vtanh.f32 %v2573_v52  ;;  %v2574_v14 = vmul.f32 0.7978846, %v2566_v6  ;;  %v2553_v22 = vmul.f32 %v2545_v3, %v7402_v61  ;;  %v2546_v58 = vmul.f32 %v7410_v50, %v7410_v50 }
 0x847   : > { %5823 = vtanh.f32 %v2571_v34  ;;  %v2572_v38 = vmul.f32 0.7978846, %v2564_v8  ;;  %v2551_v49 = vmul.f32 %v2543_v11, %v7405_v2  ;;  %v2544_v48 = vmul.f32 %v7415_v13, %v7415_v13 }
 0x848   : > { %5825 = vtanh.f32 %v2574_v14  ;;  %v2561_v63 = vmul.f32 0.044715, %v2553_v22  ;;  %v2554_v54 = vmul.f32 %v2546_v58, %v7410_v50 }
 0x849   : > { %5827 = vtanh.f32 %v2572_v38  ;;  %v2559_v57 = vmul.f32 0.044715, %v2551_v49  ;;  %v2552_v7 = vmul.f32 %v2544_v48, %v7415_v13  ;;  %v5657_v38 = vld [vmem:[#allocation19] sm:$0xff]   ;;  %v5658_v49 = vld [vmem:[#allocation19 + $0x8] sm:$0xff]   ;;  %v5659_v48 = vld [vmem:[#allocation19 + $0x10] sm:$0xff]  }
 0x84a   : > { %v2569_v60 = vadd.f32 %v2561_v63, %v7402_v61  ;;  %v2562_v4 = vmul.f32 0.044715, %v2554_v54  ;;  %5229 = vmatprep.subr.bf16.mxu1 %v5657_v38  ;;  %v5664_v63 = vld [vmem:[#allocation19 + $0x38] sm:$0xff]  }
 0x84b   : > { %v2567_v39 = vadd.f32 %v2559_v57, %v7405_v2  ;;  %v2560_v26 = vmul.f32 0.044715, %v2552_v7  ;;  %5230 = vmatpush3.bf16.msra.mxu1 %v5657_v38  ;;  %v4782_v54 = vld [vmem:[#allocation18] ss:$0 sm:$0xff] }
 0x84c   : > { %v2577_v27 = vmul.f32 0.7978846, %v2569_v60  ;;  %v2570_v12 = vadd.f32 %v2562_v4, %v7410_v50  ;;  %5231 = vmatprep.subr.bf16.mxu1 %v5658_v49 }
 0x84d   : > { %v2575_v20 = vmul.f32 0.7978846, %v2567_v39  ;;  %v2568_v5 = vadd.f32 %v2560_v26, %v7415_v13 }
 0x84e   : > { %5829 = vtanh.f32 %v2577_v27  ;;  %v2578_v23 = vmul.f32 0.7978846, %v2570_v12 }
 0x84f   : > { %5831 = vtanh.f32 %v2575_v20  ;;  %v2576_v30 = vmul.f32 0.7978846, %v2568_v5  ;;  %5232 = vmatpush3.bf16.msra.mxu1 %v5658_v49 }
 0x850   : > { %v5822_v32 = vpop.eup %5821  ;;  %5833 = vtanh.f32 %v2578_v23  ;;  %5233 = vmatprep.subr.bf16.mxu1 %v5659_v48 }
 0x851   : > { %v5824_v33 = vpop.eup %5823  ;;  %v2589_v24 = vadd.f32 1.0, %v5822_v32  ;;  %5835 = vtanh.f32 %v2576_v30 }
 0x852   : > { %v5826_v36 = vpop.eup %5825  ;;  %v2587_v40 = vadd.f32 1.0, %v5824_v33 }
 0x853   : > { %v5828_v42 = vpop.eup %5827  ;;  %v2597_v43 = vmul.f32 0.5, %v2589_v24  ;;  %v2590_v15 = vadd.f32 1.0, %v5826_v36  ;;  %5234 = vmatpush3.bf16.msra.mxu1 %v5659_v48 }
 0x854   : > { %v2588_v44 = vadd.f32 1.0, %v5828_v42  ;;  %v2595_v19 = vmul.f32 0.5, %v2587_v40 }
 0x855   : > { %v2598_v47 = vmul.f32 0.5, %v2590_v15  ;;  %v2605_v37 = vmul.f32 %v2597_v43, %v7381_v9 }
 0x856   : > { %v2596_v53 = vmul.f32 0.5, %v2588_v44  ;;  %v2603_v56 = vmul.f32 %v2595_v19, %v7383_v16 }
 0x857   : > { %v2606_v45 = vmul.f32 %v2598_v47, %v7387_v41 }
 0x858   : > { %v5830_v55 = vpop.eup %5829  ;;  %v2604_v59 = vmul.f32 %v2596_v53, %v7391_v10 }
 0x859   : > { %v5832_v28 = vpop.eup %5831  ;;  %v2629_v62 = vpack.c.bf16 %v2606_v45, %v2605_v37  ;;  %v2593_v29 = vadd.f32 1.0, %v5830_v55 }
 0x85a   : > { %v5834_v1 = vpop.eup %5833  ;;  %v2628_v51 = vpack.c.bf16 %v2604_v59, %v2603_v56  ;;  %v2591_v52 = vadd.f32 1.0, %v5832_v28 }
 0x85b   : > { %v5836_v6 = vpop.eup %5835  ;;  %v2594_v3 = vadd.f32 1.0, %v5834_v1  ;;  %v2601_v46 = vmul.f32 0.5, %v2593_v29 }
 0x85c   : > { %5221 = vmatprep.mubr.bf16.mxu0 %v2628_v51  ;;  %v2592_v34 = vadd.f32 1.0, %v5836_v6  ;;  %v2599_v8 = vmul.f32 0.5, %v2591_v52 }
 0x85d   : > { %5222 = vmatmul.mubr.bf16.vlgmr.msra.gmra.mrb[24].mxu0 %v2629_v62  ;;  %v2602_v9 = vmul.f32 0.5, %v2594_v3  ;;  %v2609_v11 = vmul.f32 %v2601_v46, %v7402_v61  ;;  %v5660_v61 = vld [vmem:[#allocation19 + $0x18] sm:$0xff]  }
 0x85e   : > { %v2600_v41 = vmul.f32 0.5, %v2592_v34  ;;  %v2607_v10 = vmul.f32 %v2599_v8, %v7405_v2  ;;  %5235 = vmatprep.subr.bf16.mxu1 %v5660_v61  ;;  %v5662_v2 = vld [vmem:[#allocation19 + $0x28] sm:$0xff]  }
 0x85f   : > { %v2610_v16 = vmul.f32 %v2602_v9, %v7410_v50  ;;  %5236 = vmatpush3.bf16.msra.mxu1 %v5660_v61  ;;  %v5661_v50 = vld [vmem:[#allocation19 + $0x20] sm:$0xff]  }
 0x860   : > { %v2608_v14 = vmul.f32 %v2600_v41, %v7415_v13  ;;  %5237 = vmatprep.subr.bf16.mxu1 %v5661_v50  ;;  %v5663_v13 = vld [vmem:[#allocation19 + $0x30] sm:$0xff]  }
 0x861   : > { %v2631_v22 = vpack.c.bf16 %v2610_v16, %v2609_v11 }
 0x862   : > { %v2630_v58 = vpack.c.bf16 %v2608_v14, %v2607_v10 }
 0x863   : > { %5238 = vmatpush3.bf16.msra.mxu1 %v5661_v50 }
 0x864   : > { %5225 = vmatprep.mubr.bf16.mxu0 %v2630_v58  ;;  %5239 = vmatprep.subr.bf16.mxu1 %v5662_v2 }
 0x865   : > { %5226 = vmatmul.mubr.bf16.gmra.mrb[28].mxu0 %v2631_v22 }
 0x867   : > { %5240 = vmatpush3.bf16.msra.mxu1 %v5662_v2 }
 0x868   : > { %5241 = vmatprep.subr.bf16.mxu1 %v5663_v13 }
 0x86b   : > { %5242 = vmatpush3.bf16.msra.mxu1 %v5663_v13 }
 0x86c   : > { %5243 = vmatprep.subr.bf16.mxu1 %v5664_v63 }
 0x86f   : > { %5244 = vmatpush3.bf16.msra.mxu1 %v5664_v63 }
 0x930   : > { %v5223_v57 = vpop.f32.mrb[24].mxu0 }
 0x931   : > { %v7437_v7 = vadd.f32 %v5223_v57, %v4782_v54  ;;  %v2720_v60 = vpop.f32.mrb[25].mxu0 }
 0x932   : > { %v7439_v4 = vadd.f32 %v4782_v54, %v2720_v60  ;;  %v5224_v39 = vpop.f32.mrb[26].mxu0 }
 0x933   : > { %v2753_v26 = vmul.f32 %v7437_v7, %v7437_v7  ;;  %v7443_v27 = vadd.f32 %v5224_v39, %v4782_v54  ;;  %v2723_v12 = vpop.f32.mrb[27].mxu0 }
 0x934   : > { %v2751_v20 = vmul.f32 %v7439_v4, %v7439_v4  ;;  %v7447_v5 = vadd.f32 %v4782_v54, %v2723_v12 }
 0x935   : > { %v2761_v23 = vmul.f32 %v2753_v26, %v7437_v7  ;;  %v2754_v30 = vmul.f32 %v7443_v27, %v7443_v27 }
 0x936   : > { %v2759_v32 = vmul.f32 %v2751_v20, %v7439_v4  ;;  %v2752_v33 = vmul.f32 %v7447_v5, %v7447_v5 }
 0x937   : > { %v2769_v24 = vmul.f32 0.044715, %v2761_v23  ;;  %v2762_v36 = vmul.f32 %v2754_v30, %v7443_v27 }
 0x938   : > { %v2767_v40 = vmul.f32 0.044715, %v2759_v32  ;;  %v2760_v42 = vmul.f32 %v2752_v33, %v7447_v5  ;;  %v5227_v43 = vpop.f32.mrb[28].mxu0 }
 0x939   : > { %v2777_v15 = vadd.f32 %v2769_v24, %v7437_v7  ;;  %v2770_v44 = vmul.f32 0.044715, %v2762_v36  ;;  %v7458_v19 = vadd.f32 %v5227_v43, %v4782_v54  ;;  %v2736_v47 = vpop.f32.mrb[29].mxu0 }
 0x93a   : > { %v2775_v53 = vadd.f32 %v2767_v40, %v7439_v4  ;;  %v2768_v37 = vmul.f32 0.044715, %v2760_v42  ;;  %v7461_v45 = vadd.f32 %v4782_v54, %v2736_v47  ;;  %v5228_v55 = vpop.f32.mrb[30].mxu0 }
 0x93b   : > { %v2785_v56 = vmul.f32 0.7978846, %v2777_v15  ;;  %v2778_v59 = vadd.f32 %v2770_v44, %v7443_v27  ;;  %v2757_v28 = vmul.f32 %v7458_v19, %v7458_v19  ;;  %v7466_v62 = vadd.f32 %v5228_v55, %v4782_v54  ;;  %v2739_v29 = vpop.f32.mrb[31].mxu0 }
 0x93c   : > { %v2783_v1 = vmul.f32 0.7978846, %v2775_v53  ;;  %v2776_v51 = vadd.f32 %v2768_v37, %v7447_v5  ;;  %v2755_v52 = vmul.f32 %v7461_v45, %v7461_v45  ;;  %v7471_v6 = vadd.f32 %v4782_v54, %v2739_v29 }
 0x93d   : > { %5837 = vtanh.f32 %v2785_v56  ;;  %v2786_v3 = vmul.f32 0.7978846, %v2778_v59  ;;  %v2765_v46 = vmul.f32 %v2757_v28, %v7458_v19  ;;  %v2758_v34 = vmul.f32 %v7466_v62, %v7466_v62 }
 0x93e   : > { %5839 = vtanh.f32 %v2783_v1  ;;  %v2784_v8 = vmul.f32 0.7978846, %v2776_v51  ;;  %v2763_v9 = vmul.f32 %v2755_v52, %v7461_v45  ;;  %v2756_v41 = vmul.f32 %v7471_v6, %v7471_v6 }
 0x93f   : > { %5841 = vtanh.f32 %v2786_v3  ;;  %v2773_v11 = vmul.f32 0.044715, %v2765_v46  ;;  %v2766_v16 = vmul.f32 %v2758_v34, %v7466_v62 }
 0x940   : > { %5843 = vtanh.f32 %v2784_v8  ;;  %v2771_v10 = vmul.f32 0.044715, %v2763_v9  ;;  %v2764_v14 = vmul.f32 %v2756_v41, %v7471_v6  ;;  %v5665_v8 = vld [vmem:[#allocation22] sm:$0xff]   ;;  %v5666_v9 = vld [vmem:[#allocation22 + $0x8] sm:$0xff]   ;;  %v5667_v41 = vld [vmem:[#allocation22 + $0x10] sm:$0xff]  }
 0x941   : > { %v2781_v22 = vadd.f32 %v2773_v11, %v7458_v19  ;;  %v2774_v58 = vmul.f32 0.044715, %v2766_v16  ;;  %5253 = vmatprep.subr.bf16.mxu0 %v5665_v8  ;;  %v5672_v11 = vld [vmem:[#allocation22 + $0x38] sm:$0xff]  }
 0x942   : > { %v2779_v38 = vadd.f32 %v2771_v10, %v7461_v45  ;;  %v2772_v49 = vmul.f32 0.044715, %v2764_v14  ;;  %5254 = vmatpush3.bf16.msra.mxu0 %v5665_v8  ;;  %v5673_v16 = vld [vmem:[%s7933_s14 + $0x40] sm:$0xff]   ;;  %v5675_v14 = vld [vmem:[%s7933_s14 + $0x48] sm:$0xff]  }
 0x943   : > { %v2789_v48 = vmul.f32 0.7978846, %v2781_v22  ;;  %v2782_v61 = vadd.f32 %v2774_v58, %v7466_v62  ;;  %5255 = vmatprep.subr.bf16.mxu0 %v5666_v9  ;;  %v5674_v10 = vld [vmem:[%s7933_s14] sm:$0xff]   ;;  %4985 = vmatprep.subr.bf16.mxu1 %v5673_v16  ;;  %v5676_v22 = vld [vmem:[%s7933_s14 + $0x8] sm:$0xff]   ;;  %v5677_v58 = vld [vmem:[%s7933_s14 + $0x50] sm:$0xff]  }
 0x944   : > { %v2787_v50 = vmul.f32 0.7978846, %v2779_v38  ;;  %v2780_v2 = vadd.f32 %v2772_v49, %v7471_v6  ;;  %v5678_v38 = vld [vmem:[%s7933_s14 + $0x10] sm:$0xff]   ;;  %v5679_v49 = vld [vmem:[%s7933_s14 + $0x58] sm:$0xff]  }
 0x945   : > { %5845 = vtanh.f32 %v2789_v48  ;;  %v2790_v13 = vmul.f32 0.7978846, %v2782_v61  ;;  %v5680_v48 = vld [vmem:[%s7933_s14 + $0x18] sm:$0xff]   ;;  %v5681_v61 = vld [vmem:[%s7933_s14 + $0x60] sm:$0xff]  }
 0x946   : > { %5847 = vtanh.f32 %v2787_v50  ;;  %v2788_v63 = vmul.f32 0.7978846, %v2780_v2  ;;  %5256 = vmatpush3.bf16.msra.mxu0 %v5666_v9  ;;  %v5682_v50 = vld [vmem:[%s7933_s14 + $0x20] sm:$0xff]   ;;  %v5683_v2 = vld [vmem:[%s7933_s14 + $0x68] sm:$0xff]  }
 0x947   : > { %v5838_v54 = vpop.eup %5837  ;;  %5849 = vtanh.f32 %v2790_v13  ;;  %5257 = vmatprep.subr.bf16.mxu0 %v5667_v41  ;;  %v5684_v13 = vld [vmem:[%s7933_s14 + $0x28] sm:$0xff]  }
 0x948   : > { %v5840_v57 = vpop.eup %5839  ;;  %v2801_v60 = vadd.f32 1.0, %v5838_v54  ;;  %5851 = vtanh.f32 %v2788_v63  ;;  %v4791_v63 = vld [vmem:[#allocation21] ss:$0 sm:$0xff] }
 0x949   : > { %v5842_v39 = vpop.eup %5841  ;;  %v2799_v26 = vadd.f32 1.0, %v5840_v57 }
 0x94a   : > { %v5844_v12 = vpop.eup %5843  ;;  %v2809_v20 = vmul.f32 0.5, %v2801_v60  ;;  %v2802_v23 = vadd.f32 1.0, %v5842_v39  ;;  %5258 = vmatpush3.bf16.msra.mxu0 %v5667_v41 }
 0x94b   : > { %v2800_v30 = vadd.f32 1.0, %v5844_v12  ;;  %v2807_v32 = vmul.f32 0.5, %v2799_v26 }
 0x94c   : > { %v2810_v33 = vmul.f32 0.5, %v2802_v23  ;;  %v2817_v36 = vmul.f32 %v2809_v20, %v7437_v7 }
 0x94d   : > { %v2808_v24 = vmul.f32 0.5, %v2800_v30  ;;  %v2815_v43 = vmul.f32 %v2807_v32, %v7439_v4 }
 0x94e   : > { %v2818_v40 = vmul.f32 %v2810_v33, %v7443_v27 }
 0x94f   : > { %v5846_v42 = vpop.eup %5845  ;;  %v2816_v15 = vmul.f32 %v2808_v24, %v7447_v5 }
 0x950   : > { %v5848_v44 = vpop.eup %5847  ;;  %v2841_v47 = vpack.c.bf16 %v2818_v40, %v2817_v36  ;;  %v2805_v53 = vadd.f32 1.0, %v5846_v42 }
 0x951   : > { %v5850_v37 = vpop.eup %5849  ;;  %v2840_v55 = vpack.c.bf16 %v2816_v15, %v2815_v43  ;;  %v2803_v56 = vadd.f32 1.0, %v5848_v44 }
 0x952   : > { %v5852_v59 = vpop.eup %5851  ;;  %v2806_v28 = vadd.f32 1.0, %v5850_v37  ;;  %v2813_v29 = vmul.f32 0.5, %v2805_v53 }
 0x953   : > { %5245 = vmatprep.mubr.bf16.mxu1 %v2840_v55  ;;  %v2804_v1 = vadd.f32 1.0, %v5852_v59  ;;  %v2811_v51 = vmul.f32 0.5, %v2803_v56 }
 0x954   : > { %5246 = vmatmul.mubr.bf16.vlgmr.msra.gmra.mrb[24].mxu1 %v2841_v47  ;;  %v2814_v7 = vmul.f32 0.5, %v2806_v28  ;;  %v2821_v52 = vmul.f32 %v2813_v29, %v7458_v19  ;;  %v5668_v19 = vld [vmem:[#allocation22 + $0x18] sm:$0xff]  }
 0x955   : > { %v2812_v27 = vmul.f32 0.5, %v2804_v1  ;;  %v2819_v5 = vmul.f32 %v2811_v51, %v7461_v45  ;;  %5259 = vmatprep.subr.bf16.mxu0 %v5668_v19  ;;  %v5669_v45 = vld [vmem:[#allocation22 + $0x20] sm:$0xff]   ;;  %4986 = vmatpush3.bf16.msra.mxu1 %v5674_v10 }
 0x956   : > { %v2822_v4 = vmul.f32 %v2814_v7, %v7466_v62  ;;  %5260 = vmatpush3.bf16.msra.mxu0 %v5668_v19  ;;  %v5670_v62 = vld [vmem:[#allocation22 + $0x28] sm:$0xff]   ;;  %4987 = vmatprep.subr.bf16.mxu1 %v5675_v14 }
 0x957   : > { %v2820_v3 = vmul.f32 %v2812_v27, %v7471_v6  ;;  %5261 = vmatprep.subr.bf16.mxu0 %v5669_v45  ;;  %v5671_v6 = vld [vmem:[#allocation22 + $0x30] sm:$0xff]  }
 0x958   : > { %v2843_v46 = vpack.c.bf16 %v2822_v4, %v2821_v52 }
 0x959   : > { %v2842_v34 = vpack.c.bf16 %v2820_v3, %v2819_v5  ;;  %4988 = vmatpush3.bf16.msra.mxu1 %v5676_v22 }
 0x95a   : > { %5262 = vmatpush3.bf16.msra.mxu0 %v5669_v45  ;;  %4989 = vmatprep.subr.bf16.mxu1 %v5677_v58 }
 0x95b   : > { %5249 = vmatprep.mubr.bf16.mxu1 %v2842_v34  ;;  %5263 = vmatprep.subr.bf16.mxu0 %v5670_v62 }
 0x95c   : > { %5250 = vmatmul.mubr.bf16.gmra.mrb[28].mxu1 %v2843_v46 }
 0x95d   : > { %4990 = vmatpush3.bf16.msra.mxu1 %v5678_v38 }
 0x95e   : > { %5264 = vmatpush3.bf16.msra.mxu0 %v5670_v62  ;;  %4991 = vmatprep.subr.bf16.mxu1 %v5679_v49 }
 0x95f   : > { %5265 = vmatprep.subr.bf16.mxu0 %v5671_v6 }
 0x961   : > { %4992 = vmatpush3.bf16.msra.mxu1 %v5680_v48 }
 0x962   : > { %5266 = vmatpush3.bf16.msra.mxu0 %v5671_v6  ;;  %4993 = vmatprep.subr.bf16.mxu1 %v5681_v61 }
 0x963   : > { %5267 = vmatprep.subr.bf16.mxu0 %v5672_v11 }
 0x965   : > { %4994 = vmatpush3.bf16.msra.mxu1 %v5682_v50 }
 0x966   : > { %5268 = vmatpush3.bf16.msra.mxu0 %v5672_v11  ;;  %4995 = vmatprep.subr.bf16.mxu1 %v5683_v2 }
 0x969   : > { %4996 = vmatpush3.bf16.msra.mxu1 %v5684_v13 }
 0xa27   : > { %v5247_v54 = vpop.f32.mrb[24].mxu1 }
 0xa28   : > { %v7505_v57 = vadd.f32 %v5247_v54, %v4791_v63  ;;  %v2932_v60 = vpop.f32.mrb[25].mxu1 }
 0xa29   : > { %v7507_v39 = vadd.f32 %v4791_v63, %v2932_v60  ;;  %v5248_v26 = vpop.f32.mrb[26].mxu1 }
 0xa2a   : > { %v2965_v12 = vmul.f32 %v7505_v57, %v7505_v57  ;;  %v7511_v20 = vadd.f32 %v5248_v26, %v4791_v63  ;;  %v2935_v23 = vpop.f32.mrb[27].mxu1 }
 0xa2b   : > { %v2963_v30 = vmul.f32 %v7507_v39, %v7507_v39  ;;  %v7515_v32 = vadd.f32 %v4791_v63, %v2935_v23 }
 0xa2c   : > { %v2973_v33 = vmul.f32 %v2965_v12, %v7505_v57  ;;  %v2966_v24 = vmul.f32 %v7511_v20, %v7511_v20 }
 0xa2d   : > { %v2971_v36 = vmul.f32 %v2963_v30, %v7507_v39  ;;  %v2964_v40 = vmul.f32 %v7515_v32, %v7515_v32 }
 0xa2e   : > { %v2981_v42 = vmul.f32 0.044715, %v2973_v33  ;;  %v2974_v43 = vmul.f32 %v2966_v24, %v7511_v20 }
 0xa2f   : > { %v2979_v15 = vmul.f32 0.044715, %v2971_v36  ;;  %v2972_v44 = vmul.f32 %v2964_v40, %v7515_v32  ;;  %v5251_v47 = vpop.f32.mrb[28].mxu1 }
 0xa30   : > { %v2989_v53 = vadd.f32 %v2981_v42, %v7505_v57  ;;  %v2982_v37 = vmul.f32 0.044715, %v2974_v43  ;;  %v7526_v55 = vadd.f32 %v5251_v47, %v4791_v63  ;;  %v2948_v56 = vpop.f32.mrb[29].mxu1 }
 0xa31   : > { %v2987_v59 = vadd.f32 %v2979_v15, %v7507_v39  ;;  %v2980_v28 = vmul.f32 0.044715, %v2972_v44  ;;  %v7529_v29 = vadd.f32 %v4791_v63, %v2948_v56  ;;  %v5252_v1 = vpop.f32.mrb[30].mxu1 }
 0xa32   : > { %v2997_v51 = vmul.f32 0.7978846, %v2989_v53  ;;  %v2990_v7 = vadd.f32 %v2982_v37, %v7511_v20  ;;  %v2969_v27 = vmul.f32 %v7526_v55, %v7526_v55  ;;  %v7534_v52 = vadd.f32 %v5252_v1, %v4791_v63  ;;  %v2951_v4 = vpop.f32.mrb[31].mxu1 }
 0xa33   : > { %v2995_v5 = vmul.f32 0.7978846, %v2987_v59  ;;  %v2988_v3 = vadd.f32 %v2980_v28, %v7515_v32  ;;  %v2967_v46 = vmul.f32 %v7529_v29, %v7529_v29  ;;  %v7539_v34 = vadd.f32 %v4791_v63, %v2951_v4 }
 0xa34   : > { %5853 = vtanh.f32 %v2997_v51  ;;  %v2998_v8 = vmul.f32 0.7978846, %v2990_v7  ;;  %v2977_v9 = vmul.f32 %v2969_v27, %v7526_v55  ;;  %v2970_v41 = vmul.f32 %v7534_v52, %v7534_v52 }
 0xa35   : > { %5855 = vtanh.f32 %v2995_v5  ;;  %v2996_v19 = vmul.f32 0.7978846, %v2988_v3  ;;  %v2975_v45 = vmul.f32 %v2967_v46, %v7529_v29  ;;  %v2968_v62 = vmul.f32 %v7539_v34, %v7539_v34 }
 0xa36   : > { %5857 = vtanh.f32 %v2998_v8  ;;  %v2985_v6 = vmul.f32 0.044715, %v2977_v9  ;;  %v2978_v11 = vmul.f32 %v2970_v41, %v7534_v52 }
 0xa37   : > { %5859 = vtanh.f32 %v2996_v19  ;;  %v2983_v16 = vmul.f32 0.044715, %v2975_v45  ;;  %v2976_v10 = vmul.f32 %v2968_v62, %v7539_v34  ;;  %v5685_v19 = vld [vmem:[%s7933_s14 + $0x70] sm:$0xff]   ;;  %v5687_v62 = vld [vmem:[%s7933_s14 + $0x78] sm:$0xff]  }
 0xa38   : > { %v2993_v14 = vadd.f32 %v2985_v6, %v7526_v55  ;;  %v2986_v22 = vmul.f32 0.044715, %v2978_v11  ;;  %v5686_v45 = vld [vmem:[%s7933_s14 + $0x30] sm:$0xff]   ;;  %4997 = vmatprep.subr.bf16.mxu1 %v5685_v19  ;;  %v5688_v6 = vld [vmem:[%s7933_s14 + $0x38] sm:$0xff]  }
 0xa39   : > { %v2991_v58 = vadd.f32 %v2983_v16, %v7529_v29  ;;  %v2984_v38 = vmul.f32 0.044715, %v2976_v10  ;;  %4998 = vmatpush3.bf16.msra.mxu1 %v5686_v45 }
 0xa3a   : > { %v3001_v49 = vmul.f32 0.7978846, %v2993_v14  ;;  %v2994_v48 = vadd.f32 %v2986_v22, %v7534_v52  ;;  %4999 = vmatprep.subr.bf16.mxu1 %v5687_v62 }
 0xa3b   : > { %v2999_v61 = vmul.f32 0.7978846, %v2991_v58  ;;  %v2992_v50 = vadd.f32 %v2984_v38, %v7539_v34 }
 0xa3c   : > { %5861 = vtanh.f32 %v3001_v49  ;;  %v3002_v2 = vmul.f32 0.7978846, %v2994_v48 }
 0xa3d   : > { %5863 = vtanh.f32 %v2999_v61  ;;  %v3000_v13 = vmul.f32 0.7978846, %v2992_v50  ;;  %5000 = vmatpush3.bf16.msra.mxu1 %v5688_v6 }
 0xa3e   : > { %v5854_v63 = vpop.eup %5853  ;;  %5865 = vtanh.f32 %v3002_v2 }
 0xa3f   : > { %v5856_v54 = vpop.eup %5855  ;;  %v3013_v60 = vadd.f32 1.0, %v5854_v63  ;;  %5867 = vtanh.f32 %v3000_v13 }
 0xa40   : > { %v5858_v26 = vpop.eup %5857  ;;  %v3011_v12 = vadd.f32 1.0, %v5856_v54 }
 0xa41   : > { %v5860_v23 = vpop.eup %5859  ;;  %v3021_v30 = vmul.f32 0.5, %v3013_v60  ;;  %v3014_v33 = vadd.f32 1.0, %v5858_v26 }
 0xa42   : > { %v3012_v24 = vadd.f32 1.0, %v5860_v23  ;;  %v3019_v36 = vmul.f32 0.5, %v3011_v12  ;;  %v5689_v12 = vld [vmem:[#allocation25] sm:$0xff]   ;;  %v5690_v23 = vld [vmem:[#allocation25 + $0x8] sm:$0xff]  }
 0xa43   : > { %v3022_v40 = vmul.f32 0.5, %v3014_v33  ;;  %v3029_v43 = vmul.f32 %v3021_v30, %v7505_v57  ;;  %5277 = vmatprep.subr.bf16.mxu0 %v5689_v12  ;;  %v5691_v30 = vld [vmem:[#allocation25 + $0x10] sm:$0xff]   ;;  %v5692_v33 = vld [vmem:[#allocation25 + $0x18] sm:$0xff]  }
 0xa44   : > { %v3020_v42 = vmul.f32 0.5, %v3012_v24  ;;  %v3027_v47 = vmul.f32 %v3019_v36, %v7507_v39  ;;  %v5693_v24 = vld [vmem:[#allocation25 + $0x20] sm:$0xff]   ;;  %v5694_v36 = vld [vmem:[#allocation25 + $0x28] sm:$0xff]  }
 0xa45   : > { %v3030_v15 = vmul.f32 %v3022_v40, %v7511_v20  ;;  %v5695_v40 = vld [vmem:[#allocation25 + $0x30] sm:$0xff]  }
 0xa46   : > { %v5862_v44 = vpop.eup %5861  ;;  %v3028_v53 = vmul.f32 %v3020_v42, %v7515_v32  ;;  %v5696_v42 = vld [vmem:[#allocation25 + $0x38] sm:$0xff]  }
 0xa47   : > { %v5864_v37 = vpop.eup %5863  ;;  %v3053_v56 = vpack.c.bf16 %v3030_v15, %v3029_v43  ;;  %v3017_v59 = vadd.f32 1.0, %v5862_v44  ;;  %v7582_v15 = vld [vmem:[%s7934_s4] ss:$0 sm:$0xff]  ;;  %s7805_s4 = scalar_lea.hbm %s6738_s19, %s4874_s8 }
 0xa48   : > { %v5866_v28 = vpop.eup %5865  ;;  %v3052_v1 = vpack.c.bf16 %v3028_v53, %v3027_v47  ;;  %v3015_v51 = vadd.f32 1.0, %v5864_v37 }
 0xa49   : > { %v5868_v7 = vpop.eup %5867  ;;  %v3018_v27 = vadd.f32 1.0, %v5866_v28  ;;  %v3025_v4 = vmul.f32 0.5, %v3017_v59 }
 0xa4a   : > { %5269 = vmatprep.mubr.bf16.mxu0 %v3052_v1  ;;  %v3016_v57 = vadd.f32 1.0, %v5868_v7  ;;  %v3023_v5 = vmul.f32 0.5, %v3015_v51 }
 0xa4b   : > { %5270 = vmatmul.mubr.bf16.vlgmr.msra.gmra.mrb[32].mxu0 %v3053_v56  ;;  %v3026_v39 = vmul.f32 0.5, %v3018_v27  ;;  %v3033_v32 = vmul.f32 %v3025_v4, %v7526_v55  ;;  %v4800_v55 = vld [vmem:[#allocation24] ss:$0 sm:$0xff] }
 0xa4c   : > { %v3024_v20 = vmul.f32 0.5, %v3016_v57  ;;  %v3031_v46 = vmul.f32 %v3023_v5, %v7529_v29  ;;  %5278 = vmatpush3.bf16.msra.mxu0 %v5689_v12 }
 0xa4d   : > { %v3034_v3 = vmul.f32 %v3026_v39, %v7534_v52  ;;  %5279 = vmatprep.subr.bf16.mxu0 %v5690_v23 }
 0xa4e   : > { %v3032_v8 = vmul.f32 %v3024_v20, %v7539_v34 }
 0xa4f   : > { %v3055_v9 = vpack.c.bf16 %v3034_v3, %v3033_v32 }
 0xa50   : > { %v3054_v41 = vpack.c.bf16 %v3032_v8, %v3031_v46  ;;  %5280 = vmatpush3.bf16.msra.mxu0 %v5690_v23 }
 0xa51   : > { %5281 = vmatprep.subr.bf16.mxu0 %v5691_v30 }
 0xa52   : > { %5273 = vmatprep.mubr.bf16.mxu0 %v3054_v41 }
 0xa53   : > { %5274 = vmatmul.mubr.bf16.gmra.mrb[36].mxu0 %v3055_v9 }
 0xa54   : > { %5282 = vmatpush3.bf16.msra.mxu0 %v5691_v30 }
 0xa55   : > { %5283 = vmatprep.subr.bf16.mxu0 %v5692_v33 }
 0xa58   : > { %5284 = vmatpush3.bf16.msra.mxu0 %v5692_v33 }
 0xa59   : > { %5285 = vmatprep.subr.bf16.mxu0 %v5693_v24 }
 0xa5c   : > { %5286 = vmatpush3.bf16.msra.mxu0 %v5693_v24 }
 0xa5d   : > { %5287 = vmatprep.subr.bf16.mxu0 %v5694_v36 }
 0xa60   : > { %5288 = vmatpush3.bf16.msra.mxu0 %v5694_v36 }
 0xa61   : > { %5289 = vmatprep.subr.bf16.mxu0 %v5695_v40 }
 0xa64   : > { %5290 = vmatpush3.bf16.msra.mxu0 %v5695_v40 }
 0xa65   : > { %5291 = vmatprep.subr.bf16.mxu0 %v5696_v42 }
 0xa68   : > { %5292 = vmatpush3.bf16.msra.mxu0 %v5696_v42 }
 0xb1e   : > { %v5271_v11 = vpop.f32.mrb[32].mxu0 }
 0xb1f   : > { %v3144_v16 = vpop.f32.mrb[33].mxu0  ;;  %v3153_v10 = vadd.f32 %v5271_v11, %v4800_v55 }
 0xb20   : > { %v5272_v52 = vpop.f32.mrb[34].mxu0  ;;  %v3145_v34 = vadd.f32 %v4800_v55, %v3144_v16 }
 0xb21   : > { %v3156_v29 = vadd.f32 %v5272_v52, %v4800_v55  ;;  %v3147_v14 = vpop.f32.mrb[35].mxu0 }
 0xb22   : > { %v3148_v22 = vadd.f32 %v4800_v55, %v3147_v14 }
 0xb23   : > { %v7565_v58 = vpack.c.bf16 %v3156_v29, %v3153_v10 }
 0xb24   : > { %v7567_v38 = vpack.c.bf16 %v3148_v22, %v3145_v34 }
 0xb26   : > { %v5275_v49 = vpop.f32.mrb[36].mxu0  ;;  %3358 = vmatprep.mubr.bf16.mxu1 %v7567_v38 }
 0xb27   : > { %v3160_v48 = vpop.f32.mrb[37].mxu0  ;;  %3359 = vmatmul.mubr.bf16.vlgmr.msra.gmra.mrb[32].mxu1 %v7315_v25  ;;  %v3169_v50 = vadd.f32 %v5275_v49, %v4800_v55 }
 0xb28   : > { %v5276_v61 = vpop.f32.mrb[38].mxu0  ;;  %3366 = vmatprep.mubr.bf16.mxu1 %v7565_v58  ;;  %v3161_v63 = vadd.f32 %v4800_v55, %v3160_v48 }
 0xb29   : > { %v3172_v2 = vadd.f32 %v5276_v61, %v4800_v55  ;;  %v3163_v13 = vpop.f32.mrb[39].mxu0 }
 0xb2a   : > { %v3164_v54 = vadd.f32 %v4800_v55, %v3163_v13 }
 0xb2b   : > { %v7572_v60 = vpack.c.bf16 %v3172_v2, %v3169_v50 }
 0xb2c   : > { %v7574_v26 = vpack.c.bf16 %v3164_v54, %v3161_v63 }
 0xb2f   : > { %3367 = vmatmul.mubr.bf16.gmra.mrb[36].mxu1 %v7313_v17 }
 0xb30   : > { %3374 = vmatprep.mubr.bf16.mxu1 %v7574_v26 }
 0xb37   : > { %3375 = vmatmul.mubr.bf16.gmra.mrb[40].mxu1 %v7321_v35 }
 0xb38   : > { %3382 = vmatprep.mubr.bf16.mxu1 %v7572_v60 }
 0xb3f   : > { %3383 = vmatmul.mubr.bf16.gmra.mrb[44].mxu1 %v7319_v31 }
 0xbfa   : > { %v5001_v43 = vpop.f32.mrb[32].mxu1 }
 0xbfb   : > { %v5002_v44 = vpop.f32.mrb[33].mxu1 }
 0xbfc   : > { %v5003_v47 = vadd.f32 %v5002_v44, %v5001_v43  ;;  %v5004_v53 = vpop.f32.mrb[34].mxu1 }
 0xbfd   : > { %v5005_v37 = vpop.f32.mrb[35].mxu1 }
 0xbfe   : > { %v7585_v56 = vadd.f32 %v5003_v47, %v7582_v15  ;;  %v5006_v59 = vadd.f32 %v5005_v37, %v5004_v53 }
 0xc00   : > { %v3391_v28 = vmul.f32 %v7585_v56, %v7585_v56  ;;  %v7590_v1 = vadd.f32 %v5006_v59, %v7582_v15 }
 0xc02   : > { %v3399_v51 = vmul.f32 %v3391_v28, %v7585_v56  ;;  %v3392_v7 = vmul.f32 %v7590_v1, %v7590_v1  ;;  %v5007_v27 = vpop.f32.mrb[36].mxu1 }
 0xc03   : > { %v5008_v4 = vpop.f32.mrb[37].mxu1 }
 0xc04   : > { %v3407_v57 = vmul.f32 0.044715, %v3399_v51  ;;  %v3400_v5 = vmul.f32 %v3392_v7, %v7590_v1  ;;  %v5009_v39 = vadd.f32 %v5008_v4, %v5007_v27  ;;  %v5010_v20 = vpop.f32.mrb[38].mxu1 }
 0xc05   : > { %v5011_v32 = vpop.f32.mrb[39].mxu1 }
 0xc06   : > { %v3415_v3 = vadd.f32 %v3407_v57, %v7585_v56  ;;  %v3408_v46 = vmul.f32 0.044715, %v3400_v5  ;;  %v7598_v8 = vadd.f32 %v5009_v39, %v7582_v15  ;;  %v5012_v9 = vadd.f32 %v5011_v32, %v5010_v20 }
 0xc08   : > { %v3423_v41 = vmul.f32 0.7978846, %v3415_v3  ;;  %v3416_v19 = vadd.f32 %v3408_v46, %v7590_v1  ;;  %v3393_v45 = vmul.f32 %v7598_v8, %v7598_v8  ;;  %v7604_v62 = vadd.f32 %v5012_v9, %v7582_v15 }
 0xc0a   : > { %v3424_v6 = vmul.f32 0.7978846, %v3416_v19  ;;  %v3401_v11 = vmul.f32 %v3393_v45, %v7598_v8  ;;  %v3394_v55 = vmul.f32 %v7604_v62, %v7604_v62  ;;  %v5013_v16 = vpop.f32.mrb[40].mxu1  ;;  %5869 = vtanh.f32 %v3423_v41 }
 0xc0b   : > { %v5014_v52 = vpop.f32.mrb[41].mxu1 }
 0xc0c   : > { %v3409_v10 = vmul.f32 0.044715, %v3401_v11  ;;  %v3402_v29 = vmul.f32 %v3394_v55, %v7604_v62  ;;  %v5015_v14 = vadd.f32 %v5014_v52, %v5013_v16  ;;  %v5016_v34 = vpop.f32.mrb[42].mxu1  ;;  %5871 = vtanh.f32 %v3424_v6 }
 0xc0d   : > { %v5017_v22 = vpop.f32.mrb[43].mxu1 }
 0xc0e   : > { %v3417_v49 = vadd.f32 %v3409_v10, %v7598_v8  ;;  %v3410_v48 = vmul.f32 0.044715, %v3402_v29  ;;  %v7612_v61 = vadd.f32 %v5015_v14, %v7582_v15  ;;  %v5018_v50 = vadd.f32 %v5017_v22, %v5016_v34 }
 0xc10   : > { %v3425_v2 = vmul.f32 0.7978846, %v3417_v49  ;;  %v3418_v13 = vadd.f32 %v3410_v48, %v7604_v62  ;;  %v3395_v63 = vmul.f32 %v7612_v61, %v7612_v61  ;;  %v3380_v54 = vadd.f32 %v5018_v50, %v7582_v15 }
 0xc12   : > { %5873 = vtanh.f32 %v3425_v2  ;;  %v3426_v12 = vmul.f32 0.7978846, %v3418_v13  ;;  %v3403_v23 = vmul.f32 %v3395_v63, %v7612_v61  ;;  %v3396_v30 = vmul.f32 %v3380_v54, %v3380_v54  ;;  %v5019_v33 = vpop.f32.mrb[44].mxu1 }
 0xc13   : > { %v5020_v24 = vpop.f32.mrb[45].mxu1 }
 0xc14   : > { %v5870_v36 = vpop.eup %5869  ;;  %5875 = vtanh.f32 %v3426_v12  ;;  %v3411_v40 = vmul.f32 0.044715, %v3403_v23  ;;  %v3404_v42 = vmul.f32 %v3396_v30, %v3380_v54  ;;  %v5021_v43 = vadd.f32 %v5020_v24, %v5019_v33  ;;  %v5022_v44 = vpop.f32.mrb[46].mxu1 }
 0xc15   : > { %v5023_v47 = vpop.f32.mrb[47].mxu1  ;;  %v3439_v53 = vadd.f32 1.0, %v5870_v36 }
 0xc16   : > { %v5872_v37 = vpop.eup %5871  ;;  %v3419_v59 = vadd.f32 %v3411_v40, %v7612_v61  ;;  %v3412_v28 = vmul.f32 0.044715, %v3404_v42  ;;  %v3385_v51 = vadd.f32 %v5021_v43, %v7582_v15  ;;  %v5024_v7 = vadd.f32 %v5023_v47, %v5022_v44 }
 0xc17   : > { %v3440_v27 = vadd.f32 1.0, %v5872_v37  ;;  %v3447_v4 = vmul.f32 0.5, %v3439_v53 }
 0xc18   : > { %v3427_v57 = vmul.f32 0.7978846, %v3419_v59  ;;  %v3420_v5 = vadd.f32 %v3412_v28, %v3380_v54  ;;  %v3397_v39 = vmul.f32 %v3385_v51, %v3385_v51  ;;  %v3388_v20 = vadd.f32 %v5024_v7, %v7582_v15  ;;  %v5697_v59 = vld [vmem:[#allocation27] sm:$0xff]   ;;  %v5698_v28 = vld [vmem:[#allocation27 + $0x8] sm:$0xff]  }
 0xc19   : > { %v3448_v32 = vmul.f32 0.5, %v3440_v27  ;;  %v3455_v41 = vmul.f32 %v3447_v4, %v7585_v56  ;;  %5301 = vmatprep.subr.bf16.mxu1 %v5697_v59  ;;  %v5701_v7 = vld [vmem:[#allocation27 + $0x20] sm:$0xff]   ;;  %v5703_v27 = vld [vmem:[#allocation27 + $0x30] sm:$0xff]   ;;  %v5704_v4 = vld [vmem:[#allocation27 + $0x38] sm:$0xff]  }
 0xc1a   : > { %v3428_v3 = vmul.f32 0.7978846, %v3420_v5  ;;  %v3405_v46 = vmul.f32 %v3397_v39, %v3385_v51  ;;  %v3398_v9 = vmul.f32 %v3388_v20, %v3388_v20  ;;  %5877 = vtanh.f32 %v3427_v57  ;;  %5302 = vmatpush3.bf16.msra.mxu1 %v5697_v59  ;;  %v5707_v57 = vld [vmem:[#allocation30 + $0x4] ss:$8 sps:$4 sm:$0xff]   ;;  %v4826_v5 = vld [vmem:[%s7935_s28] ss:$0 sm:$0xff] }
 0xc1b   : > { %v3456_v19 = vmul.f32 %v3448_v32, %v7590_v1  ;;  %5303 = vmatprep.subr.bf16.mxu1 %v5698_v28  ;;  %s4417_s28 = scalar_lea.sflag [#allocation6], %s1244_s3 }
 0xc1c   : > { %v5874_v45 = vpop.eup %5873  ;;  %v3413_v6 = vmul.f32 0.044715, %v3405_v46  ;;  %v3406_v11 = vmul.f32 %v3398_v9, %v3388_v20  ;;  %5879 = vtanh.f32 %v3428_v3 }
 0xc1d   : > { %v3441_v55 = vadd.f32 1.0, %v5874_v45  ;;  %v3480_v16 = vpack.c.bf16 %v3456_v19, %v3455_v41 }
 0xc1e   : > { %v5876_v52 = vpop.eup %5875  ;;  %v3421_v10 = vadd.f32 %v3413_v6, %v3385_v51  ;;  %v3414_v29 = vmul.f32 0.044715, %v3406_v11  ;;  %5304 = vmatpush3.bf16.msra.mxu1 %v5698_v28 }
 0xc1f   : > { %v3449_v14 = vmul.f32 0.5, %v3441_v55  ;;  %v3442_v15 = vadd.f32 1.0, %v5876_v52  ;;  %5293 = vmatprep.mubr.bf16.mxu0 %v3480_v16 }
 0xc20   : > { %v3429_v34 = vmul.f32 0.7978846, %v3421_v10  ;;  %v3422_v22 = vadd.f32 %v3414_v29, %v3388_v20 }
 0xc21   : > { %v3450_v49 = vmul.f32 0.5, %v3442_v15  ;;  %v3457_v56 = vmul.f32 %v3449_v14, %v7598_v8 }
 0xc22   : > { %v3430_v48 = vmul.f32 0.7978846, %v3422_v22  ;;  %5881 = vtanh.f32 %v3429_v34 }
 0xc23   : > { %v3458_v1 = vmul.f32 %v3450_v49, %v7604_v62 }
 0xc24   : > { %v5878_v50 = vpop.eup %5877  ;;  %5883 = vtanh.f32 %v3430_v48 }
 0xc25   : > { %v3481_v2 = vpack.c.bf16 %v3458_v1, %v3457_v56  ;;  %v3443_v13 = vadd.f32 1.0, %v5878_v50 }
 0xc26   : > { %v5880_v63 = vpop.eup %5879 }
 0xc27   : > { %5294 = vmatmul.mubr.bf16.vlgmr.msra.gmra.mrb[40].mxu0 %v3481_v2  ;;  %v3444_v12 = vadd.f32 1.0, %v5880_v63  ;;  %v3451_v23 = vmul.f32 0.5, %v3443_v13 }
 0xc29   : > { %v3452_v30 = vmul.f32 0.5, %v3444_v12  ;;  %v3459_v33 = vmul.f32 %v3451_v23, %v7612_v61  ;;  %v5699_v61 = vld [vmem:[#allocation27 + $0x10] sm:$0xff]  }
 0xc2a   : > { %5305 = vmatprep.subr.bf16.mxu1 %v5699_v61 }
 0xc2b   : > { %v3460_v24 = vmul.f32 %v3452_v30, %v3380_v54  ;;  %5306 = vmatpush3.bf16.msra.mxu1 %v5699_v61  ;;  %v5700_v54 = vld [vmem:[#allocation27 + $0x18] sm:$0xff]  }
 0xc2c   : > { %v5882_v36 = vpop.eup %5881  ;;  %5307 = vmatprep.subr.bf16.mxu1 %v5700_v54 }
 0xc2d   : > { %v3482_v40 = vpack.c.bf16 %v3460_v24, %v3459_v33  ;;  %v3445_v42 = vadd.f32 1.0, %v5882_v36 }
 0xc2e   : > { %v5884_v43 = vpop.eup %5883 }
 0xc2f   : > { %5297 = vmatprep.mubr.bf16.mxu0 %v3482_v40  ;;  %v3446_v8 = vadd.f32 1.0, %v5884_v43  ;;  %v3453_v44 = vmul.f32 0.5, %v3445_v42  ;;  %5308 = vmatpush3.bf16.msra.mxu1 %v5700_v54 }
 0xc30   : > { %5309 = vmatprep.subr.bf16.mxu1 %v5701_v7 }
 0xc31   : > { %v3454_v62 = vmul.f32 0.5, %v3446_v8  ;;  %v3461_v47 = vmul.f32 %v3453_v44, %v3385_v51  ;;  %v5702_v51 = vld [vmem:[#allocation27 + $0x28] sm:$0xff]  }
 0xc33   : > { %v3462_v53 = vmul.f32 %v3454_v62, %v3388_v20  ;;  %5310 = vmatpush3.bf16.msra.mxu1 %v5701_v7 }
 0xc34   : > { %5311 = vmatprep.subr.bf16.mxu1 %v5702_v51 }
 0xc35   : > { %v3483_v37 = vpack.c.bf16 %v3462_v53, %v3461_v47 }
 0xc37   : > { %5298 = vmatmul.mubr.bf16.gmra.mrb[44].mxu0 %v3483_v37  ;;  %5312 = vmatpush3.bf16.msra.mxu1 %v5702_v51 }
 0xc38   : > { %5313 = vmatprep.subr.bf16.mxu1 %v5703_v27 }
 0xc3b   : > { %5314 = vmatpush3.bf16.msra.mxu1 %v5703_v27 }
 0xc3c   : > { %5315 = vmatprep.subr.bf16.mxu1 %v5704_v4 }
 0xc3f   : > { %5316 = vmatpush3.bf16.msra.mxu1 %v5704_v4 }
 0xc40   : > { %4211 = vmatprep.subr.bf16.mxu1 %v5707_v57 }
 0xcfa   : > { %v5295_v39 = vpop.f32.mrb[40].mxu0 }
 0xcfb   : > { %v7628_v20 = vadd.f32 %v5295_v39, %v4826_v5  ;;  %v3572_v32 = vpop.f32.mrb[41].mxu0 }
 0xcfc   : > { %v7630_v3 = vadd.f32 %v4826_v5, %v3572_v32  ;;  %v5296_v46 = vpop.f32.mrb[42].mxu0 }
 0xcfd   : > { %v3605_v9 = vmul.f32 %v7628_v20, %v7628_v20  ;;  %v7634_v41 = vadd.f32 %v5296_v46, %v4826_v5  ;;  %v3575_v19 = vpop.f32.mrb[43].mxu0 }
 0xcfe   : > { %v3603_v45 = vmul.f32 %v7630_v3, %v7630_v3  ;;  %v7638_v6 = vadd.f32 %v4826_v5, %v3575_v19 }
 0xcff   : > { %v3613_v11 = vmul.f32 %v3605_v9, %v7628_v20  ;;  %v3606_v55 = vmul.f32 %v7634_v41, %v7634_v41 }
 0xd00   : > { %v3611_v16 = vmul.f32 %v3603_v45, %v7630_v3  ;;  %v3604_v52 = vmul.f32 %v7638_v6, %v7638_v6 }
 0xd01   : > { %v3621_v10 = vmul.f32 0.044715, %v3613_v11  ;;  %v3614_v29 = vmul.f32 %v3606_v55, %v7634_v41 }
 0xd02   : > { %v3619_v14 = vmul.f32 0.044715, %v3611_v16  ;;  %v3612_v15 = vmul.f32 %v3604_v52, %v7638_v6 }
 0xd03   : > { %v3629_v34 = vadd.f32 %v3621_v10, %v7628_v20  ;;  %v3622_v22 = vmul.f32 0.044715, %v3614_v29 }
 0xd04   : > { %v3627_v49 = vadd.f32 %v3619_v14, %v7630_v3  ;;  %v3620_v48 = vmul.f32 0.044715, %v3612_v15 }
 0xd05   : > { %v3637_v56 = vmul.f32 0.7978846, %v3629_v34  ;;  %v3630_v1 = vadd.f32 %v3622_v22, %v7634_v41 }
 0xd06   : > { %v3635_v50 = vmul.f32 0.7978846, %v3627_v49  ;;  %v3628_v2 = vadd.f32 %v3620_v48, %v7638_v6 }
 0xd07   : > { %5885 = vtanh.f32 %v3637_v56  ;;  %v3638_v13 = vmul.f32 0.7978846, %v3630_v1 }
 0xd08   : > { %5887 = vtanh.f32 %v3635_v50  ;;  %v3636_v63 = vmul.f32 0.7978846, %v3628_v2  ;;  %v5705_v2 = vld [vmem:[#allocation30] ss:$8 sps:$4 sm:$0xff]  }
 0xd09   : > { %5889 = vtanh.f32 %v3638_v13  ;;  %v5710_v13 = vld [vmem:[#allocation30 + $0x14] ss:$8 sps:$4 sm:$0xff]  }
 0xd0a   : > { %5891 = vtanh.f32 %v3636_v63  ;;  %v5299_v12 = vpop.f32.mrb[44].mxu0  ;;  %v5708_v63 = vld [vmem:[#allocation30 + $0x10] ss:$8 sps:$4 sm:$0xff]  }
 0xd0b   : > { %v7652_v23 = vadd.f32 %v5299_v12, %v4826_v5  ;;  %v3588_v30 = vpop.f32.mrb[45].mxu0 }
 0xd0c   : > { %v7654_v33 = vadd.f32 %v4826_v5, %v3588_v30  ;;  %v5300_v24 = vpop.f32.mrb[46].mxu0 }
 0xd0d   : > { %v3609_v36 = vmul.f32 %v7652_v23, %v7652_v23  ;;  %v7658_v40 = vadd.f32 %v5300_v24, %v4826_v5  ;;  %v3591_v42 = vpop.f32.mrb[47].mxu0 }
 0xd0e   : > { %v3607_v43 = vmul.f32 %v7654_v33, %v7654_v33  ;;  %v7662_v8 = vadd.f32 %v4826_v5, %v3591_v42 }
 0xd0f   : > { %v3617_v44 = vmul.f32 %v3609_v36, %v7652_v23  ;;  %v3610_v62 = vmul.f32 %v7658_v40, %v7658_v40  ;;  %v5711_v36 = vld [vmem:[#allocation30 + $0x20] ss:$8 sps:$4 sm:$0xff]  }
 0xd10   : > { %v3615_v47 = vmul.f32 %v3607_v43, %v7654_v33  ;;  %v3608_v53 = vmul.f32 %v7662_v8, %v7662_v8 }
 0xd11   : > { %v5886_v37 = vpop.eup %5885  ;;  %v3625_v59 = vmul.f32 0.044715, %v3617_v44  ;;  %v3618_v28 = vmul.f32 %v3610_v62, %v7658_v40 }
 0xd12   : > { %v5888_v61 = vpop.eup %5887  ;;  %v3653_v54 = vadd.f32 1.0, %v5886_v37  ;;  %v3623_v7 = vmul.f32 0.044715, %v3615_v47  ;;  %v3616_v51 = vmul.f32 %v3608_v53, %v7662_v8  ;;  %v5714_v37 = vld [vmem:[#allocation30 + $0x30] ss:$8 sps:$4 sm:$0xff]  }
 0xd13   : > { %v5890_v27 = vpop.eup %5889  ;;  %v3633_v4 = vadd.f32 %v3625_v59, %v7652_v23  ;;  %v3626_v57 = vmul.f32 0.044715, %v3618_v28  ;;  %v3651_v5 = vadd.f32 1.0, %v5888_v61  ;;  %v5719_v28 = vld [vmem:[#allocation30 + $0x44] ss:$8 sps:$4 sm:$0xff]  }
 0xd14   : > { %v5892_v39 = vpop.eup %5891  ;;  %v3661_v32 = vmul.f32 0.5, %v3653_v54  ;;  %v3654_v46 = vadd.f32 1.0, %v5890_v27  ;;  %v3631_v9 = vadd.f32 %v3623_v7, %v7654_v33  ;;  %v3624_v19 = vmul.f32 0.044715, %v3616_v51 }
 0xd15   : > { %v3641_v45 = vmul.f32 0.7978846, %v3633_v4  ;;  %v3634_v11 = vadd.f32 %v3626_v57, %v7658_v40  ;;  %v3652_v55 = vadd.f32 1.0, %v5892_v39  ;;  %v3659_v16 = vmul.f32 0.5, %v3651_v5  ;;  %v5717_v57 = vld [vmem:[#allocation30 + $0x40] ss:$8 sps:$4 sm:$0xff]  }
 0xd16   : > { %v3662_v52 = vmul.f32 0.5, %v3654_v46  ;;  %v3639_v10 = vmul.f32 0.7978846, %v3631_v9  ;;  %v3632_v29 = vadd.f32 %v3624_v19, %v7662_v8  ;;  %v3669_v34 = vmul.f32 %v3661_v32, %v7628_v20  ;;  %v5713_v20 = vld [vmem:[#allocation30 + $0x24] ss:$8 sps:$4 sm:$0xff]   ;;  %v5731_v9 = vld [vmem:[#allocation28 + $0x10] sm:$0xff]  }
 0xd17   : > { %5893 = vtanh.f32 %v3641_v45  ;;  %v3642_v14 = vmul.f32 0.7978846, %v3634_v11  ;;  %v3660_v15 = vmul.f32 0.5, %v3652_v55  ;;  %v3667_v48 = vmul.f32 %v3659_v16, %v7630_v3  ;;  %v5722_v5 = vld [vmem:[#allocation30 + $0x54] ss:$8 sps:$4 sm:$0xff]   ;;  %v5729_v32 = vld [vmem:[#allocation28] sm:$0xff]  }
 0xd18   : > { %v3670_v22 = vmul.f32 %v3662_v52, %v7634_v41  ;;  %5895 = vtanh.f32 %v3639_v10  ;;  %v3640_v49 = vmul.f32 0.7978846, %v3632_v29  ;;  %v5720_v39 = vld [vmem:[#allocation30 + $0x50] ss:$8 sps:$4 sm:$0xff]   ;;  %5325 = vmatprep.subr.bf16.mxu0 %v5729_v32  ;;  %v5730_v46 = vld [vmem:[#allocation28 + $0x8] sm:$0xff]   ;;  %v5733_v45 = vld [vmem:[#allocation28 + $0x20] sm:$0xff]  }
 0xd19   : > { %5897 = vtanh.f32 %v3642_v14  ;;  %v3668_v56 = vmul.f32 %v3660_v15, %v7638_v6  ;;  %v5716_v6 = vld [vmem:[#allocation30 + $0x34] ss:$8 sps:$4 sm:$0xff]   ;;  %5326 = vmatpush3.bf16.msra.mxu0 %v5729_v32  ;;  %v5734_v11 = vld [vmem:[#allocation28 + $0x28] sm:$0xff]  }
 0xd1a   : > { %v3693_v1 = vpack.c.bf16 %v3670_v22, %v3669_v34  ;;  %5899 = vtanh.f32 %v3640_v49  ;;  %5327 = vmatprep.subr.bf16.mxu0 %v5730_v46  ;;  %v5732_v19 = vld [vmem:[#allocation28 + $0x18] sm:$0xff]   ;;  %v4835_v16 = vld [vmem:[%s7936_s2] ss:$0 sm:$0xff]  ;;  %s6409_s2 = scalar_lea.vmem %s7807_s16, 128 }
 0xd1b   : > { %v3692_v50 = vpack.c.bf16 %v3668_v56, %v3667_v48  ;;  %v5736_v55 = vld [vmem:[#allocation28 + $0x38] sm:$0xff]   ;;  %p6410_p12 = scmp.ne.s32.totalorder %s7807_s16, %s6409_s2 }
 0xd1d   : > { %5317 = vmatprep.mubr.bf16.mxu1 %v3692_v50  ;;  %5328 = vmatpush3.bf16.msra.mxu0 %v5730_v46  ;;  %p6411_p2 = pnand %p6410_p12, %p7938_p1 }
 0xd1e   : > { %5318 = vmatmul.mubr.bf16.vlgmr.msra.gmra.mrb[48].mxu1 %v3693_v1  ;;  %5329 = vmatprep.subr.bf16.mxu0 %v5731_v9 }
 0xd1f   : > { %4212 = vmatpush1.bf16.msra.mxu1 %v5705_v2  ;;  %p6412_p3 = pneg %p6411_p2 }
 0xd20   : > { %4213 = vmatprep.subr.bf16.mxu1 %v5710_v13 }
 0xd21   : > { %v5894_v12 = vpop.eup %5893  ;;  %5330 = vmatpush3.bf16.msra.mxu0 %v5731_v9 }
 0xd22   : > { %v5896_v41 = vpop.eup %5895  ;;  %v3657_v30 = vadd.f32 1.0, %v5894_v12  ;;  %5331 = vmatprep.subr.bf16.mxu0 %v5732_v19 }
 0xd23   : > { %v5898_v24 = vpop.eup %5897  ;;  %4214 = vmatpush1.bf16.msra.mxu1 %v5708_v63  ;;  %v3655_v3 = vadd.f32 1.0, %v5896_v41 }
 0xd24   : > { %v5900_v42 = vpop.eup %5899  ;;  %4215 = vmatprep.subr.bf16.mxu1 %v5713_v20  ;;  %v3658_v43 = vadd.f32 1.0, %v5898_v24  ;;  %v3665_v44 = vmul.f32 0.5, %v3657_v30 }
 0xd25   : > { %v3656_v62 = vadd.f32 1.0, %v5900_v42  ;;  %v3663_v47 = vmul.f32 0.5, %v3655_v3  ;;  %5332 = vmatpush3.bf16.msra.mxu0 %v5732_v19 }
 0xd26   : > { %v3666_v53 = vmul.f32 0.5, %v3658_v43  ;;  %v3673_v61 = vmul.f32 %v3665_v44, %v7652_v23  ;;  %v5725_v23 = vld [vmem:[#allocation30 + $0x64] ss:$8 sps:$4 sm:$0xff]   ;;  %5333 = vmatprep.subr.bf16.mxu0 %v5733_v45 }
 0xd27   : > { %4216 = vmatpush1.bf16.msra.mxu1 %v5711_v36  ;;  %v3664_v59 = vmul.f32 0.5, %v3656_v62  ;;  %v3671_v7 = vmul.f32 %v3663_v47, %v7654_v33  ;;  %v5728_v33 = vld [vmem:[#allocation30 + $0x74] ss:$8 sps:$4 sm:$0xff]  }
 0xd28   : > { %4217 = vmatprep.subr.bf16.mxu1 %v5716_v6  ;;  %v3674_v54 = vmul.f32 %v3666_v53, %v7658_v40  ;;  %v5723_v40 = vld [vmem:[#allocation30 + $0x60] ss:$8 sps:$4 sm:$0xff]  }
 0xd29   : > { %v3672_v51 = vmul.f32 %v3664_v59, %v7662_v8  ;;  %v5726_v8 = vld [vmem:[#allocation30 + $0x70] ss:$8 sps:$4 sm:$0xff]   ;;  %5334 = vmatpush3.bf16.msra.mxu0 %v5733_v45 }
 0xd2a   : > { %v3695_v27 = vpack.c.bf16 %v3674_v54, %v3673_v61  ;;  %5335 = vmatprep.subr.bf16.mxu0 %v5734_v11 }
 0xd2b   : > { %4218 = vmatpush1.bf16.msra.mxu1 %v5714_v37  ;;  %v3694_v4 = vpack.c.bf16 %v3672_v51, %v3671_v7 }
 0xd2c   : > { %4219 = vmatprep.subr.bf16.mxu1 %v5719_v28 }
 0xd2d   : > { %5321 = vmatprep.mubr.bf16.mxu1 %v3694_v4  ;;  %5336 = vmatpush3.bf16.msra.mxu0 %v5734_v11 }
 0xd2e   : > { %5322 = vmatmul.mubr.bf16.gmra.mrb[52].mxu1 %v3695_v27 }
 0xd2f   : > { %4220 = vmatpush1.bf16.msra.mxu1 %v5717_v57  ;;  %4243 = vmatprep.mubr.bf16.mxu1 %v6563_v0 }
 0xd30   : > { %4221 = vmatprep.subr.bf16.mxu1 %v5722_v5 }
 0xd33   : > { %4222 = vmatpush1.bf16.msra.mxu1 %v5720_v39 }
 0xd34   : > { %4223 = vmatprep.subr.bf16.mxu1 %v5725_v23 }
 0xd37   : > { %4224 = vmatpush1.bf16.msra.mxu1 %v5723_v40 }
 0xd38   : > { %4225 = vmatprep.subr.bf16.mxu1 %v5728_v33 }
 0xd3b   : > { %4226 = vmatpush1.bf16.msra.mxu1 %v5726_v8 }
 0xd3c   : > { %4334 = vmatprep.subr.bf16.mxu1 %v7567_v38  ;;  %v5735_v38 = vld [vmem:[#allocation28 + $0x30] sm:$0xff]  }
 0xd3d   : > { %5337 = vmatprep.subr.bf16.mxu0 %v5735_v38 }
 0xd3e   : > { %5338 = vmatpush3.bf16.msra.mxu0 %v5735_v38 }
 0xd3f   : > { %5339 = vmatprep.subr.bf16.mxu0 %v5736_v55 }
 0xd42   : > { %5340 = vmatpush3.bf16.msra.mxu0 %v5736_v55 }
 0xdf1   : > { %v5319_v52 = vpop.f32.mrb[48].mxu1 }
 0xdf2   : > { %v7687_v10 = vadd.f32 %v5319_v52, %v4835_v16  ;;  %v3784_v29 = vpop.f32.mrb[49].mxu1 }
 0xdf3   : > { %v7689_v14 = vadd.f32 %v4835_v16, %v3784_v29  ;;  %v5320_v15 = vpop.f32.mrb[50].mxu1 }
 0xdf4   : > { %v3817_v34 = vmul.f32 %v7687_v10, %v7687_v10  ;;  %v7693_v22 = vadd.f32 %v5320_v15, %v4835_v16  ;;  %v3787_v49 = vpop.f32.mrb[51].mxu1 }
 0xdf5   : > { %v3815_v48 = vmul.f32 %v7689_v14, %v7689_v14  ;;  %v7697_v56 = vadd.f32 %v4835_v16, %v3787_v49 }
 0xdf6   : > { %v3825_v1 = vmul.f32 %v3817_v34, %v7687_v10  ;;  %v3818_v50 = vmul.f32 %v7693_v22, %v7693_v22 }
 0xdf7   : > { %v3823_v2 = vmul.f32 %v3815_v48, %v7689_v14  ;;  %v3816_v13 = vmul.f32 %v7697_v56, %v7697_v56 }
 0xdf8   : > { %v3833_v63 = vmul.f32 0.044715, %v3825_v1  ;;  %v3826_v20 = vmul.f32 %v3818_v50, %v7693_v22 }
 0xdf9   : > { %v3831_v12 = vmul.f32 0.044715, %v3823_v2  ;;  %v3824_v41 = vmul.f32 %v3816_v13, %v7697_v56 }
 0xdfa   : > { %v3841_v30 = vadd.f32 %v3833_v63, %v7687_v10  ;;  %v3834_v24 = vmul.f32 0.044715, %v3826_v20 }
 0xdfb   : > { %v3839_v36 = vadd.f32 %v3831_v12, %v7689_v14  ;;  %v3832_v3 = vmul.f32 0.044715, %v3824_v41 }
 0xdfc   : > { %v3849_v42 = vmul.f32 0.7978846, %v3841_v30  ;;  %v3842_v6 = vadd.f32 %v3834_v24, %v7693_v22 }
 0xdfd   : > { %v3847_v43 = vmul.f32 0.7978846, %v3839_v36  ;;  %v3840_v44 = vadd.f32 %v3832_v3, %v7697_v56 }
 0xdfe   : > { %5901 = vtanh.f32 %v3849_v42  ;;  %v3850_v62 = vmul.f32 0.7978846, %v3842_v6 }
 0xdff   : > { %5903 = vtanh.f32 %v3847_v43  ;;  %v3848_v47 = vmul.f32 0.7978846, %v3840_v44 }
 0xe00   : > { %5905 = vtanh.f32 %v3850_v62 }
 0xe01   : > { %5907 = vtanh.f32 %v3848_v47  ;;  %v5323_v53 = vpop.f32.mrb[52].mxu1 }
 0xe02   : > { %v7711_v37 = vadd.f32 %v5323_v53, %v4835_v16  ;;  %v3800_v59 = vpop.f32.mrb[53].mxu1 }
 0xe03   : > { %v7713_v28 = vadd.f32 %v4835_v16, %v3800_v59  ;;  %v5324_v61 = vpop.f32.mrb[54].mxu1 }
 0xe04   : > { %v3821_v54 = vmul.f32 %v7711_v37, %v7711_v37  ;;  %v3812_v7 = vadd.f32 %v5324_v61, %v4835_v16  ;;  %v3803_v51 = vpop.f32.mrb[55].mxu1 }
 0xe05   : > { %v3819_v27 = vmul.f32 %v7713_v28, %v7713_v28  ;;  %v3804_v4 = vadd.f32 %v4835_v16, %v3803_v51 }
 0xe06   : > { %v3829_v57 = vmul.f32 %v3821_v54, %v7711_v37  ;;  %v3822_v5 = vmul.f32 %v3812_v7, %v3812_v7 }
 0xe07   : > { %v3827_v39 = vmul.f32 %v3819_v27, %v7713_v28  ;;  %v3820_v23 = vmul.f32 %v3804_v4, %v3804_v4 }
 0xe08   : > { %v5902_v40 = vpop.eup %5901  ;;  %v3837_v33 = vmul.f32 0.044715, %v3829_v57  ;;  %v3830_v8 = vmul.f32 %v3822_v5, %v3812_v7 }
 0xe09   : > { %v5904_v32 = vpop.eup %5903  ;;  %v3865_v46 = vadd.f32 1.0, %v5902_v40  ;;  %v3835_v9 = vmul.f32 0.044715, %v3827_v39  ;;  %v3828_v19 = vmul.f32 %v3820_v23, %v3804_v4  ;;  %v4844_v40 = vld [vmem:[%s6723_s29] ss:$0 sm:$0xff] }
 0xe0a   : > { %v5906_v45 = vpop.eup %5905  ;;  %v3845_v11 = vadd.f32 %v3837_v33, %v7711_v37  ;;  %v3838_v38 = vmul.f32 0.044715, %v3830_v8  ;;  %v3863_v55 = vadd.f32 1.0, %v5904_v32 }
 0xe0b   : > { %v5908_v52 = vpop.eup %5907  ;;  %v3873_v16 = vmul.f32 0.5, %v3865_v46  ;;  %v3866_v29 = vadd.f32 1.0, %v5906_v45  ;;  %v3843_v15 = vadd.f32 %v3835_v9, %v7713_v28  ;;  %v3836_v34 = vmul.f32 0.044715, %v3828_v19 }
 0xe0c   : > { %v3853_v49 = vmul.f32 0.7978846, %v3845_v11  ;;  %v3846_v48 = vadd.f32 %v3838_v38, %v3812_v7  ;;  %v3864_v1 = vadd.f32 1.0, %v5908_v52  ;;  %v3871_v50 = vmul.f32 0.5, %v3863_v55 }
 0xe0d   : > { %v3874_v2 = vmul.f32 0.5, %v3866_v29  ;;  %v3851_v13 = vmul.f32 0.7978846, %v3843_v15  ;;  %v3844_v63 = vadd.f32 %v3836_v34, %v3804_v4  ;;  %v3881_v41 = vmul.f32 %v3873_v16, %v7687_v10 }
 0xe0e   : > { %5909 = vtanh.f32 %v3853_v49  ;;  %v3854_v20 = vmul.f32 0.7978846, %v3846_v48  ;;  %v3872_v12 = vmul.f32 0.5, %v3864_v1  ;;  %v3879_v36 = vmul.f32 %v3871_v50, %v7689_v14 }
 0xe0f   : > { %v3882_v30 = vmul.f32 %v3874_v2, %v7693_v22  ;;  %5911 = vtanh.f32 %v3851_v13  ;;  %v3852_v24 = vmul.f32 0.7978846, %v3844_v63 }
 0xe10   : > { %5913 = vtanh.f32 %v3854_v20  ;;  %v3880_v3 = vmul.f32 %v3872_v12, %v7697_v56 }
 0xe11   : > { %v3905_v42 = vpack.c.bf16 %v3882_v30, %v3881_v41  ;;  %5915 = vtanh.f32 %v3852_v24 }
 0xe12   : > { %v3904_v6 = vpack.c.bf16 %v3880_v3, %v3879_v36 }
 0xe14   : > { %5341 = vmatprep.mubr.bf16.mxu0 %v3904_v6 }
 0xe15   : > { %5342 = vmatmul.mubr.bf16.vlgmr.msra.gmra.mrb[48].mxu0 %v3905_v42 }
 0xe18   : > { %v5910_v43 = vpop.eup %5909 }
 0xe19   : > { %v5912_v44 = vpop.eup %5911  ;;  %v3869_v62 = vadd.f32 1.0, %v5910_v43 }
 0xe1a   : > { %v5914_v47 = vpop.eup %5913  ;;  %v3867_v53 = vadd.f32 1.0, %v5912_v44 }
 0xe1b   : > { %v5916_v10 = vpop.eup %5915  ;;  %v3870_v22 = vadd.f32 1.0, %v5914_v47  ;;  %v3877_v59 = vmul.f32 0.5, %v3869_v62 }
 0xe1c   : > { %v3868_v61 = vadd.f32 1.0, %v5916_v10  ;;  %v3875_v54 = vmul.f32 0.5, %v3867_v53 }
 0xe1d   : > { %v3878_v51 = vmul.f32 0.5, %v3870_v22  ;;  %v3885_v56 = vmul.f32 %v3877_v59, %v7711_v37 }
 0xe1e   : > { %v3876_v14 = vmul.f32 0.5, %v3868_v61  ;;  %v3883_v57 = vmul.f32 %v3875_v54, %v7713_v28 }
 0xe1f   : > { %v3886_v27 = vmul.f32 %v3878_v51, %v3812_v7 }
 0xe20   : > { %v3884_v5 = vmul.f32 %v3876_v14, %v3804_v4 }
 0xe21   : > { %v3907_v39 = vpack.c.bf16 %v3886_v27, %v3885_v56 }
 0xe22   : > { %v3906_v23 = vpack.c.bf16 %v3884_v5, %v3883_v57 }
 0xe24   : > { %5345 = vmatprep.mubr.bf16.mxu0 %v3906_v23 }
 0xe25   : > { %5346 = vmatmul.mubr.bf16.gmra.mrb[52].mxu0 %v3907_v39 }
 0xee8   : > { %v5343_v33 = vpop.f32.mrb[48].mxu0 }
 0xee9   : > { %v7730_v8 = vadd.f32 %v5343_v33, %v4844_v40  ;;  %v3996_v32 = vpop.f32.mrb[49].mxu0 }
 0xeea   : > { %v7732_v46 = vadd.f32 %v4844_v40, %v3996_v32  ;;  %v5344_v9 = vpop.f32.mrb[50].mxu0 }
 0xeeb   : > { %v4029_v19 = vmul.f32 %v7730_v8, %v7730_v8  ;;  %v7736_v37 = vadd.f32 %v5344_v9, %v4844_v40  ;;  %v3999_v7 = vpop.f32.mrb[51].mxu0 }
 0xeec   : > { %v4027_v28 = vmul.f32 %v7732_v46, %v7732_v46  ;;  %v7740_v4 = vadd.f32 %v4844_v40, %v3999_v7 }
 0xeed   : > { %v4037_v45 = vmul.f32 %v4029_v19, %v7730_v8  ;;  %v4030_v11 = vmul.f32 %v7736_v37, %v7736_v37 }
 0xeee   : > { %v4035_v38 = vmul.f32 %v4027_v28, %v7732_v46  ;;  %v4028_v55 = vmul.f32 %v7740_v4, %v7740_v4 }
 0xeef   : > { %v4045_v52 = vmul.f32 0.044715, %v4037_v45  ;;  %v4038_v16 = vmul.f32 %v4030_v11, %v7736_v37 }
 0xef0   : > { %v4043_v29 = vmul.f32 0.044715, %v4035_v38  ;;  %v4036_v15 = vmul.f32 %v4028_v55, %v7740_v4 }
 0xef1   : > { %v4053_v34 = vadd.f32 %v4045_v52, %v7730_v8  ;;  %v4046_v49 = vmul.f32 0.044715, %v4038_v16 }
 0xef2   : > { %v4051_v48 = vadd.f32 %v4043_v29, %v7732_v46  ;;  %v4044_v1 = vmul.f32 0.044715, %v4036_v15 }
 0xef3   : > { %v4061_v50 = vmul.f32 0.7978846, %v4053_v34  ;;  %v4054_v2 = vadd.f32 %v4046_v49, %v7736_v37 }
 0xef4   : > { %v4059_v13 = vmul.f32 0.7978846, %v4051_v48  ;;  %v4052_v63 = vadd.f32 %v4044_v1, %v7740_v4 }
 0xef5   : > { %5917 = vtanh.f32 %v4061_v50  ;;  %v4062_v20 = vmul.f32 0.7978846, %v4054_v2 }
 0xef6   : > { %5919 = vtanh.f32 %v4059_v13  ;;  %v4060_v12 = vmul.f32 0.7978846, %v4052_v63 }
 0xef7   : > { %5921 = vtanh.f32 %v4062_v20 }
 0xef8   : > { %5923 = vtanh.f32 %v4060_v12  ;;  %v5347_v41 = vpop.f32.mrb[52].mxu0 }
 0xef9   : > { %v7754_v30 = vadd.f32 %v5347_v41, %v4844_v40  ;;  %v4012_v24 = vpop.f32.mrb[53].mxu0 }
 0xefa   : > { %v7756_v36 = vadd.f32 %v4844_v40, %v4012_v24  ;;  %v5348_v3 = vpop.f32.mrb[54].mxu0 }
 0xefb   : > { %v4033_v42 = vmul.f32 %v7754_v30, %v7754_v30  ;;  %v7760_v6 = vadd.f32 %v5348_v3, %v4844_v40  ;;  %v4015_v43 = vpop.f32.mrb[55].mxu0 }
 0xefc   : > { %v4031_v44 = vmul.f32 %v7756_v36, %v7756_v36  ;;  %v7764_v62 = vadd.f32 %v4844_v40, %v4015_v43 }
 0xefd   : > { %v4041_v47 = vmul.f32 %v4033_v42, %v7754_v30  ;;  %v4034_v53 = vmul.f32 %v7760_v6, %v7760_v6 }
 0xefe   : > { %v4039_v10 = vmul.f32 %v4031_v44, %v7756_v36  ;;  %v4032_v22 = vmul.f32 %v7764_v62, %v7764_v62 }
 0xeff   : > { %v5918_v59 = vpop.eup %5917  ;;  %v4049_v61 = vmul.f32 0.044715, %v4041_v47  ;;  %v4042_v54 = vmul.f32 %v4034_v53, %v7760_v6 }
 0xf00   : > { %v5920_v51 = vpop.eup %5919  ;;  %v4047_v14 = vmul.f32 0.044715, %v4039_v10  ;;  %v4040_v56 = vmul.f32 %v4032_v22, %v7764_v62  ;;  %v4077_v27 = vadd.f32 1.0, %v5918_v59  ;;  %v4127_v10 = vsub.s32 1, %v7078_v18 }
 0xf01   : > { %v5922_v57 = vpop.eup %5921  ;;  %v4075_v5 = vadd.f32 1.0, %v5920_v51  ;;  %v4057_v39 = vadd.f32 %v4049_v61, %v7754_v30  ;;  %v4050_v23 = vmul.f32 0.044715, %v4042_v54 }
 0xf02   : > { %v5924_v40 = vpop.eup %5923  ;;  %v4055_v33 = vadd.f32 %v4047_v14, %v7756_v36  ;;  %v4048_v32 = vmul.f32 0.044715, %v4040_v56  ;;  %v4078_v9 = vadd.f32 1.0, %v5922_v57  ;;  %v4085_v19 = vmul.f32 0.5, %v4077_v27 }
 0xf03   : > { %v4083_v7 = vmul.f32 0.5, %v4075_v5  ;;  %v4076_v28 = vadd.f32 1.0, %v5924_v40  ;;  %v4065_v45 = vmul.f32 0.7978846, %v4057_v39  ;;  %v4058_v11 = vadd.f32 %v4050_v23, %v7760_v6 }
 0xf04   : > { %v4063_v38 = vmul.f32 0.7978846, %v4055_v33  ;;  %v4056_v55 = vadd.f32 %v4048_v32, %v7764_v62  ;;  %v4086_v52 = vmul.f32 0.5, %v4078_v9  ;;  %v4093_v34 = vmul.f32 %v4085_v19, %v7730_v8 }
 0xf05   : > { %v4084_v16 = vmul.f32 0.5, %v4076_v28  ;;  %5925 = vtanh.f32 %v4065_v45  ;;  %v4066_v29 = vmul.f32 0.7978846, %v4058_v11  ;;  %v4091_v48 = vmul.f32 %v4083_v7, %v7732_v46 }
 0xf06   : > { %5927 = vtanh.f32 %v4063_v38  ;;  %v4064_v15 = vmul.f32 0.7978846, %v4056_v55  ;;  %v4094_v49 = vmul.f32 %v4086_v52, %v7736_v37 }
 0xf07   : > { %v4092_v1 = vmul.f32 %v4084_v16, %v7740_v4  ;;  %5929 = vtanh.f32 %v4066_v29 }
 0xf08   : > { %5931 = vtanh.f32 %v4064_v15  ;;  %v4117_v50 = vpack.c.bf16 %v4094_v49, %v4093_v34 }
 0xf09   : > { %v4116_v2 = vpack.c.bf16 %v4092_v1, %v4091_v48 }
 0xf0b   : > { %4244 = vmatmul.mubr.bf16.vlgmr.msra.gmra.mrb[56].mxu1 %v4116_v2 }
 0xf0c   : > { %4335 = vmatpush1.bf16.xpose.msra.mxu1 %v7315_v25  ;;  %4253 = vmatprep.mubr.bf16.mxu1 %v6563_v0 }
 0xf0d   : > { %4336 = vmatprep.subr.bf16.mxu1 %v7565_v58 }
 0xf0f   : > { %v5926_v13 = vpop.eup %5925 }
 0xf10   : > { %v5928_v63 = vpop.eup %5927  ;;  %v4081_v8 = vadd.f32 1.0, %v5926_v13 }
 0xf11   : > { %v5930_v20 = vpop.eup %5929  ;;  %v4079_v37 = vadd.f32 1.0, %v5928_v63 }
 0xf12   : > { %v5932_v12 = vpop.eup %5931  ;;  %v4082_v46 = vadd.f32 1.0, %v5930_v20  ;;  %v4089_v41 = vmul.f32 0.5, %v4081_v8 }
 0xf13   : > { %4254 = vmatmul.mubr.bf16.gmra.mrb[60].mxu1 %v4117_v50  ;;  %v4080_v4 = vadd.f32 1.0, %v5932_v12  ;;  %v4087_v24 = vmul.f32 0.5, %v4079_v37 }
 0xf14   : > { %4337 = vmatpush1.bf16.xpose.msra.mxu1 %v7313_v17  ;;  %4263 = vmatprep.mubr.bf16.mxu1 %v6563_v0  ;;  %v4090_v25 = vmul.f32 0.5, %v4082_v46  ;;  %v4097_v3 = vmul.f32 %v4089_v41, %v7754_v30  ;;  %v4300_v17 = vld [vmem:[%s7937_s5] sm:$0xff] }
 0xf15   : > { %4338 = vmatprep.subr.bf16.mxu1 %v7574_v26  ;;  %v4088_v58 = vmul.f32 0.5, %v4080_v4  ;;  %v4095_v43 = vmul.f32 %v4087_v24, %v7756_v36  ;;  %v4869_v26 = vcombine.low %v4300_v17, %v4300_v17  ;;  %v4870_v30 = vcombine.high %v4300_v17, %v4300_v17 }
 0xf16   : > { %v4098_v42 = vmul.f32 %v4090_v25, %v7760_v6  ;;  %v4301_v6 = vld [vmem:[%s7937_s5 + $0x8] sm:$0xff]  ;;  %v4319_v4 = vstv %s4318_s11  ;;  %s6413_s11 = sshll.u32 %s6564_s13, 4  ;;  %s6414_s11 = int_to_ptr.vmem [resolvable:$false] %s6413_s11 }
 0xf17   : > { %v4096_v44 = vmul.f32 %v4088_v58, %v7764_v62  ;;  %v4872_v36 = vcombine.high %v4301_v6, %v4301_v6  ;;  %v4115_v62 = vld [vmem:[%s6733_s1] sm:$0x3]  ;;  %v4871_v20 = vcombine.low %v4301_v6, %v4301_v6  ;;  %s6415_s17 = scalar_lea.vmem %s6414_s11, 256  ;;  %p6416_p4 = scmp.lt.s32.totalorder %s7807_s16, %s6414_s11 }
 0xf18   : > { %v4119_v47 = vpack.c.bf16 %v4098_v42, %v4097_v3  ;;  %v4128_v22 = vrot.slane %v4115_v62, %v4127_v10  ;;  %p6417_p7 = scmp.lt.s32.totalorder %s6415_s17, %s6409_s2 }
 0xf19   : > { %v4118_v53 = vpack.c.bf16 %v4096_v44, %v4095_v43  ;;  %4406 = vmatprep.mubr.bf16.mxu0 %v4872_v36 }
 0xf1a   : > { %p6418_p8 = por %p6417_p7, %p6416_p4 }
 0xf1b   : > { %4264 = vmatmul.mubr.bf16.gmra.mrb[64].mxu1 %v4118_v53 }
 0xf1c   : > { %4339 = vmatpush1.bf16.xpose.msra.mxu1 %v7321_v35  ;;  %4273 = vmatprep.mubr.bf16.mxu1 %v6563_v0  ;;  %v4124_v35 = vrot.slane %v4115_v62, %v1307_v21  ;;  %p6419_p11 = pnand %p6418_p8, %p6412_p3 }
 0xf1d   : > { %4340 = vmatprep.subr.bf16.mxu1 %v7572_v60 }
 0xf23   : > { %4274 = vmatmul.mubr.bf16.gmra.mrb[68].mxu1 %v4119_v47 }
 0xf24   : > { %4341 = vmatpush1.bf16.xpose.msra.mxu1 %v7319_v31  ;;  %4366 = vmatprep.mubr.bf16.mxu1 %v4870_v30 }
 0xf2b   : > { %4367 = vmatmul.mubr.bf16.vlgmr.msra.gmra.mrb[72].mxu1 %v4869_v26 }
 0xfde   : > { %v4245_v0 = vpop.f32.mrb[56].mxu1 }
 0xfdf   : > { %v4247_v60 = vpop.f32.mrb[57].mxu1  ;;  %v4246_v61 = vadd.f32 %v4245_v0, %v4124_v35 }
 0xfe0   : > { %v4249_v59 = vpop.f32.mrb[58].mxu1  ;;  %v4248_v51 = vadd.f32 %v4247_v60, %v4128_v22 }
 0xfe1   : > { %v4250_v31 = vadd.f32 %v4249_v59, %v4124_v35  ;;  %v4251_v54 = vpop.f32.mrb[59].mxu1 }
 0xfe2   : > { %v4252_v14 = vadd.f32 %v4251_v54, %v4128_v22 }
 0xfe3   : > { %v4284_v56 = vpack.c.bf16 %v4250_v31, %v4246_v61 }
 0xfe4   : > { %v4285_v27 = vpack.c.bf16 %v4252_v14, %v4248_v51 }
 0xfe6   : > { %v4255_v57 = vpop.f32.mrb[60].mxu1  ;;  %4374 = vmatprep.subr.bf16.mxu0 %v4285_v27 }
 0xfe7   : > { %v4257_v5 = vpop.f32.mrb[61].mxu1  ;;  %4375 = vmatpush1.bf16.xpose.msra.mxu0 %v4284_v56  ;;  %v4256_v23 = vadd.f32 %v4255_v57, %v4124_v35 }
 0xfe8   : > { %v4259_v39 = vpop.f32.mrb[62].mxu1  ;;  %v4258_v21 = vadd.f32 %v4257_v5, %v4128_v22 }
 0xfe9   : > { %v4260_v40 = vadd.f32 %v4259_v39, %v4124_v35  ;;  %v4261_v18 = vpop.f32.mrb[63].mxu1 }
 0xfea   : > { %v4262_v33 = vadd.f32 %v4261_v18, %v4128_v22 }
 0xfeb   : > { %v4286_v32 = vpack.c.bf16 %v4260_v40, %v4256_v23 }
 0xfec   : > { %v4287_v9 = vpack.c.bf16 %v4262_v33, %v4258_v21 }
 0xfee   : > { %v4265_v19 = vpop.f32.mrb[64].mxu1  ;;  %4376 = vmatprep.subr.bf16.mxu0 %v4287_v9 }
 0xfef   : > { %v4267_v7 = vpop.f32.mrb[65].mxu1  ;;  %4377 = vmatpush1.bf16.xpose.msra.mxu0 %v4286_v32  ;;  %v4266_v45 = vadd.f32 %v4265_v19, %v4124_v35 }
 0xff0   : > { %v4269_v28 = vpop.f32.mrb[66].mxu1  ;;  %v4268_v55 = vadd.f32 %v4267_v7, %v4128_v22 }
 0xff1   : > { %v4270_v11 = vadd.f32 %v4269_v28, %v4124_v35  ;;  %v4271_v38 = vpop.f32.mrb[67].mxu1 }
 0xff2   : > { %v4272_v52 = vadd.f32 %v4271_v38, %v4128_v22 }
 0xff3   : > { %v4288_v16 = vpack.c.bf16 %v4270_v11, %v4266_v45 }
 0xff4   : > { %v4289_v29 = vpack.c.bf16 %v4272_v52, %v4268_v55 }
 0xff6   : > { %v4275_v15 = vpop.f32.mrb[68].mxu1  ;;  %4378 = vmatprep.subr.bf16.mxu0 %v4289_v29 }
 0xff7   : > { %v4277_v34 = vpop.f32.mrb[69].mxu1  ;;  %4379 = vmatpush1.bf16.xpose.msra.mxu0 %v4288_v16  ;;  %v4276_v48 = vadd.f32 %v4275_v15, %v4124_v35 }
 0xff8   : > { %v4279_v49 = vpop.f32.mrb[70].mxu1  ;;  %v4278_v2 = vadd.f32 %v4277_v34, %v4128_v22 }
 0xff9   : > { %v4280_v1 = vadd.f32 %v4279_v49, %v4124_v35  ;;  %v4281_v50 = vpop.f32.mrb[71].mxu1 }
 0xffa   : > { %v4282_v13 = vadd.f32 %v4281_v50, %v4128_v22 }
 0xffb   : > { %v4290_v63 = vpack.c.bf16 %v4280_v1, %v4276_v48 }
 0xffc   : > { %v4291_v8 = vpack.c.bf16 %v4282_v13, %v4278_v2 }
 0xffe   : > { %4380 = vmatprep.subr.bf16.mxu0 %v4291_v8  ;;  %v4368_v37 = vpop.f32.mrb[72].mxu1 }
 0xfff   : > { %4381 = vmatpush1.bf16.xpose.msra.mxu0 %v4290_v63  ;;  %v4370_v12 = vpop.f32.mrb[73].mxu1  ;;  %v4369_v24 = vadd.f32 %v4368_v37, %v4319_v4 }
0x1000   : > { %v4371_v46 = vpop.f32.mrb[74].mxu1 }
0x1001   : > { %v4372_v41 = vpop.f32.mrb[75].mxu1 }
0x1006   : > { %4407 = vmatmul.mubr.bf16.vlgmr.msra.gmra.mrb[56].mxu0 %v4871_v20 }
0x10d9   : > { %v4408_v25 = vpop.f32.mrb[56].mxu0 }
0x10da   : > { %v4409_v58 = vadd.f32 %v4408_v25, %v4369_v24  ;;  %v4410_v3 = vpop.f32.mrb[57].mxu0 }
0x10db   : > { %v4411_v42 = vpop.f32.mrb[58].mxu0 }
0x10dc   : > { %v4412_v43 = vpop.f32.mrb[59].mxu0  ;;  %4415 = vst.msk [vmem:[%s1246_s22] sm:$0xff] %vm4414_vm0, %v4409_v58 }
0x10dd   : > { %6422 = shalt.err (!%p6419_p11)
}
0x10de   : > { %s6423_s3 = scalar_lea.hbm %s7805_s4, 128  ;;  %s6427_s8 = scalar_lea.hbm %s6738_s19, 256 }
0x10df   : > { %p6424_p13 = scmp.ne.s32.totalorder %s7805_s4, %s6423_s3  ;;  %p6428_p5 = scmp.lt.u32.totalorder %s7805_s4, %s6738_s19 }
0x10e0   : > { %p6429_p9 = scmp.lt.u32.totalorder %s6427_s8, %s6423_s3  ;;  %p6431_p12 = scmp.lt.u32.totalorder %s6423_s3, %s7805_s4 }
0x10e1   : > { %p6425_p6 = pnand %p6424_p13, %p7938_p1 }
0x10e2   : > { %p6430_p10 = por %p6429_p9, %p6428_p5 }
0x10e3   : > { %p6426_p0 = pneg %p6425_p6 }
0x10e4   : > { %p6432_p2 = por %p6431_p12, %p6430_p10 }
0x10e6   : > { %p6433_p3 = pnand %p6432_p2, %p6426_p0 }
0x10e8   : > { %6436 = shalt.err (!%p6433_p3)
}
0x10e9   : > { %5419 = dma.vmem_to_hbm [thread:$0]  (%p7938_p1), %s7807_s16, 128, %s7805_s4, %s4417_s28  }
0x10ea PF: > { %s7939_s22 = sld [smem:[#allocation63_spill]]  ;;  %s7940_s2 = sld [smem:[#allocation67_spill]] }
0x10eb   : > { %p5511_p4 = scmp.ge.s32.totalorder %s6507_s0, 2 }
0x10f0   : > { %s4442_s13 = sand.u32 1, %s7939_s22   ;;  %p7941_p7 = scmp.ne.s32.totalorder %s7940_s2, 0 }
0x10f1   : > { %s4443_s11 = scalar_lea.sflag [#allocation6], %s4442_s13 }
0x10f2   : > { %p5474_p8 = pnand %p5511_p4, %p7941_p7 }
0x10f4   : > { %6490 = dma.done.wait (!%p5474_p8), %s4443_s11, 128  }
0x10f5   : > { %6492 = vsyncadd (!%p5474_p8), %s4443_s11, 4294967168  ;;  %s7942_s0 = sld [smem:[#allocation65_spill]]  ;;  %s7943_s17 = sld [smem:[#allocation64_spill]] }
0x10f6   : > { %s7944_s11 = sld [smem:[#allocation66_spill]]  ;;  %s7945_s16 = smov %s6499_s7 }
0x10fb   : > { %p87_p11 = scmp.ge.s32.totalorder %s7942_s0, 4   ;;  %s7946_s7 = smov %s7943_s17 }
0x10fd   :  { %89 = sbr.rel (!%p87_p11) target bundleno = 69 (0x45), region = 289 }
0x1104   :  { %4448 = vsyncpa [#allocation5], 1 }
0x1105   :  { %4450 = vsyncpa [#allocation5 + $0x1], 1 }
0x1106   :  { %4451 = vsyncpa [#allocation8], 1 }
0x1107   :  { %4452 = vsyncpa [#allocation11], 1 }
0x1108   :  { %4453 = vsyncpa [#allocation14], 1 }
0x1109   :  { %4454 = vsyncpa [#allocation17], 1 }
0x110a   :  { %4455 = vsyncpa [#allocation20], 1 }
0x110b   :  { %4456 = vsyncpa [#allocation23], 1 }
0x110c   :  { %4457 = vsyncpa [#allocation26], 1 }
0x110d   :  { %4458 = vsyncpa [#allocation29], 1 }
0x110e   :  { %4459 = vsyncpa [#allocation6], 1 }
0x110f   :  { %4461 = vsyncpa [#allocation6 + $0x1], 1 }

</bundles_post_ra>
